<compile_context>
chip_gen: v7x
topology: tpu7x:2x2x1
jax: 0.10.0
libtpu: 0.0.40
codegen_flags: <defaults>
</compile_context>

<pallas_src>
import jax
import jax.numpy as jnp
from jax.experimental import pallas as pl
from jax.experimental.pallas import tpu as pltpu


def _reflect_pad_store(dst_ref, src):
    """Reflect-pad src (H, W, C) by 1 into dst_ref (H+2, W+2, C) via slice stores.

    Every store reads from `src` directly (never from dst_ref), so the border
    stores carry no RAW dependency on the interior store.
    """
    H, W, _ = src.shape
    dst_ref[1:H + 1, 1:W + 1, :] = src
    # Top / bottom rows (mirror without edge repeat).
    dst_ref[0:1, 1:W + 1, :] = src[1:2, :, :]
    dst_ref[H + 1:H + 2, 1:W + 1, :] = src[H - 2:H - 1, :, :]
    # Left / right columns.
    dst_ref[1:H + 1, 0:1, :] = src[:, 1:2, :]
    dst_ref[1:H + 1, W + 1:W + 2, :] = src[:, W - 2:W - 1, :]
    # Corners.
    dst_ref[0:1, 0:1, :] = src[1:2, 1:2, :]
    dst_ref[0:1, W + 1:W + 2, :] = src[1:2, W - 2:W - 1, :]
    dst_ref[H + 1:H + 2, 0:1, :] = src[H - 2:H - 1, 1:2, :]
    dst_ref[H + 1:H + 2, W + 1:W + 2, :] = src[H - 2:H - 1, W - 2:W - 1, :]


def resnet_block_kernel(x_ref, w1_ref, w2_ref, o_ref, pad_sc):
    # x_ref : (1, H, W, C)   unpadded input tile (residual read is aligned)
    # w*_ref: (9, Cin, Cout) per-tap weights, tap order k = ky*3 + kx
    # o_ref : (1, H, W, C)
    # pad_sc: VMEM (H+2, W+2, C) in compute dtype; reused for both convs.
    _, H, W, C = x_ref.shape
    cdt = pad_sc.dtype
    eps = 1e-5

    def conv3x3(w_ref):
        # 9 accumulating MXU matmuls with K=C: no (H*W, 9C) patch is ever
        # materialized; only one (H*W, C) tap is live at a time.  No bias:
        # a bias before non-affine InstanceNorm cancels exactly.
        p = pad_sc[...]                               # (H+2, W+2, C), compute dtype
        acc = jnp.zeros((H * W, C), jnp.float32)
        for ky in range(3):
            for kx in range(3):
                tap = p[ky:ky + H, kx:kx + W, :].reshape(H * W, C)
                acc = acc + jnp.dot(tap, w_ref[ky * 3 + kx],
                                    preferred_element_type=jnp.float32)
        return acc                                    # (H*W, C) f32

    def instance_norm(y):
        # InstanceNorm2d(affine=False): per-channel stats over H*W, biased var.
        # Two-pass (centered) variance for numerical safety; rsqrt lands on EUP.
        inv_n = 1.0 / float(H * W)
        mu = jnp.sum(y, axis=0, keepdims=True) * inv_n
        d = y - mu
        var = jnp.sum(d * d, axis=0, keepdims=True) * inv_n
        return d * jax.lax.rsqrt(var + eps)

    # ReflectionPad2d(1) of the input, done in VMEM with slice stores.
    _reflect_pad_store(pad_sc, x_ref[0].astype(cdt))

    # conv1 -> InstanceNorm -> ReLU.
    y1 = jnp.maximum(instance_norm(conv3x3(w1_ref)), 0.0)
    # TODO(synk): use_dropout=True (nn.Dropout(0.5)) path not implemented.

    # ReflectionPad2d(1) of the intermediate activation, reusing pad_sc.
    _reflect_pad_store(pad_sc, y1.reshape(H, W, C).astype(cdt))

    # conv2 -> InstanceNorm, then residual add with the aligned unpadded tile.
    y2 = instance_norm(conv3x3(w2_ref))
    o_ref[0] = (x_ref[0].astype(jnp.float32)
                + y2.reshape(H, W, C)).astype(o_ref.dtype)


def resnet_block(x, w1, b1, w2, b2, *, compute_dtype=None,
                 vmem_limit_bytes=48 * 1024 * 1024):
    """ResnetBlock forward.  x: (N, H, W, C) NHWC; w*: (Cout, Cin, 3, 3) OIHW.

    b1/b2 are accepted for parity with the PyTorch module but are provably
    no-ops (per-channel bias before InstanceNorm2d(affine=False) cancels), so
    they are not sent to the kernel.  compute_dtype=jnp.bfloat16 stages conv
    operands / scratch in bf16 for the v6e/v7x MXU; accumulation stays f32.
    """
    del b1, b2  # mathematically dead before a non-affine InstanceNorm
    # TODO(synk): padding_type='replicate'/'zero' variants not implemented
    #   (only 'reflect', the default in the target pipelines).
    # TODO(synk): production should use C >= 128 (lane-dense layout); the C=4
    #   self-test below exercises correctness only.
    N, H, W, C = x.shape
    cdt = jnp.dtype(compute_dtype) if compute_dtype is not None else x.dtype

    def prep_w(w):
        # OIHW (Cout, Cin, 3, 3) -> (ky, kx, Cin, Cout) -> (9, Cin, Cout)
        return jnp.transpose(w, (2, 3, 1, 0)).reshape(9, C, C).astype(cdt)

    w1k, w2k = prep_w(w1), prep_w(w2)

    return pl.pallas_call(
        resnet_block_kernel,
        out_shape=jax.ShapeDtypeStruct((N, H, W, C), x.dtype),
        grid_spec=pltpu.PrefetchScalarGridSpec(
            num_scalar_prefetch=0,
            grid=(N,),
            in_specs=[
                pl.BlockSpec((1, H, W, C), lambda n: (n, 0, 0, 0)),
                # Grid-invariant weights: single buffer (no double-buffer copy).
                pl.BlockSpec((9, C, C), lambda n: (0, 0, 0),
                             pipeline_mode=pl.Buffered(1)),
                pl.BlockSpec((9, C, C), lambda n: (0, 0, 0),
                             pipeline_mode=pl.Buffered(1)),
            ],
            out_specs=pl.BlockSpec((1, H, W, C), lambda n: (n, 0, 0, 0)),
            scratch_shapes=[pltpu.VMEM((H + 2, W + 2, C), cdt)],
        ),
        compiler_params=pltpu.CompilerParams(
            dimension_semantics=("parallel",),
            # 48 MiB is safe on every generation (v7x TC has 64 MiB physical);
            # raise toward ~100 MiB on v5e/v6e at production shapes.
            vmem_limit_bytes=vmem_limit_bytes,
        ),
    )(x, w1k, w2k)


def resnet_block_nchw(x_nchw, w1, b1, w2, b2, **kw):
    # NCHW adapter for drop-in parity with the PyTorch module.  Production
    # should stay NHWC end-to-end and skip these two HBM transposes.
    y = resnet_block(jnp.transpose(x_nchw, (0, 2, 3, 1)), w1, b1, w2, b2, **kw)
    return jnp.transpose(y, (0, 3, 1, 2))


def ref_forward(x, w1, b1, w2, b2):
    # Pure-JAX NHWC reference mirroring the PyTorch module (reflect padding,
    # conv+bias, InstanceNorm2d(affine=False), ReLU, residual).
    def conv(t, w, b):
        tp = jnp.pad(t, ((0, 0), (1, 1), (1, 1), (0, 0)), mode="reflect")
        wk = jnp.transpose(w, (2, 3, 1, 0))            # OIHW -> HWIO
        y = jax.lax.conv_general_dilated(
            tp, wk, (1, 1), "VALID", dimension_numbers=("NHWC", "HWIO", "NHWC"))
        return y + b[None, None, None, :]

    def inorm(t, eps=1e-5):
        mu = jnp.mean(t, axis=(1, 2), keepdims=True)
        var = jnp.mean((t - mu) ** 2, axis=(1, 2), keepdims=True)
        return (t - mu) * jax.lax.rsqrt(var + eps)

    y = jnp.maximum(inorm(conv(x, w1, b1)), 0.0)
    y = inorm(conv(y, w2, b2))
    return x + y


if __name__ == "__main__":
    N, C, H, W = 2, 4, 16, 16
    key = jax.random.PRNGKey(0)
    kx, kw1, kb1, kw2, kb2 = jax.random.split(key, 5)

    x = jax.random.normal(kx, (N, H, W, C), dtype=jnp.float32)   # NHWC
    w1 = jax.random.normal(kw1, (C, C, 3, 3), dtype=jnp.float32) * 0.1
    b1 = jax.random.normal(kb1, (C,), dtype=jnp.float32) * 0.1
    w2 = jax.random.normal(kw2, (C, C, 3, 3), dtype=jnp.float32) * 0.1
    b2 = jax.random.normal(kb2, (C,), dtype=jnp.float32) * 0.1

    ref = jax.block_until_ready(ref_forward(x, w1, b1, w2, b2))

    # f32 path: tight tolerance.
    out = jax.block_until_ready(resnet_block(x, w1, b1, w2, b2))
    assert out.shape == (N, H, W, C)
    assert jnp.allclose(out, ref, rtol=1e-3, atol=1e-3), (
        f"f32 max abs err = {jnp.max(jnp.abs(out - ref))}")

    # bf16 staging path (v6e/v7x MXU): looser tolerance, f32 accumulation.
    out_bf = jax.block_until_ready(
        resnet_block(x, w1, b1, w2, b2, compute_dtype=jnp.bfloat16))
    assert jnp.allclose(out_bf, ref, rtol=5e-2, atol=5e-2), (
        f"bf16 max abs err = {jnp.max(jnp.abs(out_bf - ref))}")

    print("KERNEL_OK")
</pallas_src>

<mosaic_0001>
module attributes {stable_mosaic.version = 11 : i64} {
  func.func @resnet_block_kernel(%arg0: i32, %arg1: memref<1x16x16x4xf32, #tpu.memory_space<vmem>>, %arg2: memref<9x4x4xf32, #tpu.memory_space<vmem>>, %arg3: memref<9x4x4xf32, #tpu.memory_space<vmem>>, %arg4: memref<1x16x16x4xf32, #tpu.memory_space<vmem>>, %arg5: memref<18x18x4xf32, #tpu.memory_space<vmem>>) attributes {dimension_semantics = [#tpu.dimension_semantics<parallel>], iteration_bounds = array<i64: 2>, scalar_prefetch = 0 : i64, scratch_operands = 1 : i64, tpu.core_type = #tpu.core_type<tc>, window_params = [{transform_indices = @transform_0, window_bounds = array<i64: 1, 16, 16, 4>}, {pipeline_mode = #tpu.pipeline_mode<synchronous>, transform_indices = @transform_1, window_bounds = array<i64: 9, 4, 4>}, {pipeline_mode = #tpu.pipeline_mode<synchronous>, transform_indices = @transform_2, window_bounds = array<i64: 9, 4, 4>}, {transform_indices = @transform_3, window_bounds = array<i64: 1, 16, 16, 4>}]} {
    %c0 = arith.constant 0 : index
    %c0_0 = arith.constant 0 : index
    %c0_1 = arith.constant 0 : index
    %c0_2 = arith.constant 0 : index
    %0 = vector.load %arg1[%c0, %c0_0, %c0_1, %c0_2] : memref<1x16x16x4xf32, #tpu.memory_space<vmem>>, vector<1x16x16x4xf32>
    %1 = vector.shape_cast %0 : vector<1x16x16x4xf32> to vector<16x16x4xf32>
    %c1 = arith.constant 1 : index
    %c1_3 = arith.constant 1 : index
    %c0_4 = arith.constant 0 : index
    %2 = vector.load %arg5[%c1, %c1_3, %c0_4] : memref<18x18x4xf32, #tpu.memory_space<vmem>>, vector<16x16x4xf32>
    tpu.vector_store %arg5[%c1, %c1_3, %c0_4], %1 {strides = array<i32>} : memref<18x18x4xf32, #tpu.memory_space<vmem>>, vector<16x16x4xf32>,
    %3 = vector.extract_strided_slice %1 {offsets = [1, 0, 0], sizes = [1, 16, 4], strides = [1, 1, 1]} : vector<16x16x4xf32> to vector<1x16x4xf32>
    %c0_5 = arith.constant 0 : index
    %c1_6 = arith.constant 1 : index
    %c0_7 = arith.constant 0 : index
    %4 = vector.load %arg5[%c0_5, %c1_6, %c0_7] : memref<18x18x4xf32, #tpu.memory_space<vmem>>, vector<1x16x4xf32>
    tpu.vector_store %arg5[%c0_5, %c1_6, %c0_7], %3 {strides = array<i32>} : memref<18x18x4xf32, #tpu.memory_space<vmem>>, vector<1x16x4xf32>,
    %5 = vector.extract_strided_slice %1 {offsets = [14, 0, 0], sizes = [1, 16, 4], strides = [1, 1, 1]} : vector<16x16x4xf32> to vector<1x16x4xf32>
    %c17 = arith.constant 17 : index
    %c1_8 = arith.constant 1 : index
    %c0_9 = arith.constant 0 : index
    %6 = vector.load %arg5[%c17, %c1_8, %c0_9] : memref<18x18x4xf32, #tpu.memory_space<vmem>>, vector<1x16x4xf32>
    tpu.vector_store %arg5[%c17, %c1_8, %c0_9], %5 {strides = array<i32>} : memref<18x18x4xf32, #tpu.memory_space<vmem>>, vector<1x16x4xf32>,
    %7 = vector.extract_strided_slice %1 {offsets = [0, 1, 0], sizes = [16, 1, 4], strides = [1, 1, 1]} : vector<16x16x4xf32> to vector<16x1x4xf32>
    %c1_10 = arith.constant 1 : index
    %c0_11 = arith.constant 0 : index
    %c0_12 = arith.constant 0 : index
    %8 = vector.load %arg5[%c1_10, %c0_11, %c0_12] : memref<18x18x4xf32, #tpu.memory_space<vmem>>, vector<16x1x4xf32>
    tpu.vector_store %arg5[%c1_10, %c0_11, %c0_12], %7 {strides = array<i32>} : memref<18x18x4xf32, #tpu.memory_space<vmem>>, vector<16x1x4xf32>,
    %9 = vector.extract_strided_slice %1 {offsets = [0, 14, 0], sizes = [16, 1, 4], strides = [1, 1, 1]} : vector<16x16x4xf32> to vector<16x1x4xf32>
    %c1_13 = arith.constant 1 : index
    %c17_14 = arith.constant 17 : index
    %c0_15 = arith.constant 0 : index
    %10 = vector.load %arg5[%c1_13, %c17_14, %c0_15] : memref<18x18x4xf32, #tpu.memory_space<vmem>>, vector<16x1x4xf32>
    tpu.vector_store %arg5[%c1_13, %c17_14, %c0_15], %9 {strides = array<i32>} : memref<18x18x4xf32, #tpu.memory_space<vmem>>, vector<16x1x4xf32>,
    %11 = vector.extract_strided_slice %1 {offsets = [1, 1, 0], sizes = [1, 1, 4], strides = [1, 1, 1]} : vector<16x16x4xf32> to vector<1x1x4xf32>
    %c0_16 = arith.constant 0 : index
    %c0_17 = arith.constant 0 : index
    %c0_18 = arith.constant 0 : index
    %12 = vector.load %arg5[%c0_16, %c0_17, %c0_18] : memref<18x18x4xf32, #tpu.memory_space<vmem>>, vector<1x1x4xf32>
    tpu.vector_store %arg5[%c0_16, %c0_17, %c0_18], %11 {strides = array<i32>} : memref<18x18x4xf32, #tpu.memory_space<vmem>>, vector<1x1x4xf32>,
    %13 = vector.extract_strided_slice %1 {offsets = [1, 14, 0], sizes = [1, 1, 4], strides = [1, 1, 1]} : vector<16x16x4xf32> to vector<1x1x4xf32>
    %c0_19 = arith.constant 0 : index
    %c17_20 = arith.constant 17 : index
    %c0_21 = arith.constant 0 : index
    %14 = vector.load %arg5[%c0_19, %c17_20, %c0_21] : memref<18x18x4xf32, #tpu.memory_space<vmem>>, vector<1x1x4xf32>
    tpu.vector_store %arg5[%c0_19, %c17_20, %c0_21], %13 {strides = array<i32>} : memref<18x18x4xf32, #tpu.memory_space<vmem>>, vector<1x1x4xf32>,
    %15 = vector.extract_strided_slice %1 {offsets = [14, 1, 0], sizes = [1, 1, 4], strides = [1, 1, 1]} : vector<16x16x4xf32> to vector<1x1x4xf32>
    %c17_22 = arith.constant 17 : index
    %c0_23 = arith.constant 0 : index
    %c0_24 = arith.constant 0 : index
    %16 = vector.load %arg5[%c17_22, %c0_23, %c0_24] : memref<18x18x4xf32, #tpu.memory_space<vmem>>, vector<1x1x4xf32>
    tpu.vector_store %arg5[%c17_22, %c0_23, %c0_24], %15 {strides = array<i32>} : memref<18x18x4xf32, #tpu.memory_space<vmem>>, vector<1x1x4xf32>,
    %17 = vector.extract_strided_slice %1 {offsets = [14, 14, 0], sizes = [1, 1, 4], strides = [1, 1, 1]} : vector<16x16x4xf32> to vector<1x1x4xf32>
    %c17_25 = arith.constant 17 : index
    %c17_26 = arith.constant 17 : index
    %c0_27 = arith.constant 0 : index
    %18 = vector.load %arg5[%c17_25, %c17_26, %c0_27] : memref<18x18x4xf32, #tpu.memory_space<vmem>>, vector<1x1x4xf32>
    tpu.vector_store %arg5[%c17_25, %c17_26, %c0_27], %17 {strides = array<i32>} : memref<18x18x4xf32, #tpu.memory_space<vmem>>, vector<1x1x4xf32>,
    %c0_28 = arith.constant 0 : index
    %c0_29 = arith.constant 0 : index
    %c0_30 = arith.constant 0 : index
    %19 = vector.load %arg5[%c0_28, %c0_29, %c0_30] : memref<18x18x4xf32, #tpu.memory_space<vmem>>, vector<18x18x4xf32>
    %cst = arith.constant 0.000000e+00 : f32
    %20 = vector.broadcast %cst : f32 to vector<256x4xf32>
    %21 = vector.extract_strided_slice %19 {offsets = [0, 0, 0], sizes = [16, 16, 4], strides = [1, 1, 1]} : vector<18x18x4xf32> to vector<16x16x4xf32>
    %22 = vector.shape_cast %21 : vector<16x16x4xf32> to vector<256x4xf32>
    %c0_31 = arith.constant 0 : index
    %c0_32 = arith.constant 0 : index
    %c0_33 = arith.constant 0 : index
    %23 = vector.load %arg2[%c0_31, %c0_32, %c0_33] : memref<9x4x4xf32, #tpu.memory_space<vmem>>, vector<1x4x4xf32>
    %24 = vector.shape_cast %23 : vector<1x4x4xf32> to vector<4x4xf32>
    %cst_34 = arith.constant dense<0.000000e+00> : vector<256x4xf32>
    %25 = tpu.matmul %22, %24, %cst_34 {dimension_numbers = #tpu.dot_dimension_numbers<[1], [0], [0], [1], [0, 0, 1, 1], [], []>} : vector<256x4xf32>, vector<4x4xf32>, vector<256x4xf32> -> vector<256x4xf32>
    %26 = arith.addf %20, %25 : vector<256x4xf32>
    %27 = vector.extract_strided_slice %19 {offsets = [0, 1, 0], sizes = [16, 16, 4], strides = [1, 1, 1]} : vector<18x18x4xf32> to vector<16x16x4xf32>
    %28 = vector.shape_cast %27 : vector<16x16x4xf32> to vector<256x4xf32>
    %c1_35 = arith.constant 1 : index
    %c0_36 = arith.constant 0 : index
    %c0_37 = arith.constant 0 : index
    %29 = vector.load %arg2[%c1_35, %c0_36, %c0_37] : memref<9x4x4xf32, #tpu.memory_space<vmem>>, vector<1x4x4xf32>
    %30 = vector.shape_cast %29 : vector<1x4x4xf32> to vector<4x4xf32>
    %cst_38 = arith.constant dense<0.000000e+00> : vector<256x4xf32>
    %31 = tpu.matmul %28, %30, %cst_38 {dimension_numbers = #tpu.dot_dimension_numbers<[1], [0], [0], [1], [0, 0, 1, 1], [], []>} : vector<256x4xf32>, vector<4x4xf32>, vector<256x4xf32> -> vector<256x4xf32>
    %32 = arith.addf %26, %31 : vector<256x4xf32>
    %33 = vector.extract_strided_slice %19 {offsets = [0, 2, 0], sizes = [16, 16, 4], strides = [1, 1, 1]} : vector<18x18x4xf32> to vector<16x16x4xf32>
    %34 = vector.shape_cast %33 : vector<16x16x4xf32> to vector<256x4xf32>
    %c2 = arith.constant 2 : index
    %c0_39 = arith.constant 0 : index
    %c0_40 = arith.constant 0 : index
    %35 = vector.load %arg2[%c2, %c0_39, %c0_40] : memref<9x4x4xf32, #tpu.memory_space<vmem>>, vector<1x4x4xf32>
    %36 = vector.shape_cast %35 : vector<1x4x4xf32> to vector<4x4xf32>
    %cst_41 = arith.constant dense<0.000000e+00> : vector<256x4xf32>
    %37 = tpu.matmul %34, %36, %cst_41 {dimension_numbers = #tpu.dot_dimension_numbers<[1], [0], [0], [1], [0, 0, 1, 1], [], []>} : vector<256x4xf32>, vector<4x4xf32>, vector<256x4xf32> -> vector<256x4xf32>
    %38 = arith.addf %32, %37 : vector<256x4xf32>
    %39 = vector.extract_strided_slice %19 {offsets = [1, 0, 0], sizes = [16, 16, 4], strides = [1, 1, 1]} : vector<18x18x4xf32> to vector<16x16x4xf32>
    %40 = vector.shape_cast %39 : vector<16x16x4xf32> to vector<256x4xf32>
    %c3 = arith.constant 3 : index
    %c0_42 = arith.constant 0 : index
    %c0_43 = arith.constant 0 : index
    %41 = vector.load %arg2[%c3, %c0_42, %c0_43] : memref<9x4x4xf32, #tpu.memory_space<vmem>>, vector<1x4x4xf32>
    %42 = vector.shape_cast %41 : vector<1x4x4xf32> to vector<4x4xf32>
    %cst_44 = arith.constant dense<0.000000e+00> : vector<256x4xf32>
    %43 = tpu.matmul %40, %42, %cst_44 {dimension_numbers = #tpu.dot_dimension_numbers<[1], [0], [0], [1], [0, 0, 1, 1], [], []>} : vector<256x4xf32>, vector<4x4xf32>, vector<256x4xf32> -> vector<256x4xf32>
    %44 = arith.addf %38, %43 : vector<256x4xf32>
    %45 = vector.extract_strided_slice %19 {offsets = [1, 1, 0], sizes = [16, 16, 4], strides = [1, 1, 1]} : vector<18x18x4xf32> to vector<16x16x4xf32>
    %46 = vector.shape_cast %45 : vector<16x16x4xf32> to vector<256x4xf32>
    %c4 = arith.constant 4 : index
    %c0_45 = arith.constant 0 : index
    %c0_46 = arith.constant 0 : index
    %47 = vector.load %arg2[%c4, %c0_45, %c0_46] : memref<9x4x4xf32, #tpu.memory_space<vmem>>, vector<1x4x4xf32>
    %48 = vector.shape_cast %47 : vector<1x4x4xf32> to vector<4x4xf32>
    %cst_47 = arith.constant dense<0.000000e+00> : vector<256x4xf32>
    %49 = tpu.matmul %46, %48, %cst_47 {dimension_numbers = #tpu.dot_dimension_numbers<[1], [0], [0], [1], [0, 0, 1, 1], [], []>} : vector<256x4xf32>, vector<4x4xf32>, vector<256x4xf32> -> vector<256x4xf32>
    %50 = arith.addf %44, %49 : vector<256x4xf32>
    %51 = vector.extract_strided_slice %19 {offsets = [1, 2, 0], sizes = [16, 16, 4], strides = [1, 1, 1]} : vector<18x18x4xf32> to vector<16x16x4xf32>
    %52 = vector.shape_cast %51 : vector<16x16x4xf32> to vector<256x4xf32>
    %c5 = arith.constant 5 : index
    %c0_48 = arith.constant 0 : index
    %c0_49 = arith.constant 0 : index
    %53 = vector.load %arg2[%c5, %c0_48, %c0_49] : memref<9x4x4xf32, #tpu.memory_space<vmem>>, vector<1x4x4xf32>
    %54 = vector.shape_cast %53 : vector<1x4x4xf32> to vector<4x4xf32>
    %cst_50 = arith.constant dense<0.000000e+00> : vector<256x4xf32>
    %55 = tpu.matmul %52, %54, %cst_50 {dimension_numbers = #tpu.dot_dimension_numbers<[1], [0], [0], [1], [0, 0, 1, 1], [], []>} : vector<256x4xf32>, vector<4x4xf32>, vector<256x4xf32> -> vector<256x4xf32>
    %56 = arith.addf %50, %55 : vector<256x4xf32>
    %57 = vector.extract_strided_slice %19 {offsets = [2, 0, 0], sizes = [16, 16, 4], strides = [1, 1, 1]} : vector<18x18x4xf32> to vector<16x16x4xf32>
    %58 = vector.shape_cast %57 : vector<16x16x4xf32> to vector<256x4xf32>
    %c6 = arith.constant 6 : index
    %c0_51 = arith.constant 0 : index
    %c0_52 = arith.constant 0 : index
    %59 = vector.load %arg2[%c6, %c0_51, %c0_52] : memref<9x4x4xf32, #tpu.memory_space<vmem>>, vector<1x4x4xf32>
    %60 = vector.shape_cast %59 : vector<1x4x4xf32> to vector<4x4xf32>
    %cst_53 = arith.constant dense<0.000000e+00> : vector<256x4xf32>
    %61 = tpu.matmul %58, %60, %cst_53 {dimension_numbers = #tpu.dot_dimension_numbers<[1], [0], [0], [1], [0, 0, 1, 1], [], []>} : vector<256x4xf32>, vector<4x4xf32>, vector<256x4xf32> -> vector<256x4xf32>
    %62 = arith.addf %56, %61 : vector<256x4xf32>
    %63 = vector.extract_strided_slice %19 {offsets = [2, 1, 0], sizes = [16, 16, 4], strides = [1, 1, 1]} : vector<18x18x4xf32> to vector<16x16x4xf32>
    %64 = vector.shape_cast %63 : vector<16x16x4xf32> to vector<256x4xf32>
    %c7 = arith.constant 7 : index
    %c0_54 = arith.constant 0 : index
    %c0_55 = arith.constant 0 : index
    %65 = vector.load %arg2[%c7, %c0_54, %c0_55] : memref<9x4x4xf32, #tpu.memory_space<vmem>>, vector<1x4x4xf32>
    %66 = vector.shape_cast %65 : vector<1x4x4xf32> to vector<4x4xf32>
    %cst_56 = arith.constant dense<0.000000e+00> : vector<256x4xf32>
    %67 = tpu.matmul %64, %66, %cst_56 {dimension_numbers = #tpu.dot_dimension_numbers<[1], [0], [0], [1], [0, 0, 1, 1], [], []>} : vector<256x4xf32>, vector<4x4xf32>, vector<256x4xf32> -> vector<256x4xf32>
    %68 = arith.addf %62, %67 : vector<256x4xf32>
    %69 = vector.extract_strided_slice %19 {offsets = [2, 2, 0], sizes = [16, 16, 4], strides = [1, 1, 1]} : vector<18x18x4xf32> to vector<16x16x4xf32>
    %70 = vector.shape_cast %69 : vector<16x16x4xf32> to vector<256x4xf32>
    %c8 = arith.constant 8 : index
    %c0_57 = arith.constant 0 : index
    %c0_58 = arith.constant 0 : index
    %71 = vector.load %arg2[%c8, %c0_57, %c0_58] : memref<9x4x4xf32, #tpu.memory_space<vmem>>, vector<1x4x4xf32>
    %72 = vector.shape_cast %71 : vector<1x4x4xf32> to vector<4x4xf32>
    %cst_59 = arith.constant dense<0.000000e+00> : vector<256x4xf32>
    %73 = tpu.matmul %70, %72, %cst_59 {dimension_numbers = #tpu.dot_dimension_numbers<[1], [0], [0], [1], [0, 0, 1, 1], [], []>} : vector<256x4xf32>, vector<4x4xf32>, vector<256x4xf32> -> vector<256x4xf32>
    %74 = arith.addf %68, %73 : vector<256x4xf32>
    %cst_60 = arith.constant dense<0.000000e+00> : vector<4xf32>
    %75 = vector.multi_reduction <add>, %74, %cst_60 [0] : vector<256x4xf32> to vector<4xf32>
    %76 = vector.shape_cast %75 : vector<4xf32> to vector<1x4xf32>
    %cst_61 = arith.constant 3.906250e-03 : f32
    %77 = vector.broadcast %cst_61 : f32 to vector<1x4xf32>
    %78 = arith.mulf %76, %77 : vector<1x4xf32>
    %79 = vector.broadcast %78 : vector<1x4xf32> to vector<256x4xf32>
    %80 = arith.subf %74, %79 : vector<256x4xf32>
    %81 = arith.mulf %80, %80 : vector<256x4xf32>
    %cst_62 = arith.constant dense<0.000000e+00> : vector<4xf32>
    %82 = vector.multi_reduction <add>, %81, %cst_62 [0] : vector<256x4xf32> to vector<4xf32>
    %83 = vector.shape_cast %82 : vector<4xf32> to vector<1x4xf32>
    %cst_63 = arith.constant 3.906250e-03 : f32
    %84 = vector.broadcast %cst_63 : f32 to vector<1x4xf32>
    %85 = arith.mulf %83, %84 : vector<1x4xf32>
    %cst_64 = arith.constant 9.99999974E-6 : f32
    %86 = vector.broadcast %cst_64 : f32 to vector<1x4xf32>
    %87 = arith.addf %85, %86 : vector<1x4xf32>
    %88 = math.rsqrt %87 : vector<1x4xf32>
    %89 = vector.broadcast %88 : vector<1x4xf32> to vector<256x4xf32>
    %90 = arith.mulf %80, %89 : vector<256x4xf32>
    %cst_65 = arith.constant 0.000000e+00 : f32
    %91 = vector.broadcast %cst_65 : f32 to vector<256x4xf32>
    %92 = arith.maximumf %90, %91 : vector<256x4xf32>
    %93 = vector.shape_cast %92 : vector<256x4xf32> to vector<16x16x4xf32>
    %c1_66 = arith.constant 1 : index
    %c1_67 = arith.constant 1 : index
    %c0_68 = arith.constant 0 : index
    %94 = vector.load %arg5[%c1_66, %c1_67, %c0_68] : memref<18x18x4xf32, #tpu.memory_space<vmem>>, vector<16x16x4xf32>
    tpu.vector_store %arg5[%c1_66, %c1_67, %c0_68], %93 {strides = array<i32>} : memref<18x18x4xf32, #tpu.memory_space<vmem>>, vector<16x16x4xf32>,
    %95 = vector.extract_strided_slice %93 {offsets = [1, 0, 0], sizes = [1, 16, 4], strides = [1, 1, 1]} : vector<16x16x4xf32> to vector<1x16x4xf32>
    %c0_69 = arith.constant 0 : index
    %c1_70 = arith.constant 1 : index
    %c0_71 = arith.constant 0 : index
    %96 = vector.load %arg5[%c0_69, %c1_70, %c0_71] : memref<18x18x4xf32, #tpu.memory_space<vmem>>, vector<1x16x4xf32>
    tpu.vector_store %arg5[%c0_69, %c1_70, %c0_71], %95 {strides = array<i32>} : memref<18x18x4xf32, #tpu.memory_space<vmem>>, vector<1x16x4xf32>,
    %97 = vector.extract_strided_slice %93 {offsets = [14, 0, 0], sizes = [1, 16, 4], strides = [1, 1, 1]} : vector<16x16x4xf32> to vector<1x16x4xf32>
    %c17_72 = arith.constant 17 : index
    %c1_73 = arith.constant 1 : index
    %c0_74 = arith.constant 0 : index
    %98 = vector.load %arg5[%c17_72, %c1_73, %c0_74] : memref<18x18x4xf32, #tpu.memory_space<vmem>>, vector<1x16x4xf32>
    tpu.vector_store %arg5[%c17_72, %c1_73, %c0_74], %97 {strides = array<i32>} : memref<18x18x4xf32, #tpu.memory_space<vmem>>, vector<1x16x4xf32>,
    %99 = vector.extract_strided_slice %93 {offsets = [0, 1, 0], sizes = [16, 1, 4], strides = [1, 1, 1]} : vector<16x16x4xf32> to vector<16x1x4xf32>
    %c1_75 = arith.constant 1 : index
    %c0_76 = arith.constant 0 : index
    %c0_77 = arith.constant 0 : index
    %100 = vector.load %arg5[%c1_75, %c0_76, %c0_77] : memref<18x18x4xf32, #tpu.memory_space<vmem>>, vector<16x1x4xf32>
    tpu.vector_store %arg5[%c1_75, %c0_76, %c0_77], %99 {strides = array<i32>} : memref<18x18x4xf32, #tpu.memory_space<vmem>>, vector<16x1x4xf32>,
    %101 = vector.extract_strided_slice %93 {offsets = [0, 14, 0], sizes = [16, 1, 4], strides = [1, 1, 1]} : vector<16x16x4xf32> to vector<16x1x4xf32>
    %c1_78 = arith.constant 1 : index
    %c17_79 = arith.constant 17 : index
    %c0_80 = arith.constant 0 : index
    %102 = vector.load %arg5[%c1_78, %c17_79, %c0_80] : memref<18x18x4xf32, #tpu.memory_space<vmem>>, vector<16x1x4xf32>
    tpu.vector_store %arg5[%c1_78, %c17_79, %c0_80], %101 {strides = array<i32>} : memref<18x18x4xf32, #tpu.memory_space<vmem>>, vector<16x1x4xf32>,
    %103 = vector.extract_strided_slice %93 {offsets = [1, 1, 0], sizes = [1, 1, 4], strides = [1, 1, 1]} : vector<16x16x4xf32> to vector<1x1x4xf32>
    %c0_81 = arith.constant 0 : index
    %c0_82 = arith.constant 0 : index
    %c0_83 = arith.constant 0 : index
    %104 = vector.load %arg5[%c0_81, %c0_82, %c0_83] : memref<18x18x4xf32, #tpu.memory_space<vmem>>, vector<1x1x4xf32>
    tpu.vector_store %arg5[%c0_81, %c0_82, %c0_83], %103 {strides = array<i32>} : memref<18x18x4xf32, #tpu.memory_space<vmem>>, vector<1x1x4xf32>,
    %105 = vector.extract_strided_slice %93 {offsets = [1, 14, 0], sizes = [1, 1, 4], strides = [1, 1, 1]} : vector<16x16x4xf32> to vector<1x1x4xf32>
    %c0_84 = arith.constant 0 : index
    %c17_85 = arith.constant 17 : index
    %c0_86 = arith.constant 0 : index
    %106 = vector.load %arg5[%c0_84, %c17_85, %c0_86] : memref<18x18x4xf32, #tpu.memory_space<vmem>>, vector<1x1x4xf32>
    tpu.vector_store %arg5[%c0_84, %c17_85, %c0_86], %105 {strides = array<i32>} : memref<18x18x4xf32, #tpu.memory_space<vmem>>, vector<1x1x4xf32>,
    %107 = vector.extract_strided_slice %93 {offsets = [14, 1, 0], sizes = [1, 1, 4], strides = [1, 1, 1]} : vector<16x16x4xf32> to vector<1x1x4xf32>
    %c17_87 = arith.constant 17 : index
    %c0_88 = arith.constant 0 : index
    %c0_89 = arith.constant 0 : index
    %108 = vector.load %arg5[%c17_87, %c0_88, %c0_89] : memref<18x18x4xf32, #tpu.memory_space<vmem>>, vector<1x1x4xf32>
    tpu.vector_store %arg5[%c17_87, %c0_88, %c0_89], %107 {strides = array<i32>} : memref<18x18x4xf32, #tpu.memory_space<vmem>>, vector<1x1x4xf32>,
    %109 = vector.extract_strided_slice %93 {offsets = [14, 14, 0], sizes = [1, 1, 4], strides = [1, 1, 1]} : vector<16x16x4xf32> to vector<1x1x4xf32>
    %c17_90 = arith.constant 17 : index
    %c17_91 = arith.constant 17 : index
    %c0_92 = arith.constant 0 : index
    %110 = vector.load %arg5[%c17_90, %c17_91, %c0_92] : memref<18x18x4xf32, #tpu.memory_space<vmem>>, vector<1x1x4xf32>
    tpu.vector_store %arg5[%c17_90, %c17_91, %c0_92], %109 {strides = array<i32>} : memref<18x18x4xf32, #tpu.memory_space<vmem>>, vector<1x1x4xf32>,
    %c0_93 = arith.constant 0 : index
    %c0_94 = arith.constant 0 : index
    %c0_95 = arith.constant 0 : index
    %111 = vector.load %arg5[%c0_93, %c0_94, %c0_95] : memref<18x18x4xf32, #tpu.memory_space<vmem>>, vector<18x18x4xf32>
    %cst_96 = arith.constant 0.000000e+00 : f32
    %112 = vector.broadcast %cst_96 : f32 to vector<256x4xf32>
    %113 = vector.extract_strided_slice %111 {offsets = [0, 0, 0], sizes = [16, 16, 4], strides = [1, 1, 1]} : vector<18x18x4xf32> to vector<16x16x4xf32>
    %114 = vector.shape_cast %113 : vector<16x16x4xf32> to vector<256x4xf32>
    %c0_97 = arith.constant 0 : index
    %c0_98 = arith.constant 0 : index
    %c0_99 = arith.constant 0 : index
    %115 = vector.load %arg3[%c0_97, %c0_98, %c0_99] : memref<9x4x4xf32, #tpu.memory_space<vmem>>, vector<1x4x4xf32>
    %116 = vector.shape_cast %115 : vector<1x4x4xf32> to vector<4x4xf32>
    %cst_100 = arith.constant dense<0.000000e+00> : vector<256x4xf32>
    %117 = tpu.matmul %114, %116, %cst_100 {dimension_numbers = #tpu.dot_dimension_numbers<[1], [0], [0], [1], [0, 0, 1, 1], [], []>} : vector<256x4xf32>, vector<4x4xf32>, vector<256x4xf32> -> vector<256x4xf32>
    %118 = arith.addf %112, %117 : vector<256x4xf32>
    %119 = vector.extract_strided_slice %111 {offsets = [0, 1, 0], sizes = [16, 16, 4], strides = [1, 1, 1]} : vector<18x18x4xf32> to vector<16x16x4xf32>
    %120 = vector.shape_cast %119 : vector<16x16x4xf32> to vector<256x4xf32>
    %c1_101 = arith.constant 1 : index
    %c0_102 = arith.constant 0 : index
    %c0_103 = arith.constant 0 : index
    %121 = vector.load %arg3[%c1_101, %c0_102, %c0_103] : memref<9x4x4xf32, #tpu.memory_space<vmem>>, vector<1x4x4xf32>
    %122 = vector.shape_cast %121 : vector<1x4x4xf32> to vector<4x4xf32>
    %cst_104 = arith.constant dense<0.000000e+00> : vector<256x4xf32>
    %123 = tpu.matmul %120, %122, %cst_104 {dimension_numbers = #tpu.dot_dimension_numbers<[1], [0], [0], [1], [0, 0, 1, 1], [], []>} : vector<256x4xf32>, vector<4x4xf32>, vector<256x4xf32> -> vector<256x4xf32>
    %124 = arith.addf %118, %123 : vector<256x4xf32>
    %125 = vector.extract_strided_slice %111 {offsets = [0, 2, 0], sizes = [16, 16, 4], strides = [1, 1, 1]} : vector<18x18x4xf32> to vector<16x16x4xf32>
    %126 = vector.shape_cast %125 : vector<16x16x4xf32> to vector<256x4xf32>
    %c2_105 = arith.constant 2 : index
    %c0_106 = arith.constant 0 : index
    %c0_107 = arith.constant 0 : index
    %127 = vector.load %arg3[%c2_105, %c0_106, %c0_107] : memref<9x4x4xf32, #tpu.memory_space<vmem>>, vector<1x4x4xf32>
    %128 = vector.shape_cast %127 : vector<1x4x4xf32> to vector<4x4xf32>
    %cst_108 = arith.constant dense<0.000000e+00> : vector<256x4xf32>
    %129 = tpu.matmul %126, %128, %cst_108 {dimension_numbers = #tpu.dot_dimension_numbers<[1], [0], [0], [1], [0, 0, 1, 1], [], []>} : vector<256x4xf32>, vector<4x4xf32>, vector<256x4xf32> -> vector<256x4xf32>
    %130 = arith.addf %124, %129 : vector<256x4xf32>
    %131 = vector.extract_strided_slice %111 {offsets = [1, 0, 0], sizes = [16, 16, 4], strides = [1, 1, 1]} : vector<18x18x4xf32> to vector<16x16x4xf32>
    %132 = vector.shape_cast %131 : vector<16x16x4xf32> to vector<256x4xf32>
    %c3_109 = arith.constant 3 : index
    %c0_110 = arith.constant 0 : index
    %c0_111 = arith.constant 0 : index
    %133 = vector.load %arg3[%c3_109, %c0_110, %c0_111] : memref<9x4x4xf32, #tpu.memory_space<vmem>>, vector<1x4x4xf32>
    %134 = vector.shape_cast %133 : vector<1x4x4xf32> to vector<4x4xf32>
    %cst_112 = arith.constant dense<0.000000e+00> : vector<256x4xf32>
    %135 = tpu.matmul %132, %134, %cst_112 {dimension_numbers = #tpu.dot_dimension_numbers<[1], [0], [0], [1], [0, 0, 1, 1], [], []>} : vector<256x4xf32>, vector<4x4xf32>, vector<256x4xf32> -> vector<256x4xf32>
    %136 = arith.addf %130, %135 : vector<256x4xf32>
    %137 = vector.extract_strided_slice %111 {offsets = [1, 1, 0], sizes = [16, 16, 4], strides = [1, 1, 1]} : vector<18x18x4xf32> to vector<16x16x4xf32>
    %138 = vector.shape_cast %137 : vector<16x16x4xf32> to vector<256x4xf32>
    %c4_113 = arith.constant 4 : index
    %c0_114 = arith.constant 0 : index
    %c0_115 = arith.constant 0 : index
    %139 = vector.load %arg3[%c4_113, %c0_114, %c0_115] : memref<9x4x4xf32, #tpu.memory_space<vmem>>, vector<1x4x4xf32>
    %140 = vector.shape_cast %139 : vector<1x4x4xf32> to vector<4x4xf32>
    %cst_116 = arith.constant dense<0.000000e+00> : vector<256x4xf32>
    %141 = tpu.matmul %138, %140, %cst_116 {dimension_numbers = #tpu.dot_dimension_numbers<[1], [0], [0], [1], [0, 0, 1, 1], [], []>} : vector<256x4xf32>, vector<4x4xf32>, vector<256x4xf32> -> vector<256x4xf32>
    %142 = arith.addf %136, %141 : vector<256x4xf32>
    %143 = vector.extract_strided_slice %111 {offsets = [1, 2, 0], sizes = [16, 16, 4], strides = [1, 1, 1]} : vector<18x18x4xf32> to vector<16x16x4xf32>
    %144 = vector.shape_cast %143 : vector<16x16x4xf32> to vector<256x4xf32>
    %c5_117 = arith.constant 5 : index
    %c0_118 = arith.constant 0 : index
    %c0_119 = arith.constant 0 : index
    %145 = vector.load %arg3[%c5_117, %c0_118, %c0_119] : memref<9x4x4xf32, #tpu.memory_space<vmem>>, vector<1x4x4xf32>
    %146 = vector.shape_cast %145 : vector<1x4x4xf32> to vector<4x4xf32>
    %cst_120 = arith.constant dense<0.000000e+00> : vector<256x4xf32>
    %147 = tpu.matmul %144, %146, %cst_120 {dimension_numbers = #tpu.dot_dimension_numbers<[1], [0], [0], [1], [0, 0, 1, 1], [], []>} : vector<256x4xf32>, vector<4x4xf32>, vector<256x4xf32> -> vector<256x4xf32>
    %148 = arith.addf %142, %147 : vector<256x4xf32>
    %149 = vector.extract_strided_slice %111 {offsets = [2, 0, 0], sizes = [16, 16, 4], strides = [1, 1, 1]} : vector<18x18x4xf32> to vector<16x16x4xf32>
    %150 = vector.shape_cast %149 : vector<16x16x4xf32> to vector<256x4xf32>
    %c6_121 = arith.constant 6 : index
    %c0_122 = arith.constant 0 : index
    %c0_123 = arith.constant 0 : index
    %151 = vector.load %arg3[%c6_121, %c0_122, %c0_123] : memref<9x4x4xf32, #tpu.memory_space<vmem>>, vector<1x4x4xf32>
    %152 = vector.shape_cast %151 : vector<1x4x4xf32> to vector<4x4xf32>
    %cst_124 = arith.constant dense<0.000000e+00> : vector<256x4xf32>
    %153 = tpu.matmul %150, %152, %cst_124 {dimension_numbers = #tpu.dot_dimension_numbers<[1], [0], [0], [1], [0, 0, 1, 1], [], []>} : vector<256x4xf32>, vector<4x4xf32>, vector<256x4xf32> -> vector<256x4xf32>
    %154 = arith.addf %148, %153 : vector<256x4xf32>
    %155 = vector.extract_strided_slice %111 {offsets = [2, 1, 0], sizes = [16, 16, 4], strides = [1, 1, 1]} : vector<18x18x4xf32> to vector<16x16x4xf32>
    %156 = vector.shape_cast %155 : vector<16x16x4xf32> to vector<256x4xf32>
    %c7_125 = arith.constant 7 : index
    %c0_126 = arith.constant 0 : index
    %c0_127 = arith.constant 0 : index
    %157 = vector.load %arg3[%c7_125, %c0_126, %c0_127] : memref<9x4x4xf32, #tpu.memory_space<vmem>>, vector<1x4x4xf32>
    %158 = vector.shape_cast %157 : vector<1x4x4xf32> to vector<4x4xf32>
    %cst_128 = arith.constant dense<0.000000e+00> : vector<256x4xf32>
    %159 = tpu.matmul %156, %158, %cst_128 {dimension_numbers = #tpu.dot_dimension_numbers<[1], [0], [0], [1], [0, 0, 1, 1], [], []>} : vector<256x4xf32>, vector<4x4xf32>, vector<256x4xf32> -> vector<256x4xf32>
    %160 = arith.addf %154, %159 : vector<256x4xf32>
    %161 = vector.extract_strided_slice %111 {offsets = [2, 2, 0], sizes = [16, 16, 4], strides = [1, 1, 1]} : vector<18x18x4xf32> to vector<16x16x4xf32>
    %162 = vector.shape_cast %161 : vector<16x16x4xf32> to vector<256x4xf32>
    %c8_129 = arith.constant 8 : index
    %c0_130 = arith.constant 0 : index
    %c0_131 = arith.constant 0 : index
    %163 = vector.load %arg3[%c8_129, %c0_130, %c0_131] : memref<9x4x4xf32, #tpu.memory_space<vmem>>, vector<1x4x4xf32>
    %164 = vector.shape_cast %163 : vector<1x4x4xf32> to vector<4x4xf32>
    %cst_132 = arith.constant dense<0.000000e+00> : vector<256x4xf32>
    %165 = tpu.matmul %162, %164, %cst_132 {dimension_numbers = #tpu.dot_dimension_numbers<[1], [0], [0], [1], [0, 0, 1, 1], [], []>} : vector<256x4xf32>, vector<4x4xf32>, vector<256x4xf32> -> vector<256x4xf32>
    %166 = arith.addf %160, %165 : vector<256x4xf32>
    %cst_133 = arith.constant dense<0.000000e+00> : vector<4xf32>
    %167 = vector.multi_reduction <add>, %166, %cst_133 [0] : vector<256x4xf32> to vector<4xf32>
    %168 = vector.shape_cast %167 : vector<4xf32> to vector<1x4xf32>
    %cst_134 = arith.constant 3.906250e-03 : f32
    %169 = vector.broadcast %cst_134 : f32 to vector<1x4xf32>
    %170 = arith.mulf %168, %169 : vector<1x4xf32>
    %171 = vector.broadcast %170 : vector<1x4xf32> to vector<256x4xf32>
    %172 = arith.subf %166, %171 : vector<256x4xf32>
    %173 = arith.mulf %172, %172 : vector<256x4xf32>
    %cst_135 = arith.constant dense<0.000000e+00> : vector<4xf32>
    %174 = vector.multi_reduction <add>, %173, %cst_135 [0] : vector<256x4xf32> to vector<4xf32>
    %175 = vector.shape_cast %174 : vector<4xf32> to vector<1x4xf32>
    %cst_136 = arith.constant 3.906250e-03 : f32
    %176 = vector.broadcast %cst_136 : f32 to vector<1x4xf32>
    %177 = arith.mulf %175, %176 : vector<1x4xf32>
    %cst_137 = arith.constant 9.99999974E-6 : f32
    %178 = vector.broadcast %cst_137 : f32 to vector<1x4xf32>
    %179 = arith.addf %177, %178 : vector<1x4xf32>
    %180 = math.rsqrt %179 : vector<1x4xf32>
    %181 = vector.broadcast %180 : vector<1x4xf32> to vector<256x4xf32>
    %182 = arith.mulf %172, %181 : vector<256x4xf32>
    %c0_138 = arith.constant 0 : index
    %c0_139 = arith.constant 0 : index
    %c0_140 = arith.constant 0 : index
    %c0_141 = arith.constant 0 : index
    %183 = vector.load %arg1[%c0_138, %c0_139, %c0_140, %c0_141] : memref<1x16x16x4xf32, #tpu.memory_space<vmem>>, vector<1x16x16x4xf32>
    %184 = vector.shape_cast %183 : vector<1x16x16x4xf32> to vector<16x16x4xf32>
    %185 = vector.shape_cast %182 : vector<256x4xf32> to vector<16x16x4xf32>
    %186 = arith.addf %184, %185 : vector<16x16x4xf32>
    %c0_142 = arith.constant 0 : index
    %c0_143 = arith.constant 0 : index
    %c0_144 = arith.constant 0 : index
    %c0_145 = arith.constant 0 : index
    %187 = vector.load %arg4[%c0_142, %c0_143, %c0_144, %c0_145] : memref<1x16x16x4xf32, #tpu.memory_space<vmem>>, vector<1x16x16x4xf32>
    %188 = vector.shape_cast %187 : vector<1x16x16x4xf32> to vector<16x16x4xf32>
    %189 = vector.shape_cast %186 : vector<16x16x4xf32> to vector<1x16x16x4xf32>
    tpu.vector_store %arg4[%c0_142, %c0_143, %c0_144, %c0_145], %189 {strides = array<i32>} : memref<1x16x16x4xf32, #tpu.memory_space<vmem>>, vector<1x16x16x4xf32>,
    return
  }
  func.func @transform_0(%arg0: i32) -> (i32, i32, i32, i32) {
    %c0_i32 = arith.constant 0 : i32
    %c0_i32_0 = arith.constant 0 : i32
    %c0_i32_1 = arith.constant 0 : i32
    %c0_i32_2 = arith.constant 0 : i32
    return %arg0, %c0_i32, %c0_i32_0, %c0_i32_1 : i32, i32, i32, i32
  }
  func.func @transform_1(%arg0: i32) -> (i32, i32, i32) {
    %c0_i32 = arith.constant 0 : i32
    %c0_i32_0 = arith.constant 0 : i32
    %c0_i32_1 = arith.constant 0 : i32
    %c0_i32_2 = arith.constant 0 : i32
    return %c0_i32, %c0_i32_0, %c0_i32_1 : i32, i32, i32
  }
  func.func @transform_2(%arg0: i32) -> (i32, i32, i32) {
    %c0_i32 = arith.constant 0 : i32
    %c0_i32_0 = arith.constant 0 : i32
    %c0_i32_1 = arith.constant 0 : i32
    %c0_i32_2 = arith.constant 0 : i32
    return %c0_i32, %c0_i32_0, %c0_i32_1 : i32, i32, i32
  }
  func.func @transform_3(%arg0: i32) -> (i32, i32, i32, i32) {
    %c0_i32 = arith.constant 0 : i32
    %c0_i32_0 = arith.constant 0 : i32
    %c0_i32_1 = arith.constant 0 : i32
    %c0_i32_2 = arith.constant 0 : i32
    return %arg0, %c0_i32, %c0_i32_0, %c0_i32_1 : i32, i32, i32, i32
  }
}

</mosaic_0001>

<bundles_post_ra>
// kernel: tpu_custom_call.1
= control target key start
LH: loop header
LB: loop body
LE: loop exit
PB: predicated region body
PF: predicated region fallthrough
CT: control target
= control target key end

     0   :  { %s9277_s12 = smov 0   ;;  %s12407_s0 = inlined_call_operand.vmem [shape: f32[2,16,16,4], index: 0, kind: input, shape index: {}]   ;;  %s12408_s1 = inlined_call_operand.vmem [shape: f32[9,4,4], index: 1, kind: input, shape index: {}]   ;;  %s12409_s2 = inlined_call_operand.vmem [shape: f32[9,4,4], index: 2, kind: input, shape index: {}]   ;;  %s12410_s3 = inlined_call_operand.vmem [shape: f32[2,16,16,4], index: 3, kind: output, shape index: {}]  }
   0x1 LB: > { %s6608_s13 = sadd.s32 4294967295, %s9255_s12   ;;  %p6612_p0 = scmp.ge.s32.totalorder %s9255_s12, 1  ;;  %s9255_s12 = sphi %s9277_s12, %s13_s12  }
   0x2   : > { %p137_p1 = scmp.lt.s32.totalorder %s9255_s12, 3 }
   0x4   : > { %p138_p2 = pnand %p6612_p0, %p137_p1 }
   0x6   : > { %141 = sbr.rel (%p138_p2) target bundleno = 1900 (0x76c), region = 32 }
   0xd   : > { %v6617_v0 = vld [vmem:[%s12408_s1 + $0x4] sm:$0xf]  ;;  %vm530_vm0 = vcmask 1043456   ;;  %p161_p3 = scmp.lt.s32.totalorder %s6608_s13, 1  ;;  %v9292_v1 = vld [vmem:[%s12408_s1] sm:$0xf] }
   0xe   : > { %7825 = vmatprep.subr.msk.mxu0 %vm530_vm0, %v6617_v0  ;;  %vm204_vm1 = vcmask 31744   ;;  %vm242_vm2 = vcmask 25601   ;;  %vm259_vm3 = vcmask 30726   ;;  %vm383_vm4 = vcmask 1046528   ;;  %v9422_v48 = vld [vmem:[%s12408_s1 + $0x8] sm:$0xf] }
   0xf   : > { %7826 = vmatpush3.msk.msra.mxu0 %vm530_vm0, %v6617_v0  ;;  %s12766_s13 = smov (!%p161_p3, %s6608_s13), 1  ;;  %vm1051_vm5 = vcmask 1045504  }
  0x10   : > { %7875 = vmatprep.subr.msk.mxu0 %vm530_vm0, %v9292_v1  ;;  %s7229_s18 = sshll.u32 %s12766_s13, 8 }
  0x11   : > { %s9305_s21 = scalar_lea.vmem %s12407_s0, %s7229_s18  ;;  %s12288_s6 = scalar_lea.vmem %s12410_s3, %s7229_s18 }
  0x12   : > { %v173_v2 = vld [vmem:[%s9305_s21 + $0x10] sm:$0xff]  ;;  %v174_v3 = vld [vmem:[%s9305_s21 + $0x18] sm:$0xff]  ;;  %v171_v4 = vld [vmem:[%s9305_s21] sm:$0xff] }
  0x13   : > { %207 = vst.msk [vmem:[#allocation2 + $0x31] sm:$0xff] %vm204_vm1, %v173_v2  ;;  %208 = vst.msk [vmem:[#allocation2 + $0x39] sm:$0xff] %vm204_vm1, %v174_v3  ;;  %v172_v5 = vld [vmem:[%s9305_s21 + $0x8] sm:$0xff]  ;;  %v175_v6 = vld [vmem:[%s9305_s21 + $0x20] sm:$0xff] }
  0x14   : > { %237 = vst.msk [vmem:[#allocation2 + $0x1] sm:$0xff] %vm204_vm1, %v173_v2  ;;  %238 = vst.msk [vmem:[#allocation2 + $0x9] sm:$0xff] %vm204_vm1, %v174_v3  ;;  %v176_v7 = vld [vmem:[%s9305_s21 + $0x28] sm:$0xff]  ;;  %v177_v8 = vld [vmem:[%s9305_s21 + $0x30] sm:$0xff] }
  0x15   : > { %244 = vst.msk [vmem:[#allocation2 + $0x2f] sm:$0x2] %vm242_vm2, %v173_v2  ;;  %276 = vst.msk [vmem:[#allocation2 - $0x1] sm:$0x2] %vm242_vm2, %v173_v2  ;;  %v178_v9 = vld [vmem:[%s9305_s21 + $0x38] sm:$0xff]  ;;  %v179_v10 = vld [vmem:[%s9305_s21 + $0x40] sm:$0xff] }
  0x16   : > { %277 = vst.msk [vmem:[#allocation2 + $0xb] sm:$0x40] %vm259_vm3, %v174_v3  ;;  %261 = vst.msk [vmem:[#allocation2 + $0x3b] sm:$0x40] %vm259_vm3, %v174_v3  ;;  %v180_v11 = vld [vmem:[%s9305_s21 + $0x48] sm:$0xff]  ;;  %v181_v12 = vld [vmem:[%s9305_s21 + $0x50] sm:$0xff] }
  0x17   : > { %205 = vst.msk [vmem:[#allocation2 + $0x19] sm:$0xff] %vm204_vm1, %v171_v4  ;;  %206 = vst.msk [vmem:[#allocation2 + $0x21] sm:$0xff] %vm204_vm1, %v172_v5  ;;  %v182_v13 = vld [vmem:[%s9305_s21 + $0x58] sm:$0xff]  ;;  %v183_v14 = vld [vmem:[%s9305_s21 + $0x60] sm:$0xff] }
  0x18   : > { %243 = vst.msk [vmem:[#allocation2 + $0x17] sm:$0x2] %vm242_vm2, %v171_v4  ;;  %245 = vst.msk [vmem:[#allocation2 + $0x47] sm:$0x2] %vm242_vm2, %v175_v6  ;;  %v184_v15 = vld [vmem:[%s9305_s21 + $0x68] sm:$0xff]  ;;  %v185_v16 = vld [vmem:[%s9305_s21 + $0x70] sm:$0xff] }
  0x19   : > { %260 = vst.msk [vmem:[#allocation2 + $0x23] sm:$0x40] %vm259_vm3, %v172_v5  ;;  %262 = vst.msk [vmem:[#allocation2 + $0x53] sm:$0x40] %vm259_vm3, %v176_v7  ;;  %v186_v17 = vld [vmem:[%s9305_s21 + $0x78] sm:$0xff]  ;;  %v187_v18 = vld [vmem:[%s9305_s21 + $0x80] sm:$0xff] }
  0x1a   : > { %209 = vst.msk [vmem:[#allocation2 + $0x49] sm:$0xff] %vm204_vm1, %v175_v6  ;;  %210 = vst.msk [vmem:[#allocation2 + $0x51] sm:$0xff] %vm204_vm1, %v176_v7  ;;  %v188_v19 = vld [vmem:[%s9305_s21 + $0x88] sm:$0xff]  ;;  %v189_v20 = vld [vmem:[%s9305_s21 + $0x90] sm:$0xff] }
  0x1b   : > { %211 = vst.msk [vmem:[#allocation2 + $0x61] sm:$0xff] %vm204_vm1, %v177_v8  ;;  %212 = vst.msk [vmem:[#allocation2 + $0x69] sm:$0xff] %vm204_vm1, %v178_v9  ;;  %v190_v21 = vld [vmem:[%s9305_s21 + $0x98] sm:$0xff]  ;;  %v191_v22 = vld [vmem:[%s9305_s21 + $0xa0] sm:$0xff] }
  0x1c   : > { %246 = vst.msk [vmem:[#allocation2 + $0x5f] sm:$0x2] %vm242_vm2, %v177_v8  ;;  %247 = vst.msk [vmem:[#allocation2 + $0x77] sm:$0x2] %vm242_vm2, %v179_v10  ;;  %v192_v23 = vld [vmem:[%s9305_s21 + $0xa8] sm:$0xff]  ;;  %v193_v24 = vld [vmem:[%s9305_s21 + $0xb0] sm:$0xff] }
  0x1d   : > { %263 = vst.msk [vmem:[#allocation2 + $0x6b] sm:$0x40] %vm259_vm3, %v178_v9  ;;  %264 = vst.msk [vmem:[#allocation2 + $0x83] sm:$0x40] %vm259_vm3, %v180_v11  ;;  %v194_v25 = vld [vmem:[%s9305_s21 + $0xb8] sm:$0xff]  ;;  %v9377_v26 = vld [vmem:[#allocation2] sm:$0xff] }
  0x1e   : > { %213 = vst.msk [vmem:[#allocation2 + $0x79] sm:$0xff] %vm204_vm1, %v179_v10  ;;  %214 = vst.msk [vmem:[#allocation2 + $0x81] sm:$0xff] %vm204_vm1, %v180_v11  ;;  %v9379_v27 = vld [vmem:[#allocation2 + $0x8] sm:$0xff]  ;;  %v9381_v28 = vld [vmem:[#allocation2 + $0x10] sm:$0x3]  ;;  %v384_v29 = vrot.slane %v9377_v26, 1 }
  0x1f   : > { %215 = vst.msk [vmem:[#allocation2 + $0x91] sm:$0xff] %vm204_vm1, %v181_v12  ;;  %216 = vst.msk [vmem:[#allocation2 + $0x99] sm:$0xff] %vm204_vm1, %v182_v13  ;;  %v385_v30 = vrot.slane %v9379_v27, 1  ;;  %v387_v31 = vrot.slane %v9381_v28, 1  ;;  %v9392_v32 = vld [vmem:[#allocation2 + $0x18] sm:$0xff]  ;;  %v9394_v33 = vld [vmem:[#allocation2 + $0x20] sm:$0xff] }
  0x20   : > { %248 = vst.msk [vmem:[#allocation2 + $0x8f] sm:$0x2] %vm242_vm2, %v181_v12  ;;  %249 = vst.msk [vmem:[#allocation2 + $0xa7] sm:$0x2] %vm242_vm2, %v183_v14  ;;  %v9396_v34 = vld [vmem:[#allocation2 + $0x30] sm:$0xff]  ;;  %v389_v35 = vrot.slane %v9392_v32, 1 }
  0x21   : > { %265 = vst.msk [vmem:[#allocation2 + $0x9b] sm:$0x40] %vm259_vm3, %v182_v13  ;;  %266 = vst.msk [vmem:[#allocation2 + $0xb3] sm:$0x40] %vm259_vm3, %v184_v15  ;;  %v390_v36 = vrot.slane %v9394_v33, 1  ;;  %v9402_v38 = vld [vmem:[#allocation2 + $0x38] sm:$0xff]  ;;  %v386_v40 = vsel %vm383_vm4, %v384_v29, %v385_v30  ;;  %v388_v41 = vsel %vm383_vm4, %v385_v30, %v387_v31 }
  0x22   : > { %217 = vst.msk [vmem:[#allocation2 + $0xa9] sm:$0xff] %vm204_vm1, %v183_v14  ;;  %218 = vst.msk [vmem:[#allocation2 + $0xb1] sm:$0xff] %vm204_vm1, %v184_v15  ;;  %v9400_v37 = vld [vmem:[#allocation2 + $0x28] sm:$0x3]  ;;  %v394_v39 = vrot.slane %v9396_v34, 1  ;;  %v395_v43 = vrot.slane %v9402_v38, 1  ;;  %7827 = vmatprep.mubr.msk.f32.mxu0 %vm204_vm1, %v386_v40 }
  0x23   : > { %219 = vst.msk [vmem:[#allocation2 + $0xc1] sm:$0xff] %vm204_vm1, %v185_v16  ;;  %220 = vst.msk [vmem:[#allocation2 + $0xc9] sm:$0xff] %vm204_vm1, %v186_v17  ;;  %v392_v42 = vrot.slane %v9400_v37, 1  ;;  %v9409_v44 = vld [vmem:[#allocation2 + $0x40] sm:$0x3]  ;;  %v9413_v45 = vsel %vm383_vm4, %v389_v35, %v390_v36  ;;  %v9415_v46 = vld [vmem:[#allocation2 + $0x48] sm:$0xff]  ;;  %7828 = vmatmul.mubr.msk.f32.vlgmr.msra.gmra.mrb[0].mxu0 %vm204_vm1, %v388_v41 }
  0x24   : > { %250 = vst.msk [vmem:[#allocation2 + $0xbf] sm:$0x2] %vm242_vm2, %v185_v16  ;;  %251 = vst.msk [vmem:[#allocation2 + $0xd7] sm:$0x2] %vm242_vm2, %v187_v18  ;;  %v9417_v47 = vld [vmem:[#allocation2 + $0x50] sm:$0xff]  ;;  %7876 = vmatpush3.msk.msra.mxu0 %vm530_vm0, %v9292_v1  ;;  %7830 = vmatprep.mubr.msk.f32.mxu0 %vm204_vm1, %v9413_v45  ;;  %v397_v50 = vrot.slane %v9409_v44, 1  ;;  %v9434_v51 = vsel %vm383_vm4, %v394_v39, %v395_v43 }
  0x25   : > { %267 = vst.msk [vmem:[#allocation2 + $0xcb] sm:$0x40] %vm259_vm3, %v186_v17  ;;  %268 = vst.msk [vmem:[#allocation2 + $0xe3] sm:$0x40] %vm259_vm3, %v188_v19  ;;  %v9430_v49 = vsel %vm383_vm4, %v390_v36, %v392_v42  ;;  %v399_v52 = vrot.slane %v9415_v46, 1  ;;  %v400_v53 = vrot.slane %v9417_v47, 1  ;;  %7925 = vmatprep.subr.msk.mxu0 %vm530_vm0, %v9422_v48 }
  0x26   : > { %221 = vst.msk [vmem:[#allocation2 + $0xd9] sm:$0xff] %vm204_vm1, %v187_v18  ;;  %222 = vst.msk [vmem:[#allocation2 + $0xe1] sm:$0xff] %vm204_vm1, %v188_v19  ;;  %v9438_v54 = vld [vmem:[#allocation2 + $0x58] sm:$0x3]  ;;  %v9442_v55 = vld [vmem:[#allocation2 + $0x60] sm:$0xff]  ;;  %v9451_v57 = vsel %vm383_vm4, %v395_v43, %v397_v50 }
  0x27   : > { %223 = vst.msk [vmem:[#allocation2 + $0xf1] sm:$0xff] %vm204_vm1, %v189_v20  ;;  %224 = vst.msk [vmem:[#allocation2 + $0xf9] sm:$0xff] %vm204_vm1, %v190_v21  ;;  %v9444_v56 = vld [vmem:[#allocation2 + $0x68] sm:$0xff]  ;;  %7831 = vmatmul.mubr.msk.f32.gmra.mrb[2].mxu0 %vm204_vm1, %v9430_v49  ;;  %v402_v58 = vrot.slane %v9438_v54, 1  ;;  %v9455_v59 = vsel %vm383_vm4, %v399_v52, %v400_v53  ;;  %v404_v60 = vrot.slane %v9442_v55, 1  ;;  %v9461_v63 = vld [vmem:[#allocation2 + $0x78] sm:$0xff] }
  0x28   : > { %252 = vst.msk [vmem:[#allocation2 + $0xef] sm:$0x2] %vm242_vm2, %v189_v20  ;;  %253 = vst.msk [vmem:[#allocation2 + $0x107] sm:$0x2] %vm242_vm2, %v191_v22  ;;  %7833 = vmatprep.mubr.msk.f32.mxu0 %vm204_vm1, %v9434_v51  ;;  %v405_v61 = vrot.slane %v9444_v56, 1  ;;  %v9463_v0 = vld [vmem:[#allocation2 + $0x80] sm:$0xff] }
  0x29   : > { %269 = vst.msk [vmem:[#allocation2 + $0xfb] sm:$0x40] %vm259_vm3, %v190_v21  ;;  %270 = vst.msk [vmem:[#allocation2 + $0x113] sm:$0x40] %vm259_vm3, %v192_v23  ;;  %v9459_v62 = vld [vmem:[#allocation2 + $0x70] sm:$0x3]  ;;  %v9470_v1 = vsel %vm383_vm4, %v400_v53, %v402_v58 }
  0x2a   : > { %225 = vst.msk [vmem:[#allocation2 + $0x109] sm:$0xff] %vm204_vm1, %v191_v22  ;;  %226 = vst.msk [vmem:[#allocation2 + $0x111] sm:$0xff] %vm204_vm1, %v192_v23  ;;  %v407_v2 = vrot.slane %v9459_v62, 1  ;;  %v9473_v3 = vld [vmem:[#allocation2 + $0x88] sm:$0x3]  ;;  %v195_v4 = vld [vmem:[%s9305_s21 + $0xc0] sm:$0xff]  ;;  %v9478_v6 = vsel %vm383_vm4, %v404_v60, %v405_v61 }
  0x2b   : > { %227 = vst.msk [vmem:[#allocation2 + $0x121] sm:$0xff] %vm204_vm1, %v193_v24  ;;  %228 = vst.msk [vmem:[#allocation2 + $0x129] sm:$0xff] %vm204_vm1, %v194_v25  ;;  %7834 = vmatmul.mubr.msk.f32.gmra.mrb[4].mxu0 %vm204_vm1, %v9451_v57  ;;  %v196_v5 = vld [vmem:[%s9305_s21 + $0xc8] sm:$0xff]  ;;  %v409_v7 = vrot.slane %v9461_v63, 1  ;;  %v410_v8 = vrot.slane %v9463_v0, 1  ;;  %v197_v9 = vld [vmem:[%s9305_s21 + $0xd0] sm:$0xff] }
  0x2c   : > { %254 = vst.msk [vmem:[#allocation2 + $0x11f] sm:$0x2] %vm242_vm2, %v193_v24  ;;  %12556 = vst [vmem:[#allocation3_spill] sm:$0xff] %v9455_v59  ;;  %7836 = vmatprep.mubr.msk.f32.mxu0 %vm204_vm1, %v9455_v59  ;;  %v198_v10 = vld [vmem:[%s9305_s21 + $0xd8] sm:$0xff]  ;;  %v199_v11 = vld [vmem:[%s9305_s21 + $0xe0] sm:$0xff]  ;;  %v9511_v15 = vsel %vm383_vm4, %v405_v61, %v407_v2  ;;  %v412_v16 = vrot.slane %v9473_v3, 1 }
  0x2d   : > { %271 = vst.msk [vmem:[#allocation2 + $0x12b] sm:$0x40] %vm259_vm3, %v194_v25  ;;  %12557 = vst [vmem:[#allocation4_spill] sm:$0xff] %v9470_v1  ;;  %v9489_v12 = vld [vmem:[#allocation2 + $0x90] sm:$0xff]  ;;  %v9491_v13 = vld [vmem:[#allocation2 + $0x98] sm:$0xff]  ;;  %v9515_v17 = vsel %vm383_vm4, %v409_v7, %v410_v8 }
  0x2e   : > { %12558 = vst [vmem:[#allocation5_spill] sm:$0xff] %v9478_v6  ;;  %229 = vst.msk [vmem:[#allocation2 + $0x139] sm:$0xff] %vm204_vm1, %v195_v4  ;;  %v200_v14 = vld [vmem:[%s9305_s21 + $0xe8] sm:$0xff]  ;;  %v414_v18 = vrot.slane %v9489_v12, 1  ;;  %v415_v19 = vrot.slane %v9491_v13, 1  ;;  %v9523_v22 = vld [vmem:[#allocation2 + $0xb0] sm:$0xff]  ;;  %v9530_v23 = vsel %vm383_vm4, %v410_v8, %v412_v16 }
  0x2f   : > { %230 = vst.msk [vmem:[#allocation2 + $0x141] sm:$0xff] %vm204_vm1, %v196_v5  ;;  %231 = vst.msk [vmem:[#allocation2 + $0x151] sm:$0xff] %vm204_vm1, %v197_v9  ;;  %7837 = vmatmul.mubr.msk.f32.gmra.mrb[6].mxu0 %vm204_vm1, %v9470_v1  ;;  %v9519_v20 = vld [vmem:[#allocation2 + $0xa0] sm:$0x3]  ;;  %v9521_v21 = vld [vmem:[#allocation2 + $0xa8] sm:$0xff]  ;;  %v420_v30 = vrot.slane %v9523_v22, 1 }
  0x30   : > { %255 = vst.msk [vmem:[#allocation2 + $0x137] sm:$0x2] %vm242_vm2, %v195_v4  ;;  %256 = vst.msk [vmem:[#allocation2 + $0x14f] sm:$0x2] %vm242_vm2, %v197_v9  ;;  %7839 = vmatprep.mubr.msk.f32.mxu0 %vm204_vm1, %v9478_v6  ;;  %v417_v24 = vrot.slane %v9519_v20, 1  ;;  %v9534_v25 = vsel %vm383_vm4, %v414_v18, %v415_v19  ;;  %v419_v29 = vrot.slane %v9521_v21, 1 }
  0x31   : > { %272 = vst.msk [vmem:[#allocation2 + $0x143] sm:$0x40] %vm259_vm3, %v196_v5  ;;  %273 = vst.msk [vmem:[#allocation2 + $0x15b] sm:$0x40] %vm259_vm3, %v198_v10  ;;  %v9538_v31 = vld [vmem:[#allocation2 + $0xb8] sm:$0x3] }
  0x32   : > { %232 = vst.msk [vmem:[#allocation2 + $0x159] sm:$0xff] %vm204_vm1, %v198_v10  ;;  %233 = vst.msk [vmem:[#allocation2 + $0x169] sm:$0xff] %vm204_vm1, %v199_v11  ;;  %v9540_v35 = vld [vmem:[#allocation2 + $0xc0] sm:$0xff]  ;;  %v9542_v36 = vld [vmem:[#allocation2 + $0xc8] sm:$0xff]  ;;  %v9549_v39 = vsel %vm383_vm4, %v415_v19, %v417_v24  ;;  %v422_v40 = vrot.slane %v9538_v31, 1  ;;  %v9553_v41 = vsel %vm383_vm4, %v419_v29, %v420_v30 }
  0x33   : > { %257 = vst.msk [vmem:[#allocation2 + $0x167] sm:$0x2] %vm242_vm2, %v199_v11  ;;  %278 = vst.msk [vmem:[#allocation2 + $0x197] sm:$0x2] %vm242_vm2, %v199_v11  ;;  %7840 = vmatmul.mubr.msk.f32.gmra.mrb[8].mxu0 %vm204_vm1, %v9511_v15  ;;  %v424_v42 = vrot.slane %v9540_v35, 1  ;;  %v425_v43 = vrot.slane %v9542_v36, 1 }
  0x34   : > { %240 = vst.msk [vmem:[#allocation2 + $0x199] sm:$0xff] %vm204_vm1, %v199_v11  ;;  %234 = vst.msk [vmem:[#allocation2 + $0x171] sm:$0xff] %vm204_vm1, %v200_v14  ;;  %7842 = vmatprep.mubr.msk.f32.mxu0 %vm204_vm1, %v9515_v17  ;;  %v9557_v50 = vld [vmem:[#allocation2 + $0xd0] sm:$0x3]  ;;  %v9559_v52 = vld [vmem:[#allocation2 + $0xd8] sm:$0xff]  ;;  %v9568_v58 = vsel %vm383_vm4, %v420_v30, %v422_v40 }
  0x35   : > { %241 = vst.msk [vmem:[#allocation2 + $0x1a1] sm:$0xff] %vm204_vm1, %v200_v14  ;;  %12559 = vst [vmem:[#allocation6_spill] sm:$0xff] %v9511_v15  ;;  %v9561_v53 = vld [vmem:[#allocation2 + $0xe0] sm:$0xff]  ;;  %v427_v60 = vrot.slane %v9557_v50, 1  ;;  %v9572_v61 = vsel %vm383_vm4, %v424_v42, %v425_v43  ;;  %v429_v2 = vrot.slane %v9559_v52, 1  ;;  %v9578_v7 = vld [vmem:[#allocation2 + $0xf0] sm:$0xff] }
  0x36   : > { %274 = vst.msk [vmem:[#allocation2 + $0x173] sm:$0x40] %vm259_vm3, %v200_v14  ;;  %279 = vst.msk [vmem:[#allocation2 + $0x1a3] sm:$0x40] %vm259_vm3, %v200_v14  ;;  %v430_v4 = vrot.slane %v9561_v53, 1  ;;  %v9580_v8 = vld [vmem:[#allocation2 + $0xf8] sm:$0xff] }
  0x37   : > { %12560 = vst [vmem:[#allocation7_spill] sm:$0xff] %v9515_v17  ;;  %12561 = vst [vmem:[#allocation8_spill] sm:$0xff] %v9530_v23  ;;  %7843 = vmatmul.mubr.msk.f32.gmra.mrb[10].mxu0 %vm204_vm1, %v9530_v23  ;;  %v9576_v5 = vld [vmem:[#allocation2 + $0xe8] sm:$0x3]  ;;  %v9587_v9 = vsel %vm383_vm4, %v425_v43, %v427_v60  ;;  %v434_v14 = vrot.slane %v9578_v7, 1  ;;  %v435_v16 = vrot.slane %v9580_v8, 1 }
  0x38   : > { %12562 = vst [vmem:[#allocation9_spill] sm:$0xff] %v9534_v25  ;;  %7845 = vmatprep.mubr.msk.f32.mxu0 %vm204_vm1, %v9534_v25  ;;  %12563 = vst [vmem:[#allocation10_spill] sm:$0xff] %v9549_v39  ;;  %v432_v10 = vrot.slane %v9576_v5, 1  ;;  %v9591_v11 = vsel %vm383_vm4, %v429_v2, %v430_v4  ;;  %v9595_v18 = vld [vmem:[#allocation2 + $0x100] sm:$0x3]  ;;  %v9597_v19 = vld [vmem:[#allocation2 + $0x108] sm:$0xff] }
  0x39   : > { %12564 = vst [vmem:[#allocation11_spill] sm:$0xff] %v9553_v41  ;;  %12565 = vst [vmem:[#allocation12_spill] sm:$0xff] %v9568_v58  ;;  %v9599_v24 = vld [vmem:[#allocation2 + $0x110] sm:$0xff]  ;;  %v437_v30 = vrot.slane %v9595_v18, 1  ;;  %v9610_v40 = vsel %vm383_vm4, %v434_v14, %v435_v16  ;;  %v439_v42 = vrot.slane %v9597_v19, 1  ;;  %v9616_v2 = vld [vmem:[#allocation2 + $0x120] sm:$0xff] }
  0x3a   : > { %12566 = vst [vmem:[#allocation13_spill] sm:$0xff] %v9572_v61  ;;  %12567 = vst [vmem:[#allocation14_spill] sm:$0xff] %v9587_v9  ;;  %v9606_v29 = vsel %vm383_vm4, %v430_v4, %v432_v10  ;;  %v440_v43 = vrot.slane %v9599_v24, 1  ;;  %v9614_v60 = vld [vmem:[#allocation2 + $0x118] sm:$0x3]  ;;  %v9654_v23 = vld [vmem:[#allocation2 + $0x150] sm:$0xff] }
  0x3b   : > { %7846 = vmatmul.mubr.msk.f32.gmra.mrb[12].mxu0 %vm204_vm1, %v9549_v39  ;;  %12568 = vst [vmem:[#allocation15_spill] sm:$0xff] %v9591_v11  ;;  %12569 = vst [vmem:[#allocation16_spill] sm:$0xff] %v9606_v29  ;;  %v9625_v4 = vsel %vm383_vm4, %v435_v16, %v437_v30  ;;  %v442_v10 = vrot.slane %v9614_v60, 1  ;;  %v9652_v25 = vld [vmem:[#allocation2 + $0x148] sm:$0x3] }
  0x3c   : > { %7848 = vmatprep.mubr.msk.f32.mxu0 %vm204_vm1, %v9553_v41  ;;  %12570 = vst [vmem:[#allocation17_spill] sm:$0xff] %v9610_v40  ;;  %12571 = vst [vmem:[#allocation18_spill] sm:$0xff] %v9625_v4  ;;  %v9629_v14 = vsel %vm383_vm4, %v439_v42, %v440_v43  ;;  %v9635_v41 = vld [vmem:[#allocation2 + $0x138] sm:$0xff]  ;;  %v9671_v15 = vld [vmem:[#allocation2 + $0x160] sm:$0x3] }
  0x3d   : > { %12572 = vst [vmem:[#allocation19_spill] sm:$0xff] %v9629_v14  ;;  %v9644_v16 = vsel %vm383_vm4, %v440_v43, %v442_v10  ;;  %v9673_v6 = vld [vmem:[#allocation2 + $0x168] sm:$0xff]  ;;  %v9690_v59 = vld [vmem:[#allocation2 + $0x178] sm:$0x3] }
  0x3e   : > { %12573 = vst [vmem:[#allocation20_spill] sm:$0xff] %v9644_v16 }
  0x3f   : > { %7849 = vmatmul.mubr.msk.f32.gmra.mrb[14].mxu0 %vm204_vm1, %v9568_v58  ;;  %v9633_v58 = vld [vmem:[#allocation2 + $0x130] sm:$0x3] }
  0x40   : > { %7851 = vmatprep.mubr.msk.f32.mxu0 %vm204_vm1, %v9572_v61  ;;  %v447_v30 = vrot.slane %v9633_v58, 1 }
  0x43   : > { %7852 = vmatmul.mubr.msk.f32.gmra.mrb[16].mxu0 %vm204_vm1, %v9587_v9  ;;  %v9618_v9 = vld [vmem:[#allocation2 + $0x128] sm:$0xff] }
  0x44   : > { %7854 = vmatprep.mubr.msk.f32.mxu0 %vm204_vm1, %v9591_v11  ;;  %v444_v11 = vrot.slane %v9616_v2, 1  ;;  %v445_v61 = vrot.slane %v9618_v9, 1 }
  0x46   : > { %v9648_v42 = vsel %vm383_vm4, %v444_v11, %v445_v61  ;;  %v9663_v43 = vsel %vm383_vm4, %v445_v61, %v447_v30  ;;  %v452_v11 = vrot.slane %v9652_v25, 1 }
  0x47   : > { %7855 = vmatmul.mubr.msk.f32.gmra.mrb[18].mxu0 %vm204_vm1, %v9606_v29  ;;  %v9637_v29 = vld [vmem:[#allocation2 + $0x140] sm:$0xff]  ;;  %12574 = vst [vmem:[#allocation21_spill] sm:$0xff] %v9648_v42  ;;  %12575 = vst [vmem:[#allocation22_spill] sm:$0xff] %v9663_v43 }
  0x48   : > { %7857 = vmatprep.mubr.msk.f32.mxu0 %vm204_vm1, %v9610_v40  ;;  %v449_v40 = vrot.slane %v9635_v41, 1  ;;  %v450_v39 = vrot.slane %v9637_v29, 1 }
  0x4a   : > { %v9667_v10 = vsel %vm383_vm4, %v449_v40, %v450_v39  ;;  %v9682_v61 = vsel %vm383_vm4, %v450_v39, %v452_v11  ;;  %v457_v40 = vrot.slane %v9671_v15, 1  ;;  %v462_v11 = vrot.slane %v9690_v59, 1 }
  0x4b   : > { %7858 = vmatmul.mubr.msk.f32.gmra.mrb[20].mxu0 %vm204_vm1, %v9625_v4  ;;  %v9656_v4 = vld [vmem:[#allocation2 + $0x158] sm:$0xff]  ;;  %12576 = vst [vmem:[#allocation23_spill] sm:$0xff] %v9667_v10 }
  0x4c   : > { %7860 = vmatprep.mubr.msk.f32.mxu0 %vm204_vm1, %v9629_v14  ;;  %v454_v14 = vrot.slane %v9654_v23, 1  ;;  %v455_v17 = vrot.slane %v9656_v4, 1 }
  0x4e   : > { %v9686_v30 = vsel %vm383_vm4, %v454_v14, %v455_v17  ;;  %v9697_v39 = vsel %vm383_vm4, %v455_v17, %v457_v40  ;;  %v6718_v17 = vld [vmem:[%s12408_s1 + $0xc] sm:$0xf]  ;;  %v1053_v40 = vrot.slane %v9379_v27, 2 }
  0x4f   : > { %7861 = vmatmul.mubr.msk.f32.gmra.mrb[22].mxu0 %vm204_vm1, %v9644_v16  ;;  %v9675_v16 = vld [vmem:[#allocation2 + $0x170] sm:$0xff]  ;;  %12577 = vst [vmem:[#allocation24_spill] sm:$0xff] %v9686_v30  ;;  %12578 = vst [vmem:[#allocation25_spill] sm:$0xff] %v9697_v39 }
  0x50   : > { %7863 = vmatprep.mubr.msk.f32.mxu0 %vm204_vm1, %v9648_v42  ;;  %v459_v42 = vrot.slane %v9673_v6, 1  ;;  %v460_v1 = vrot.slane %v9675_v16, 1 }
  0x52   : > { %v9701_v14 = vsel %vm383_vm4, %v459_v42, %v460_v1  ;;  %v1052_v42 = vrot.slane %v9377_v26, 2 }
  0x53   : > { %7864 = vmatmul.mubr.msk.f32.gmra.mrb[24].mxu0 %vm204_vm1, %v9663_v43  ;;  %12579 = vst [vmem:[#allocation26_spill] sm:$0xff] %v9701_v14 }
  0x54   : > { %7866 = vmatprep.mubr.msk.f32.mxu0 %vm204_vm1, %v9667_v10  ;;  %v9708_v10 = vsel %vm383_vm4, %v460_v1, %v462_v11  ;;  %v202_v1 = vld [vmem:[%s9305_s21 + $0xf8] sm:$0xff]  ;;  %v1055_v11 = vrot.slane %v9381_v28, 2  ;;  %v1062_v28 = vrot.slane %v9396_v34, 2 }
  0x55   : > { %12580 = vst [vmem:[#allocation27_spill] sm:$0xff] %v9708_v10  ;;  %236 = vst.msk [vmem:[#allocation2 + $0x189] sm:$0xff] %vm204_vm1, %v202_v1 }
  0x56   : > { %275 = vst.msk [vmem:[#allocation2 + $0x18b] sm:$0x40] %vm259_vm3, %v202_v1  ;;  %v1057_v1 = vrot.slane %v9392_v32, 2 }
  0x57   : > { %7867 = vmatmul.mubr.msk.f32.gmra.mrb[26].mxu0 %vm204_vm1, %v9682_v61 }
  0x58   : > { %7869 = vmatprep.mubr.msk.f32.mxu0 %vm204_vm1, %v9686_v30 }
  0x5b   : > { %7870 = vmatmul.mubr.msk.f32.gmra.mrb[28].mxu0 %vm204_vm1, %v9697_v39  ;;  %v9805_v39 = vld [vmem:[%s12408_s1 + $0x10] sm:$0xf] }
  0x5c   : > { %7872 = vmatprep.mubr.msk.f32.mxu0 %vm204_vm1, %v9701_v14 }
  0x5f   : > { %7873 = vmatmul.mubr.msk.f32.gmra.mrb[30].mxu0 %vm204_vm1, %v9708_v10  ;;  %v1058_v10 = vrot.slane %v9394_v33, 2 }
  0x60   : > { %7877 = vmatprep.mubr.msk.f32.mxu0 %vm204_vm1, %v9377_v26  ;;  %v1056_v26 = vsel %vm1051_vm5, %v1053_v40, %v1055_v11 }
  0x61   : > { %v9798_v14 = vsel %vm1051_vm5, %v1057_v1, %v1058_v10  ;;  %v1068_v1 = vrot.slane %v9417_v47, 2 }
  0x63   : > { %7878 = vmatmul.mubr.msk.f32.vlgmr.msra.gmra.mrb[0].mxu0 %vm204_vm1, %v9379_v27  ;;  %v1060_v27 = vrot.slane %v9400_v37, 2 }
  0x64   : > { %7926 = vmatpush3.msk.msra.mxu0 %vm530_vm0, %v9422_v48  ;;  %7880 = vmatprep.mubr.msk.f32.mxu0 %vm204_vm1, %v9392_v32  ;;  %v201_v48 = vld [vmem:[%s9305_s21 + $0xf0] sm:$0xff] }
  0x65   : > { %7975 = vmatprep.subr.msk.mxu0 %vm530_vm0, %v6718_v17  ;;  %235 = vst.msk [vmem:[#allocation2 + $0x181] sm:$0xff] %vm204_vm1, %v201_v48  ;;  %v9812_v37 = vsel %vm1051_vm5, %v1058_v10, %v1060_v27  ;;  %v1073_v27 = vrot.slane %v9444_v56, 2 }
  0x66   : > { %258 = vst.msk [vmem:[#allocation2 + $0x17f] sm:$0x2] %vm242_vm2, %v201_v48  ;;  %v1054_v48 = vsel %vm1051_vm5, %v1052_v42, %v1053_v40  ;;  %v1063_v42 = vrot.slane %v9402_v38, 2  ;;  %v1065_v40 = vrot.slane %v9409_v44, 2  ;;  %v1070_v44 = vrot.slane %v9438_v54, 2 }
  0x67   : > { %7881 = vmatmul.mubr.msk.f32.gmra.mrb[2].mxu0 %vm204_vm1, %v9394_v33 }
  0x68   : > { %7883 = vmatprep.mubr.msk.f32.mxu0 %vm204_vm1, %v9396_v34  ;;  %v9816_v11 = vsel %vm1051_vm5, %v1062_v28, %v1063_v42  ;;  %v9827_v10 = vsel %vm1051_vm5, %v1063_v42, %v1065_v40  ;;  %v9840_v28 = vsel %vm1051_vm5, %v1068_v1, %v1070_v44  ;;  %v1075_v42 = vrot.slane %v9459_v62, 2 }
  0x69   : > { %v1077_v40 = vrot.slane %v9461_v63, 2  ;;  %v1082_v44 = vrot.slane %v9489_v12, 2 }
  0x6b   : > { %7884 = vmatmul.mubr.msk.f32.gmra.mrb[4].mxu0 %vm204_vm1, %v9402_v38 }
  0x6c   : > { %7886 = vmatprep.mubr.msk.f32.mxu0 %vm204_vm1, %v9415_v46 }
  0x6f   : > { %7887 = vmatmul.mubr.msk.f32.gmra.mrb[6].mxu0 %vm204_vm1, %v9417_v47 }
  0x70   : > { %7889 = vmatprep.mubr.msk.f32.mxu0 %vm204_vm1, %v9442_v55 }
  0x73   : > { %7890 = vmatmul.mubr.msk.f32.gmra.mrb[8].mxu0 %vm204_vm1, %v9444_v56 }
  0x74   : > { %7892 = vmatprep.mubr.msk.f32.mxu0 %vm204_vm1, %v9461_v63 }
  0x77   : > { %7893 = vmatmul.mubr.msk.f32.gmra.mrb[10].mxu0 %vm204_vm1, %v9463_v0 }
  0x78   : > { %7895 = vmatprep.mubr.msk.f32.mxu0 %vm204_vm1, %v9489_v12 }
  0x7b   : > { %7896 = vmatmul.mubr.msk.f32.gmra.mrb[12].mxu0 %vm204_vm1, %v9491_v13 }
  0x7c   : > { %7898 = vmatprep.mubr.msk.f32.mxu0 %vm204_vm1, %v9521_v21 }
  0x7f   : > { %7899 = vmatmul.mubr.msk.f32.gmra.mrb[14].mxu0 %vm204_vm1, %v9523_v22 }
  0x80   : > { %7901 = vmatprep.mubr.msk.f32.mxu0 %vm204_vm1, %v9540_v35 }
  0x83   : > { %7902 = vmatmul.mubr.msk.f32.gmra.mrb[16].mxu0 %vm204_vm1, %v9542_v36 }
  0x84   : > { %7904 = vmatprep.mubr.msk.f32.mxu0 %vm204_vm1, %v9559_v52 }
  0x87   : > { %7905 = vmatmul.mubr.msk.f32.gmra.mrb[18].mxu0 %vm204_vm1, %v9561_v53 }
  0x88   : > { %7907 = vmatprep.mubr.msk.f32.mxu0 %vm204_vm1, %v9578_v7 }
  0x8b   : > { %7908 = vmatmul.mubr.msk.f32.gmra.mrb[20].mxu0 %vm204_vm1, %v9580_v8 }
  0x8c   : > { %7910 = vmatprep.mubr.msk.f32.mxu0 %vm204_vm1, %v9597_v19 }
  0x8f   : > { %7911 = vmatmul.mubr.msk.f32.gmra.mrb[22].mxu0 %vm204_vm1, %v9599_v24 }
  0x90   : > { %7913 = vmatprep.mubr.msk.f32.mxu0 %vm204_vm1, %v9616_v2 }
  0x93   : > { %7914 = vmatmul.mubr.msk.f32.gmra.mrb[24].mxu0 %vm204_vm1, %v9618_v9 }
  0x94   : > { %7916 = vmatprep.mubr.msk.f32.mxu0 %vm204_vm1, %v9635_v41 }
  0x97   : > { %7917 = vmatmul.mubr.msk.f32.gmra.mrb[26].mxu0 %vm204_vm1, %v9637_v29 }
  0x98   : > { %7919 = vmatprep.mubr.msk.f32.mxu0 %vm204_vm1, %v9654_v23 }
  0x9b   : > { %7920 = vmatmul.mubr.msk.f32.gmra.mrb[28].mxu0 %vm204_vm1, %v9656_v4 }
  0x9c   : > { %7922 = vmatprep.mubr.msk.f32.mxu0 %vm204_vm1, %v9673_v6 }
  0x9f   : > { %7923 = vmatmul.mubr.msk.f32.gmra.mrb[30].mxu0 %vm204_vm1, %v9675_v16 }
  0xa0   : > { %7927 = vmatprep.mubr.msk.f32.mxu0 %vm204_vm1, %v1054_v48  ;;  %v1067_v48 = vrot.slane %v9415_v46, 2 }
  0xa3   : > { %7928 = vmatmul.mubr.msk.f32.vlgmr.msra.gmra.mrb[0].mxu0 %vm204_vm1, %v1056_v26  ;;  %v1072_v26 = vrot.slane %v9442_v55, 2 }
  0xa4   : > { %7976 = vmatpush3.msk.msra.mxu0 %vm530_vm0, %v6718_v17  ;;  %7930 = vmatprep.mubr.msk.f32.mxu0 %vm204_vm1, %v9798_v14  ;;  %v9831_v17 = vsel %vm1051_vm5, %v1067_v48, %v1068_v1  ;;  %v1078_v48 = vrot.slane %v9463_v0, 2  ;;  %v1080_v1 = vrot.slane %v9473_v3, 2 }
  0xa5   : > { %8025 = vmatprep.subr.msk.mxu0 %vm530_vm0, %v9805_v39  ;;  %12581 = vst [vmem:[#allocation28_spill] sm:$0xff] %v9831_v17  ;;  %v9844_v54 = vsel %vm1051_vm5, %v1072_v26, %v1073_v27  ;;  %v1083_v26 = vrot.slane %v9491_v13, 2 }
  0xa6   : > { %12582 = vst [vmem:[#allocation29_spill] sm:$0xff] %v9844_v54  ;;  %v9857_v62 = vsel %vm1051_vm5, %v1077_v40, %v1078_v48  ;;  %v1088_v40 = vrot.slane %v9523_v22, 2 }
  0xa7   : > { %7931 = vmatmul.mubr.msk.f32.gmra.mrb[2].mxu0 %vm204_vm1, %v9812_v37  ;;  %12583 = vst [vmem:[#allocation30_spill] sm:$0xff] %v9857_v62  ;;  %v9870_v3 = vsel %vm1051_vm5, %v1082_v44, %v1083_v26  ;;  %v1093_v44 = vrot.slane %v9542_v36, 2 }
  0xa8   : > { %7933 = vmatprep.mubr.msk.f32.mxu0 %vm204_vm1, %v9816_v11  ;;  %12584 = vst [vmem:[#allocation31_spill] sm:$0xff] %v9870_v3 }
  0xab   : > { %7934 = vmatmul.mubr.msk.f32.gmra.mrb[4].mxu0 %vm204_vm1, %v9827_v10 }
  0xac   : > { %7936 = vmatprep.mubr.msk.f32.mxu0 %vm204_vm1, %v9831_v17  ;;  %v9853_v17 = vsel %vm1051_vm5, %v1073_v27, %v1075_v42  ;;  %v1085_v27 = vrot.slane %v9519_v20, 2  ;;  %v1087_v42 = vrot.slane %v9521_v21, 2 }
  0xae   : > { %v9883_v20 = vsel %vm1051_vm5, %v1087_v42, %v1088_v40  ;;  %v1098_v42 = vrot.slane %v9561_v53, 2 }
  0xaf   : > { %7937 = vmatmul.mubr.msk.f32.gmra.mrb[6].mxu0 %vm204_vm1, %v9840_v28  ;;  %12585 = vst [vmem:[#allocation32_spill] sm:$0xff] %v9883_v20 }
  0xb0   : > { %7939 = vmatprep.mubr.msk.f32.mxu0 %vm204_vm1, %v9844_v54  ;;  %v9866_v54 = vsel %vm1051_vm5, %v1078_v48, %v1080_v1  ;;  %v1090_v48 = vrot.slane %v9538_v31, 2  ;;  %v1092_v1 = vrot.slane %v9540_v35, 2 }
  0xb2   : > { %v9896_v31 = vsel %vm1051_vm5, %v1092_v1, %v1093_v44  ;;  %v1103_v1 = vrot.slane %v9580_v8, 2 }
  0xb3   : > { %7940 = vmatmul.mubr.msk.f32.gmra.mrb[8].mxu0 %vm204_vm1, %v9853_v17  ;;  %12586 = vst [vmem:[#allocation33_spill] sm:$0xff] %v9896_v31 }
  0xb4   : > { %7942 = vmatprep.mubr.msk.f32.mxu0 %vm204_vm1, %v9857_v62  ;;  %v9879_v62 = vsel %vm1051_vm5, %v1083_v26, %v1085_v27  ;;  %v1095_v26 = vrot.slane %v9557_v50, 2  ;;  %v1097_v27 = vrot.slane %v9559_v52, 2 }
  0xb6   : > { %v9909_v50 = vsel %vm1051_vm5, %v1097_v27, %v1098_v42  ;;  %v1108_v27 = vrot.slane %v9599_v24, 2 }
  0xb7   : > { %7943 = vmatmul.mubr.msk.f32.gmra.mrb[10].mxu0 %vm204_vm1, %v9866_v54  ;;  %12587 = vst [vmem:[#allocation34_spill] sm:$0xff] %v9909_v50 }
  0xb8   : > { %7945 = vmatprep.mubr.msk.f32.mxu0 %vm204_vm1, %v9870_v3  ;;  %v9892_v3 = vsel %vm1051_vm5, %v1088_v40, %v1090_v48  ;;  %v1100_v40 = vrot.slane %v9576_v5, 2  ;;  %v1102_v48 = vrot.slane %v9578_v7, 2 }
  0xba   : > { %v9922_v5 = vsel %vm1051_vm5, %v1102_v48, %v1103_v1  ;;  %v1113_v48 = vrot.slane %v9618_v9, 2 }
  0xbb   : > { %7946 = vmatmul.mubr.msk.f32.gmra.mrb[12].mxu0 %vm204_vm1, %v9879_v62  ;;  %12588 = vst [vmem:[#allocation35_spill] sm:$0xff] %v9922_v5 }
  0xbc   : > { %7948 = vmatprep.mubr.msk.f32.mxu0 %vm204_vm1, %v9883_v20  ;;  %v9905_v20 = vsel %vm1051_vm5, %v1093_v44, %v1095_v26  ;;  %v1105_v44 = vrot.slane %v9595_v18, 2  ;;  %v1107_v26 = vrot.slane %v9597_v19, 2 }
  0xbe   : > { %v9935_v18 = vsel %vm1051_vm5, %v1107_v26, %v1108_v27  ;;  %v1118_v26 = vrot.slane %v9637_v29, 2 }
  0xbf   : > { %7949 = vmatmul.mubr.msk.f32.gmra.mrb[14].mxu0 %vm204_vm1, %v9892_v3  ;;  %12590 = vst [vmem:[#allocation37_spill] sm:$0xff] %v9935_v18 }
  0xc0   : > { %7951 = vmatprep.mubr.msk.f32.mxu0 %vm204_vm1, %v9896_v31  ;;  %v9918_v31 = vsel %vm1051_vm5, %v1098_v42, %v1100_v40  ;;  %v1110_v42 = vrot.slane %v9614_v60, 2  ;;  %v1112_v40 = vrot.slane %v9616_v2, 2 }
  0xc2   : > { %v9948_v60 = vsel %vm1051_vm5, %v1112_v40, %v1113_v48  ;;  %v1123_v40 = vrot.slane %v9656_v4, 2 }
  0xc3   : > { %7952 = vmatmul.mubr.msk.f32.gmra.mrb[16].mxu0 %vm204_vm1, %v9905_v20  ;;  %12591 = vst [vmem:[#allocation38_spill] sm:$0xff] %v9948_v60 }
  0xc4   : > { %7954 = vmatprep.mubr.msk.f32.mxu0 %vm204_vm1, %v9909_v50  ;;  %v9931_v50 = vsel %vm1051_vm5, %v1103_v1, %v1105_v44  ;;  %v1115_v1 = vrot.slane %v9633_v58, 2  ;;  %v1117_v44 = vrot.slane %v9635_v41, 2 }
  0xc5   : > { %12589 = vst [vmem:[#allocation36_spill] sm:$0xff] %v9931_v50 }
  0xc6   : > { %v9961_v58 = vsel %vm1051_vm5, %v1117_v44, %v1118_v26  ;;  %v1128_v44 = vrot.slane %v9675_v16, 2 }
  0xc7   : > { %7955 = vmatmul.mubr.msk.f32.gmra.mrb[18].mxu0 %vm204_vm1, %v9918_v31  ;;  %12593 = vst [vmem:[#allocation40_spill] sm:$0xff] %v9961_v58 }
  0xc8   : > { %7957 = vmatprep.mubr.msk.f32.mxu0 %vm204_vm1, %v9922_v5  ;;  %v9944_v5 = vsel %vm1051_vm5, %v1108_v27, %v1110_v42  ;;  %v1120_v27 = vrot.slane %v9652_v25, 2  ;;  %v1122_v42 = vrot.slane %v9654_v23, 2 }
  0xca   : > { %v9974_v25 = vsel %vm1051_vm5, %v1122_v42, %v1123_v40  ;;  %v12595_v42 = vld [vmem:[#allocation3_spill] sm:$0xff] }
  0xcb   : > { %7958 = vmatmul.mubr.msk.f32.gmra.mrb[20].mxu0 %vm204_vm1, %v9931_v50  ;;  %12594 = vst [vmem:[#allocation41_spill] sm:$0xff] %v9974_v25 }
  0xcc   : > { %7960 = vmatprep.mubr.msk.f32.mxu0 %vm204_vm1, %v9935_v18  ;;  %v9957_v18 = vsel %vm1051_vm5, %v1113_v48, %v1115_v1  ;;  %v1125_v48 = vrot.slane %v9671_v15, 2  ;;  %v1127_v1 = vrot.slane %v9673_v6, 2 }
  0xcd   : > { %12592 = vst [vmem:[#allocation39_spill] sm:$0xff] %v9957_v18 }
  0xce   : > { %v9987_v15 = vsel %vm1051_vm5, %v1127_v1, %v1128_v44  ;;  %v12600_v1 = vld [vmem:[#allocation8_spill] sm:$0xff] }
  0xcf   : > { %7961 = vmatmul.mubr.msk.f32.gmra.mrb[22].mxu0 %vm204_vm1, %v9944_v5 }
  0xd0   : > { %7963 = vmatprep.mubr.msk.f32.mxu0 %vm204_vm1, %v9948_v60  ;;  %v9970_v60 = vsel %vm1051_vm5, %v1118_v26, %v1120_v27  ;;  %v1130_v26 = vrot.slane %v9690_v59, 2  ;;  %v6786_v59 = vld [vmem:[%s12408_s1 + $0x14] sm:$0xf] }
  0xd2   : > { %v9994_v27 = vsel %vm1051_vm5, %v1128_v44, %v1130_v26  ;;  %v12601_v44 = vld [vmem:[#allocation9_spill] sm:$0xff]  ;;  %v12602_v26 = vld [vmem:[#allocation10_spill] sm:$0xff] }
  0xd3   : > { %7964 = vmatmul.mubr.msk.f32.gmra.mrb[24].mxu0 %vm204_vm1, %v9957_v18 }
  0xd4   : > { %7966 = vmatprep.mubr.msk.f32.mxu0 %vm204_vm1, %v9961_v58  ;;  %v9983_v58 = vsel %vm1051_vm5, %v1123_v40, %v1125_v48  ;;  %v12597_v40 = vld [vmem:[#allocation5_spill] sm:$0xff]  ;;  %v12599_v48 = vld [vmem:[#allocation7_spill] sm:$0xff] }
  0xd7   : > { %7967 = vmatmul.mubr.msk.f32.gmra.mrb[26].mxu0 %vm204_vm1, %v9970_v60 }
  0xd8   : > { %7969 = vmatprep.mubr.msk.f32.mxu0 %vm204_vm1, %v9974_v25 }
  0xdb   : > { %7970 = vmatmul.mubr.msk.f32.gmra.mrb[28].mxu0 %vm204_vm1, %v9983_v58 }
  0xdc   : > { %7972 = vmatprep.mubr.msk.f32.mxu0 %vm204_vm1, %v9987_v15 }
  0xdf   : > { %7973 = vmatmul.mubr.msk.f32.gmra.mrb[30].mxu0 %vm204_vm1, %v9994_v27 }
  0xe0   : > { %7977 = vmatprep.mubr.msk.f32.mxu0 %vm204_vm1, %v9392_v32  ;;  %v10062_v32 = vld [vmem:[#allocation2 + $0x180] sm:$0xff] }
  0xe3   : > { %7978 = vmatmul.mubr.msk.f32.vlgmr.msra.gmra.mrb[0].mxu0 %vm204_vm1, %v9394_v33  ;;  %v10068_v33 = vld [vmem:[#allocation2 + $0x188] sm:$0xff] }
  0xe4   : > { %8026 = vmatpush3.msk.msra.mxu0 %vm530_vm0, %v9805_v39  ;;  %7980 = vmatprep.mubr.msk.f32.mxu0 %vm204_vm1, %v9396_v34  ;;  %v6820_v39 = vld [vmem:[%s12408_s1 + $0x18] sm:$0xf] }
  0xe5   : > { %8075 = vmatprep.subr.msk.mxu0 %vm530_vm0, %v6786_v59 }
  0xe7   : > { %7981 = vmatmul.mubr.msk.f32.gmra.mrb[2].mxu0 %vm204_vm1, %v9402_v38 }
  0xe8   : > { %7983 = vmatprep.mubr.msk.f32.mxu0 %vm204_vm1, %v9415_v46 }
  0xeb   : > { %7984 = vmatmul.mubr.msk.f32.gmra.mrb[4].mxu0 %vm204_vm1, %v9417_v47 }
  0xec   : > { %7986 = vmatprep.mubr.msk.f32.mxu0 %vm204_vm1, %v9442_v55 }
  0xef   : > { %7987 = vmatmul.mubr.msk.f32.gmra.mrb[6].mxu0 %vm204_vm1, %v9444_v56 }
  0xf0   : > { %7989 = vmatprep.mubr.msk.f32.mxu0 %vm204_vm1, %v9461_v63 }
  0xf3   : > { %7990 = vmatmul.mubr.msk.f32.gmra.mrb[8].mxu0 %vm204_vm1, %v9463_v0 }
  0xf4   : > { %7992 = vmatprep.mubr.msk.f32.mxu0 %vm204_vm1, %v9489_v12 }
  0xf7   : > { %7993 = vmatmul.mubr.msk.f32.gmra.mrb[10].mxu0 %vm204_vm1, %v9491_v13 }
  0xf8   : > { %7995 = vmatprep.mubr.msk.f32.mxu0 %vm204_vm1, %v9521_v21 }
  0xfb   : > { %7996 = vmatmul.mubr.msk.f32.gmra.mrb[12].mxu0 %vm204_vm1, %v9523_v22 }
  0xfc   : > { %7998 = vmatprep.mubr.msk.f32.mxu0 %vm204_vm1, %v9540_v35 }
  0xff   : > { %7999 = vmatmul.mubr.msk.f32.gmra.mrb[14].mxu0 %vm204_vm1, %v9542_v36 }
 0x100   : > { %8001 = vmatprep.mubr.msk.f32.mxu0 %vm204_vm1, %v9559_v52 }
 0x103   : > { %8002 = vmatmul.mubr.msk.f32.gmra.mrb[16].mxu0 %vm204_vm1, %v9561_v53 }
 0x104   : > { %8004 = vmatprep.mubr.msk.f32.mxu0 %vm204_vm1, %v9578_v7 }
 0x107   : > { %8005 = vmatmul.mubr.msk.f32.gmra.mrb[18].mxu0 %vm204_vm1, %v9580_v8 }
 0x108   : > { %8007 = vmatprep.mubr.msk.f32.mxu0 %vm204_vm1, %v9597_v19 }
 0x10b   : > { %8008 = vmatmul.mubr.msk.f32.gmra.mrb[20].mxu0 %vm204_vm1, %v9599_v24 }
 0x10c   : > { %8010 = vmatprep.mubr.msk.f32.mxu0 %vm204_vm1, %v9616_v2 }
 0x10f   : > { %8011 = vmatmul.mubr.msk.f32.gmra.mrb[22].mxu0 %vm204_vm1, %v9618_v9 }
 0x110   : > { %8013 = vmatprep.mubr.msk.f32.mxu0 %vm204_vm1, %v9635_v41 }
 0x113   : > { %8014 = vmatmul.mubr.msk.f32.gmra.mrb[24].mxu0 %vm204_vm1, %v9637_v29 }
 0x114   : > { %8016 = vmatprep.mubr.msk.f32.mxu0 %vm204_vm1, %v9654_v23 }
 0x117   : > { %8017 = vmatmul.mubr.msk.f32.gmra.mrb[26].mxu0 %vm204_vm1, %v9656_v4 }
 0x118   : > { %8019 = vmatprep.mubr.msk.f32.mxu0 %vm204_vm1, %v9673_v6 }
 0x11b   : > { %8020 = vmatmul.mubr.msk.f32.gmra.mrb[28].mxu0 %vm204_vm1, %v9675_v16 }
 0x11c   : > { %8022 = vmatprep.mubr.msk.f32.mxu0 %vm204_vm1, %v10062_v32 }
 0x11f   : > { %8023 = vmatmul.mubr.msk.f32.gmra.mrb[30].mxu0 %vm204_vm1, %v10068_v33 }
 0x120   : > { %8027 = vmatprep.mubr.msk.f32.mxu0 %vm204_vm1, %v9413_v45  ;;  %v12596_v45 = vld [vmem:[#allocation4_spill] sm:$0xff] }
 0x123   : > { %8028 = vmatmul.mubr.msk.f32.vlgmr.msra.gmra.mrb[0].mxu0 %vm204_vm1, %v9430_v49  ;;  %v12598_v49 = vld [vmem:[#allocation6_spill] sm:$0xff] }
 0x124   : > { %8076 = vmatpush3.msk.msra.mxu0 %vm530_vm0, %v6786_v59  ;;  %8030 = vmatprep.mubr.msk.f32.mxu0 %vm204_vm1, %v9434_v51  ;;  %v12603_v59 = vld [vmem:[#allocation11_spill] sm:$0xff] }
 0x125   : > { %8125 = vmatprep.subr.msk.mxu0 %vm530_vm0, %v6820_v39 }
 0x127   : > { %8031 = vmatmul.mubr.msk.f32.gmra.mrb[2].mxu0 %vm204_vm1, %v9451_v57 }
 0x128   : > { %8033 = vmatprep.mubr.msk.f32.mxu0 %vm204_vm1, %v12595_v42 }
 0x12b   : > { %8034 = vmatmul.mubr.msk.f32.gmra.mrb[4].mxu0 %vm204_vm1, %v12596_v45  ;;  %v12604_v45 = vld [vmem:[#allocation12_spill] sm:$0xff] }
 0x12c   : > { %8036 = vmatprep.mubr.msk.f32.mxu0 %vm204_vm1, %v12597_v40  ;;  %v12605_v40 = vld [vmem:[#allocation13_spill] sm:$0xff] }
 0x12f   : > { %8037 = vmatmul.mubr.msk.f32.gmra.mrb[6].mxu0 %vm204_vm1, %v12598_v49  ;;  %v12606_v49 = vld [vmem:[#allocation14_spill] sm:$0xff] }
 0x130   : > { %8039 = vmatprep.mubr.msk.f32.mxu0 %vm204_vm1, %v12599_v48  ;;  %v12607_v48 = vld [vmem:[#allocation15_spill] sm:$0xff] }
 0x133   : > { %8040 = vmatmul.mubr.msk.f32.gmra.mrb[8].mxu0 %vm204_vm1, %v12600_v1  ;;  %v12608_v1 = vld [vmem:[#allocation16_spill] sm:$0xff] }
 0x134   : > { %8042 = vmatprep.mubr.msk.f32.mxu0 %vm204_vm1, %v12601_v44  ;;  %v12609_v44 = vld [vmem:[#allocation17_spill] sm:$0xff] }
 0x137   : > { %8043 = vmatmul.mubr.msk.f32.gmra.mrb[10].mxu0 %vm204_vm1, %v12602_v26  ;;  %v12610_v26 = vld [vmem:[#allocation18_spill] sm:$0xff] }
 0x138   : > { %8045 = vmatprep.mubr.msk.f32.mxu0 %vm204_vm1, %v12603_v59  ;;  %v12611_v59 = vld [vmem:[#allocation19_spill] sm:$0xff] }
 0x13b   : > { %8046 = vmatmul.mubr.msk.f32.gmra.mrb[12].mxu0 %vm204_vm1, %v12604_v45  ;;  %v12612_v45 = vld [vmem:[#allocation20_spill] sm:$0xff] }
 0x13c   : > { %8048 = vmatprep.mubr.msk.f32.mxu0 %vm204_vm1, %v12605_v40  ;;  %v12613_v40 = vld [vmem:[#allocation21_spill] sm:$0xff] }
 0x13f   : > { %8049 = vmatmul.mubr.msk.f32.gmra.mrb[14].mxu0 %vm204_vm1, %v12606_v49 }
 0x140   : > { %8051 = vmatprep.mubr.msk.f32.mxu0 %vm204_vm1, %v12607_v48  ;;  %v12614_v48 = vld [vmem:[#allocation23_spill] sm:$0xff] }
 0x143   : > { %8052 = vmatmul.mubr.msk.f32.gmra.mrb[16].mxu0 %vm204_vm1, %v12608_v1  ;;  %v12617_v1 = vld [vmem:[#allocation27_spill] sm:$0xff] }
 0x144   : > { %8054 = vmatprep.mubr.msk.f32.mxu0 %vm204_vm1, %v12609_v44  ;;  %v12615_v44 = vld [vmem:[#allocation25_spill] sm:$0xff] }
 0x147   : > { %8055 = vmatmul.mubr.msk.f32.gmra.mrb[18].mxu0 %vm204_vm1, %v12610_v26  ;;  %v1728_v26 = vrot.slane %v10068_v33, 1 }
 0x148   : > { %8057 = vmatprep.mubr.msk.f32.mxu0 %vm204_vm1, %v12611_v59  ;;  %v1727_v59 = vrot.slane %v10062_v32, 1 }
 0x14b   : > { %8058 = vmatmul.mubr.msk.f32.gmra.mrb[20].mxu0 %vm204_vm1, %v12612_v45  ;;  %v330_v45 = vld [vmem:[#allocation2 + $0x190] sm:$0x3] }
 0x14c   : > { %8060 = vmatprep.mubr.msk.f32.mxu0 %vm204_vm1, %v12613_v40  ;;  %v12616_v40 = vld [vmem:[#allocation26_spill] sm:$0xff] }
 0x14f   : > { %8061 = vmatmul.mubr.msk.f32.gmra.mrb[22].mxu0 %vm204_vm1, %v9663_v43  ;;  %v1730_v43 = vrot.slane %v330_v45, 1 }
 0x150   : > { %8063 = vmatprep.mubr.msk.f32.mxu0 %vm204_vm1, %v12614_v48  ;;  %v10138_v48 = vsel %vm383_vm4, %v1727_v59, %v1728_v26  ;;  %v6854_v59 = vld [vmem:[%s12408_s1 + $0x1c] sm:$0xf] }
 0x153   : > { %8064 = vmatmul.mubr.msk.f32.gmra.mrb[24].mxu0 %vm204_vm1, %v9682_v61 }
 0x154   : > { %8066 = vmatprep.mubr.msk.f32.mxu0 %vm204_vm1, %v9686_v30  ;;  %v10145_v30 = vsel %vm383_vm4, %v1728_v26, %v1730_v43  ;;  %v12618_v43 = vld [vmem:[#allocation28_spill] sm:$0xff] }
 0x155   : > { %v12622_v26 = vld [vmem:[#allocation32_spill] sm:$0xff] }
 0x157   : > { %8067 = vmatmul.mubr.msk.f32.gmra.mrb[26].mxu0 %vm204_vm1, %v12615_v44 }
 0x158   : > { %8069 = vmatprep.mubr.msk.f32.mxu0 %vm204_vm1, %v12616_v40 }
 0x15b   : > { %8070 = vmatmul.mubr.msk.f32.gmra.mrb[28].mxu0 %vm204_vm1, %v12617_v1 }
 0x15c   : > { %8072 = vmatprep.mubr.msk.f32.mxu0 %vm204_vm1, %v10138_v48 }
 0x15f   : > { %8073 = vmatmul.mubr.msk.f32.gmra.mrb[30].mxu0 %vm204_vm1, %v10145_v30 }
 0x160   : > { %8077 = vmatprep.mubr.msk.f32.mxu0 %vm204_vm1, %v9798_v14  ;;  %v12619_v14 = vld [vmem:[#allocation29_spill] sm:$0xff] }
 0x163   : > { %8078 = vmatmul.mubr.msk.f32.vlgmr.msra.gmra.mrb[0].mxu0 %vm204_vm1, %v9812_v37  ;;  %v12620_v37 = vld [vmem:[#allocation30_spill] sm:$0xff] }
 0x164   : > { %8126 = vmatpush3.msk.msra.mxu0 %vm530_vm0, %v6820_v39  ;;  %8080 = vmatprep.mubr.msk.f32.mxu0 %vm204_vm1, %v9816_v11  ;;  %v12621_v39 = vld [vmem:[#allocation31_spill] sm:$0xff] }
 0x165   : > { %8175 = vmatprep.subr.msk.mxu0 %vm530_vm0, %v6854_v59 }
 0x167   : > { %8081 = vmatmul.mubr.msk.f32.gmra.mrb[2].mxu0 %vm204_vm1, %v9827_v10 }
 0x168   : > { %8083 = vmatprep.mubr.msk.f32.mxu0 %vm204_vm1, %v12618_v43 }
 0x16b   : > { %8084 = vmatmul.mubr.msk.f32.gmra.mrb[4].mxu0 %vm204_vm1, %v9840_v28 }
 0x16c   : > { %8086 = vmatprep.mubr.msk.f32.mxu0 %vm204_vm1, %v12619_v14  ;;  %v12623_v14 = vld [vmem:[#allocation33_spill] sm:$0xff] }
 0x16f   : > { %8087 = vmatmul.mubr.msk.f32.gmra.mrb[6].mxu0 %vm204_vm1, %v9853_v17 }
 0x170   : > { %8089 = vmatprep.mubr.msk.f32.mxu0 %vm204_vm1, %v12620_v37  ;;  %v12624_v37 = vld [vmem:[#allocation34_spill] sm:$0xff] }
 0x173   : > { %8090 = vmatmul.mubr.msk.f32.gmra.mrb[8].mxu0 %vm204_vm1, %v9866_v54 }
 0x174   : > { %8092 = vmatprep.mubr.msk.f32.mxu0 %vm204_vm1, %v12621_v39  ;;  %v12625_v39 = vld [vmem:[#allocation35_spill] sm:$0xff] }
 0x177   : > { %8093 = vmatmul.mubr.msk.f32.gmra.mrb[10].mxu0 %vm204_vm1, %v9879_v62 }
 0x178   : > { %8095 = vmatprep.mubr.msk.f32.mxu0 %vm204_vm1, %v12622_v26  ;;  %v12626_v26 = vld [vmem:[#allocation37_spill] sm:$0xff] }
 0x17b   : > { %8096 = vmatmul.mubr.msk.f32.gmra.mrb[12].mxu0 %vm204_vm1, %v9892_v3 }
 0x17c   : > { %8098 = vmatprep.mubr.msk.f32.mxu0 %vm204_vm1, %v12623_v14  ;;  %v12627_v14 = vld [vmem:[#allocation38_spill] sm:$0xff] }
 0x17f   : > { %8099 = vmatmul.mubr.msk.f32.gmra.mrb[14].mxu0 %vm204_vm1, %v9905_v20 }
 0x180   : > { %8101 = vmatprep.mubr.msk.f32.mxu0 %vm204_vm1, %v12624_v37  ;;  %v12628_v37 = vld [vmem:[#allocation40_spill] sm:$0xff] }
 0x183   : > { %8102 = vmatmul.mubr.msk.f32.gmra.mrb[16].mxu0 %vm204_vm1, %v9918_v31 }
 0x184   : > { %8104 = vmatprep.mubr.msk.f32.mxu0 %vm204_vm1, %v12625_v39 }
 0x187   : > { %8105 = vmatmul.mubr.msk.f32.gmra.mrb[18].mxu0 %vm204_vm1, %v9931_v50  ;;  %v1999_v50 = vrot.slane %v10068_v33, 2 }
 0x188   : > { %8107 = vmatprep.mubr.msk.f32.mxu0 %vm204_vm1, %v12626_v26  ;;  %v1998_v26 = vrot.slane %v10062_v32, 2 }
 0x18b   : > { %8108 = vmatmul.mubr.msk.f32.gmra.mrb[20].mxu0 %vm204_vm1, %v9944_v5 }
 0x18c   : > { %8110 = vmatprep.mubr.msk.f32.mxu0 %vm204_vm1, %v12627_v14  ;;  %v10215_v14 = vsel %vm1051_vm5, %v1998_v26, %v1999_v50 }
 0x18f   : > { %8111 = vmatmul.mubr.msk.f32.gmra.mrb[22].mxu0 %vm204_vm1, %v9957_v18  ;;  %v2001_v18 = vrot.slane %v330_v45, 2  ;;  %v6888_v45 = vld [vmem:[%s12408_s1 + $0x20] sm:$0xf] }
 0x190   : > { %8113 = vmatprep.mubr.msk.f32.mxu0 %vm204_vm1, %v12628_v37 }
 0x193   : > { %8114 = vmatmul.mubr.msk.f32.gmra.mrb[24].mxu0 %vm204_vm1, %v9970_v60 }
 0x194   : > { %8116 = vmatprep.mubr.msk.f32.mxu0 %vm204_vm1, %v9974_v25  ;;  %v10222_v25 = vsel %vm1051_vm5, %v1999_v50, %v2001_v18 }
 0x197   : > { %8117 = vmatmul.mubr.msk.f32.gmra.mrb[26].mxu0 %vm204_vm1, %v9983_v58 }
 0x198   : > { %8119 = vmatprep.mubr.msk.f32.mxu0 %vm204_vm1, %v9987_v15 }
 0x19b   : > { %8120 = vmatmul.mubr.msk.f32.gmra.mrb[28].mxu0 %vm204_vm1, %v9994_v27 }
 0x19c   : > { %8122 = vmatprep.mubr.msk.f32.mxu0 %vm204_vm1, %v10215_v14 }
 0x19f   : > { %8123 = vmatmul.mubr.msk.f32.gmra.mrb[30].mxu0 %vm204_vm1, %v10222_v25 }
 0x1a0   : > { %8127 = vmatprep.mubr.msk.f32.mxu0 %vm204_vm1, %v9396_v34  ;;  %v10289_v34 = vld [vmem:[#allocation2 + $0x198] sm:$0xff] }
 0x1a3   : > { %8128 = vmatmul.mubr.msk.f32.vlgmr.msra.gmra.mrb[0].mxu0 %vm204_vm1, %v9402_v38  ;;  %v10295_v38 = vld [vmem:[#allocation2 + $0x1a0] sm:$0xff] }
 0x1a4   : > { %8176 = vmatpush3.msk.msra.mxu0 %vm530_vm0, %v6854_v59  ;;  %8130 = vmatprep.mubr.msk.f32.mxu0 %vm204_vm1, %v9415_v46  ;;  %v12629_v46 = vld [vmem:[#allocation4_spill] sm:$0xff] }
 0x1a5   : > { %8225 = vmatprep.subr.msk.mxu0 %vm530_vm0, %v6888_v45 }
 0x1a7   : > { %8131 = vmatmul.mubr.msk.f32.gmra.mrb[2].mxu0 %vm204_vm1, %v9417_v47  ;;  %v12630_v47 = vld [vmem:[#allocation5_spill] sm:$0xff] }
 0x1a8   : > { %8133 = vmatprep.mubr.msk.f32.mxu0 %vm204_vm1, %v9442_v55  ;;  %v12631_v55 = vld [vmem:[#allocation6_spill] sm:$0xff] }
 0x1ab   : > { %8134 = vmatmul.mubr.msk.f32.gmra.mrb[4].mxu0 %vm204_vm1, %v9444_v56  ;;  %v12632_v56 = vld [vmem:[#allocation7_spill] sm:$0xff] }
 0x1ac   : > { %8136 = vmatprep.mubr.msk.f32.mxu0 %vm204_vm1, %v9461_v63  ;;  %v12635_v63 = vld [vmem:[#allocation10_spill] sm:$0xff] }
 0x1af   : > { %8137 = vmatmul.mubr.msk.f32.gmra.mrb[6].mxu0 %vm204_vm1, %v9463_v0  ;;  %v12636_v0 = vld [vmem:[#allocation11_spill] sm:$0xff] }
 0x1b0   : > { %8139 = vmatprep.mubr.msk.f32.mxu0 %vm204_vm1, %v9489_v12  ;;  %v12638_v12 = vld [vmem:[#allocation13_spill] sm:$0xff] }
 0x1b3   : > { %8140 = vmatmul.mubr.msk.f32.gmra.mrb[8].mxu0 %vm204_vm1, %v9491_v13  ;;  %v12639_v13 = vld [vmem:[#allocation15_spill] sm:$0xff] }
 0x1b4   : > { %8142 = vmatprep.mubr.msk.f32.mxu0 %vm204_vm1, %v9521_v21  ;;  %v12640_v21 = vld [vmem:[#allocation16_spill] sm:$0xff] }
 0x1b7   : > { %8143 = vmatmul.mubr.msk.f32.gmra.mrb[10].mxu0 %vm204_vm1, %v9523_v22  ;;  %v12641_v22 = vld [vmem:[#allocation17_spill] sm:$0xff] }
 0x1b8   : > { %8145 = vmatprep.mubr.msk.f32.mxu0 %vm204_vm1, %v9540_v35  ;;  %v12643_v35 = vld [vmem:[#allocation19_spill] sm:$0xff] }
 0x1bb   : > { %8146 = vmatmul.mubr.msk.f32.gmra.mrb[12].mxu0 %vm204_vm1, %v9542_v36  ;;  %v12644_v36 = vld [vmem:[#allocation20_spill] sm:$0xff] }
 0x1bc   : > { %8148 = vmatprep.mubr.msk.f32.mxu0 %vm204_vm1, %v9559_v52  ;;  %v12646_v52 = vld [vmem:[#allocation22_spill] sm:$0xff] }
 0x1bf   : > { %8149 = vmatmul.mubr.msk.f32.gmra.mrb[14].mxu0 %vm204_vm1, %v9561_v53  ;;  %v12647_v53 = vld [vmem:[#allocation23_spill] sm:$0xff] }
 0x1c0   : > { %8151 = vmatprep.mubr.msk.f32.mxu0 %vm204_vm1, %v9578_v7  ;;  %v12648_v7 = vld [vmem:[#allocation24_spill] sm:$0xff] }
 0x1c3   : > { %8152 = vmatmul.mubr.msk.f32.gmra.mrb[16].mxu0 %vm204_vm1, %v9580_v8  ;;  %v2538_v8 = vrot.slane %v10289_v34, 1 }
 0x1c4   : > { %8154 = vmatprep.mubr.msk.f32.mxu0 %vm204_vm1, %v9597_v19  ;;  %v333_v19 = vld [vmem:[#allocation2 + $0x1a8] sm:$0x3] }
 0x1c5   : > { %v2812_v50 = vrot.slane %v333_v19, 2 }
 0x1c7   : > { %8155 = vmatmul.mubr.msk.f32.gmra.mrb[18].mxu0 %vm204_vm1, %v9599_v24  ;;  %v2541_v24 = vrot.slane %v333_v19, 1 }
 0x1c8   : > { %8157 = vmatprep.mubr.msk.f32.mxu0 %vm204_vm1, %v9616_v2 }
 0x1cb   : > { %8158 = vmatmul.mubr.msk.f32.gmra.mrb[20].mxu0 %vm204_vm1, %v9618_v9  ;;  %v2539_v9 = vrot.slane %v10295_v38, 1 }
 0x1cc   : > { %8160 = vmatprep.mubr.msk.f32.mxu0 %vm204_vm1, %v9635_v41  ;;  %v12645_v41 = vld [vmem:[#allocation21_spill] sm:$0xff] }
 0x1cd   : > { %v2542_v2 = vsel %vm383_vm4, %v2539_v9, %v2541_v24 }
 0x1cf   : > { %8161 = vmatmul.mubr.msk.f32.gmra.mrb[22].mxu0 %vm204_vm1, %v9637_v29  ;;  %v2540_v29 = vsel %vm383_vm4, %v2538_v8, %v2539_v9 }
 0x1d0   : > { %8163 = vmatprep.mubr.msk.f32.mxu0 %vm204_vm1, %v9654_v23  ;;  %v12642_v23 = vld [vmem:[#allocation18_spill] sm:$0xff] }
 0x1d3   : > { %8164 = vmatmul.mubr.msk.f32.gmra.mrb[24].mxu0 %vm204_vm1, %v9656_v4  ;;  %v12649_v4 = vld [vmem:[#allocation29_spill] sm:$0xff] }
 0x1d4   : > { %8166 = vmatprep.mubr.msk.f32.mxu0 %vm204_vm1, %v9673_v6  ;;  %v12637_v6 = vld [vmem:[#allocation12_spill] sm:$0xff] }
 0x1d7   : > { %8167 = vmatmul.mubr.msk.f32.gmra.mrb[26].mxu0 %vm204_vm1, %v9675_v16  ;;  %v12650_v16 = vld [vmem:[#allocation30_spill] sm:$0xff] }
 0x1d8   : > { %8169 = vmatprep.mubr.msk.f32.mxu0 %vm204_vm1, %v10062_v32 }
 0x1db   : > { %8170 = vmatmul.mubr.msk.f32.gmra.mrb[28].mxu0 %vm204_vm1, %v10068_v33 }
 0x1dc   : > { %8172 = vmatprep.mubr.msk.f32.mxu0 %vm204_vm1, %v10289_v34 }
 0x1df   : > { %8173 = vmatmul.mubr.msk.f32.gmra.mrb[30].mxu0 %vm204_vm1, %v10295_v38 }
 0x1e0   : > { %8177 = vmatprep.mubr.msk.f32.mxu0 %vm204_vm1, %v9434_v51  ;;  %v12633_v51 = vld [vmem:[#allocation8_spill] sm:$0xff] }
 0x1e3   : > { %8178 = vmatmul.mubr.msk.f32.vlgmr.msra.gmra.mrb[0].mxu0 %vm204_vm1, %v9451_v57  ;;  %v12634_v57 = vld [vmem:[#allocation9_spill] sm:$0xff] }
 0x1e4   : > { %8226 = vmatpush3.msk.msra.mxu0 %vm530_vm0, %v6888_v45  ;;  %8180 = vmatprep.mubr.msk.f32.mxu0 %vm204_vm1, %v12595_v42 }
 0x1e7   : > { %8181 = vmatmul.mubr.msk.f32.gmra.mrb[2].mxu0 %vm204_vm1, %v12629_v46 }
 0x1e8   : > { %8183 = vmatprep.mubr.msk.f32.mxu0 %vm204_vm1, %v12630_v47 }
 0x1eb   : > { %8184 = vmatmul.mubr.msk.f32.gmra.mrb[4].mxu0 %vm204_vm1, %v12631_v55 }
 0x1ec   : > { %8186 = vmatprep.mubr.msk.f32.mxu0 %vm204_vm1, %v12632_v56 }
 0x1ef   : > { %8187 = vmatmul.mubr.msk.f32.gmra.mrb[6].mxu0 %vm204_vm1, %v12633_v51 }
 0x1f0   : > { %8189 = vmatprep.mubr.msk.f32.mxu0 %vm204_vm1, %v12634_v57 }
 0x1f3   : > { %8190 = vmatmul.mubr.msk.f32.gmra.mrb[8].mxu0 %vm204_vm1, %v12635_v63 }
 0x1f4   : > { %8192 = vmatprep.mubr.msk.f32.mxu0 %vm204_vm1, %v12636_v0 }
 0x1f7   : > { %8193 = vmatmul.mubr.msk.f32.gmra.mrb[10].mxu0 %vm204_vm1, %v12637_v6 }
 0x1f8   : > { %8195 = vmatprep.mubr.msk.f32.mxu0 %vm204_vm1, %v12638_v12 }
 0x1fb   : > { %8196 = vmatmul.mubr.msk.f32.gmra.mrb[12].mxu0 %vm204_vm1, %v12606_v49 }
 0x1fc   : > { %8198 = vmatprep.mubr.msk.f32.mxu0 %vm204_vm1, %v12639_v13 }
 0x1ff   : > { %8199 = vmatmul.mubr.msk.f32.gmra.mrb[14].mxu0 %vm204_vm1, %v12640_v21 }
 0x200   : > { %8201 = vmatprep.mubr.msk.f32.mxu0 %vm204_vm1, %v12641_v22 }
 0x203   : > { %8202 = vmatmul.mubr.msk.f32.gmra.mrb[16].mxu0 %vm204_vm1, %v12642_v23 }
 0x204   : > { %8204 = vmatprep.mubr.msk.f32.mxu0 %vm204_vm1, %v12643_v35 }
 0x207   : > { %8205 = vmatmul.mubr.msk.f32.gmra.mrb[18].mxu0 %vm204_vm1, %v12644_v36 }
 0x208   : > { %8207 = vmatprep.mubr.msk.f32.mxu0 %vm204_vm1, %v12645_v41 }
 0x20b   : > { %8208 = vmatmul.mubr.msk.f32.gmra.mrb[20].mxu0 %vm204_vm1, %v12646_v52 }
 0x20c   : > { %8210 = vmatprep.mubr.msk.f32.mxu0 %vm204_vm1, %v12647_v53 }
 0x20f   : > { %8211 = vmatmul.mubr.msk.f32.gmra.mrb[22].mxu0 %vm204_vm1, %v9682_v61  ;;  %v12651_v61 = vld [vmem:[#allocation31_spill] sm:$0xff] }
 0x210   : > { %8213 = vmatprep.mubr.msk.f32.mxu0 %vm204_vm1, %v12648_v7 }
 0x213   : > { %8214 = vmatmul.mubr.msk.f32.gmra.mrb[24].mxu0 %vm204_vm1, %v12615_v44 }
 0x214   : > { %8216 = vmatprep.mubr.msk.f32.mxu0 %vm204_vm1, %v12616_v40 }
 0x217   : > { %8217 = vmatmul.mubr.msk.f32.gmra.mrb[26].mxu0 %vm204_vm1, %v12617_v1 }
 0x218   : > { %8219 = vmatprep.mubr.msk.f32.mxu0 %vm204_vm1, %v10138_v48 }
 0x21b   : > { %8220 = vmatmul.mubr.msk.f32.gmra.mrb[28].mxu0 %vm204_vm1, %v10145_v30  ;;  %v12652_v30 = vld [vmem:[#allocation32_spill] sm:$0xff] }
 0x21c   : > { %8222 = vmatprep.mubr.msk.f32.mxu0 %vm204_vm1, %v2540_v29 }
 0x21f   : > { %8223 = vmatmul.mubr.msk.f32.gmra.mrb[30].mxu0 %vm204_vm1, %v2542_v2 }
 0x220   : > { %8227 = vmatprep.mubr.msk.f32.mxu0 %vm204_vm1, %v9816_v11  ;;  %v12653_v11 = vld [vmem:[#allocation33_spill] sm:$0xff] }
 0x223   : > { %8228 = vmatmul.mubr.msk.f32.vlgmr.msra.gmra.mrb[0].mxu0 %vm204_vm1, %v9827_v10  ;;  %v12654_v10 = vld [vmem:[#allocation34_spill] sm:$0xff] }
 0x224   : > { %8230 = vmatprep.mubr.msk.f32.mxu0 %vm204_vm1, %v12618_v43 }
 0x227   : > { %8231 = vmatmul.mubr.msk.f32.gmra.mrb[2].mxu0 %vm204_vm1, %v9840_v28  ;;  %v12656_v28 = vld [vmem:[#allocation37_spill] sm:$0xff] }
 0x228   : > { %8233 = vmatprep.mubr.msk.f32.mxu0 %vm204_vm1, %v12649_v4 }
 0x22b   : > { %8234 = vmatmul.mubr.msk.f32.gmra.mrb[4].mxu0 %vm204_vm1, %v9853_v17  ;;  %v12655_v17 = vld [vmem:[#allocation36_spill] sm:$0xff] }
 0x22c   : > { %8236 = vmatprep.mubr.msk.f32.mxu0 %vm204_vm1, %v12650_v16 }
 0x22f   : > { %8237 = vmatmul.mubr.msk.f32.gmra.mrb[6].mxu0 %vm204_vm1, %v9866_v54  ;;  %v12657_v54 = vld [vmem:[#allocation38_spill] sm:$0xff] }
 0x230   : > { %8239 = vmatprep.mubr.msk.f32.mxu0 %vm204_vm1, %v12651_v61 }
 0x233   : > { %8240 = vmatmul.mubr.msk.f32.gmra.mrb[8].mxu0 %vm204_vm1, %v9879_v62  ;;  %v12658_v62 = vld [vmem:[#allocation39_spill] sm:$0xff] }
 0x234   : > { %8242 = vmatprep.mubr.msk.f32.mxu0 %vm204_vm1, %v12652_v30 }
 0x237   : > { %8243 = vmatmul.mubr.msk.f32.gmra.mrb[10].mxu0 %vm204_vm1, %v9892_v3  ;;  %v12659_v3 = vld [vmem:[#allocation41_spill] sm:$0xff] }
 0x238   : > { %8245 = vmatprep.mubr.msk.f32.mxu0 %vm204_vm1, %v12653_v11 }
 0x23b   : > { %8246 = vmatmul.mubr.msk.f32.gmra.mrb[12].mxu0 %vm204_vm1, %v9905_v20  ;;  %v2809_v20 = vrot.slane %v10289_v34, 2 }
 0x23c   : > { %8248 = vmatprep.mubr.msk.f32.mxu0 %vm204_vm1, %v12654_v10 }
 0x23f   : > { %8249 = vmatmul.mubr.msk.f32.gmra.mrb[14].mxu0 %vm204_vm1, %v9918_v31  ;;  %v2810_v31 = vrot.slane %v10295_v38, 2 }
 0x240   : > { %8251 = vmatprep.mubr.msk.f32.mxu0 %vm204_vm1, %v12625_v39 }
 0x241   : > { %v2813_v18 = vsel %vm1051_vm5, %v2810_v31, %v2812_v50 }
 0x243   : > { %8252 = vmatmul.mubr.msk.f32.gmra.mrb[16].mxu0 %vm204_vm1, %v12655_v17 }
 0x244   : > { %8254 = vmatprep.mubr.msk.f32.mxu0 %vm204_vm1, %v12656_v28 }
 0x247   : > { %8255 = vmatmul.mubr.msk.f32.gmra.mrb[18].mxu0 %vm204_vm1, %v9944_v5  ;;  %v2811_v5 = vsel %vm1051_vm5, %v2809_v20, %v2810_v31 }
 0x248   : > { %8257 = vmatprep.mubr.msk.f32.mxu0 %vm204_vm1, %v12657_v54 }
 0x24b   : > { %8258 = vmatmul.mubr.msk.f32.gmra.mrb[20].mxu0 %vm204_vm1, %v12658_v62 }
 0x24c   : > { %8260 = vmatprep.mubr.msk.f32.mxu0 %vm204_vm1, %v12628_v37 }
 0x24f   : > { %8261 = vmatmul.mubr.msk.f32.gmra.mrb[22].mxu0 %vm204_vm1, %v9970_v60 }
 0x250   : > { %8263 = vmatprep.mubr.msk.f32.mxu0 %vm204_vm1, %v12659_v3 }
 0x253   : > { %8264 = vmatmul.mubr.msk.f32.gmra.mrb[24].mxu0 %vm204_vm1, %v9983_v58 }
 0x254   : > { %8266 = vmatprep.mubr.msk.f32.mxu0 %vm204_vm1, %v9987_v15 }
 0x257   : > { %8267 = vmatmul.mubr.msk.f32.gmra.mrb[26].mxu0 %vm204_vm1, %v9994_v27 }
 0x258   : > { %8269 = vmatprep.mubr.msk.f32.mxu0 %vm204_vm1, %v10215_v14 }
 0x25b   : > { %8270 = vmatmul.mubr.msk.f32.gmra.mrb[28].mxu0 %vm204_vm1, %v10222_v25 }
 0x25c   : > { %8272 = vmatprep.mubr.msk.f32.mxu0 %vm204_vm1, %v2811_v5 }
 0x25f   : > { %8273 = vmatmul.mubr.msk.f32.gmra.mrb[30].mxu0 %vm204_vm1, %v2813_v18 }
 0x2f6   : > { %v10432_v60 = vpop.f32.mrb[0].mxu0 }
 0x2f7   : > { %v3081_v58 = vsel %vm204_vm1, %v10432_v60, 0.0  ;;  %v10436_v15 = vpop.f32.mrb[1].mxu0 }
 0x2f8   : > { %v3080_v27 = vsel %vm204_vm1, %v10436_v15, 0.0 }
 0x2f9   : > { %v3082_v32 = vadd.f32 %v3081_v58, %v3080_v27 }
 0x2fa   : > { %v10440_v33 = vpop.f32.mrb[2].mxu0 }
 0x2fb   : > { %v10442_v25 = vpop.f32.mrb[3].mxu0  ;;  %v3085_v49 = vsel %vm204_vm1, %v10440_v33, 0.0 }
 0x2fc   : > { %v3083_v42 = vsel %vm204_vm1, %v10442_v25, 0.0 }
 0x2fd   : > { %v3084_v40 = vadd.f32 %v3083_v42, %v3082_v32 }
 0x2fe   : > { %v10448_v48 = vpop.f32.mrb[4].mxu0 }
 0x2ff   : > { %v10450_v1 = vpop.f32.mrb[5].mxu0  ;;  %v3086_v44 = vadd.f32 %v3085_v49, %v3084_v40  ;;  %v3089_v14 = vsel %vm204_vm1, %v10448_v48, 0.0 }
 0x300   : > { %v3087_v59 = vsel %vm204_vm1, %v10450_v1, 0.0 }
 0x301   : > { %v3088_v43 = vadd.f32 %v3087_v59, %v3086_v44 }
 0x302   : > { %v10456_v37 = vpop.f32.mrb[6].mxu0 }
 0x303   : > { %v10458_v39 = vpop.f32.mrb[7].mxu0  ;;  %v3090_v26 = vadd.f32 %v3089_v14, %v3088_v43  ;;  %v3093_v38 = vsel %vm204_vm1, %v10456_v37, 0.0 }
 0x304   : > { %v3091_v45 = vsel %vm204_vm1, %v10458_v39, 0.0 }
 0x305   : > { %v3092_v34 = vadd.f32 %v3091_v45, %v3090_v26 }
 0x306   : > { %v10464_v46 = vpop.f32.mrb[8].mxu0 }
 0x307   : > { %v10466_v47 = vpop.f32.mrb[9].mxu0  ;;  %v3094_v55 = vadd.f32 %v3093_v38, %v3092_v34  ;;  %v3097_v57 = vsel %vm204_vm1, %v10464_v46, 0.0 }
 0x308   : > { %v3095_v56 = vsel %vm204_vm1, %v10466_v47, 0.0 }
 0x309   : > { %v3096_v51 = vadd.f32 %v3095_v56, %v3094_v55 }
 0x30a   : > { %v10472_v63 = vpop.f32.mrb[10].mxu0 }
 0x30b   : > { %v10474_v0 = vpop.f32.mrb[11].mxu0  ;;  %v3098_v6 = vadd.f32 %v3097_v57, %v3096_v51  ;;  %v3101_v21 = vsel %vm204_vm1, %v10472_v63, 0.0 }
 0x30c   : > { %v3099_v12 = vsel %vm204_vm1, %v10474_v0, 0.0 }
 0x30d   : > { %v3100_v13 = vadd.f32 %v3099_v12, %v3098_v6 }
 0x30e   : > { %v10480_v22 = vpop.f32.mrb[12].mxu0 }
 0x30f   : > { %v10482_v23 = vpop.f32.mrb[13].mxu0  ;;  %v3102_v35 = vadd.f32 %v3101_v21, %v3100_v13  ;;  %v3105_v52 = vsel %vm204_vm1, %v10480_v22, 0.0 }
 0x310   : > { %v3103_v36 = vsel %vm204_vm1, %v10482_v23, 0.0 }
 0x311   : > { %v3104_v41 = vadd.f32 %v3103_v36, %v3102_v35 }
 0x312   : > { %v10488_v53 = vpop.f32.mrb[14].mxu0 }
 0x313   : > { %v10490_v7 = vpop.f32.mrb[15].mxu0  ;;  %v3106_v8 = vadd.f32 %v3105_v52, %v3104_v41  ;;  %v3109_v24 = vsel %vm204_vm1, %v10488_v53, 0.0 }
 0x314   : > { %v3107_v9 = vsel %vm204_vm1, %v10490_v7, 0.0 }
 0x315   : > { %v3108_v19 = vadd.f32 %v3107_v9, %v3106_v8 }
 0x316   : > { %v10496_v29 = vpop.f32.mrb[16].mxu0 }
 0x317   : > { %v10498_v2 = vpop.f32.mrb[17].mxu0  ;;  %v3110_v4 = vadd.f32 %v3109_v24, %v3108_v19  ;;  %v3113_v30 = vsel %vm204_vm1, %v10496_v29, 0.0 }
 0x318   : > { %v3111_v16 = vsel %vm204_vm1, %v10498_v2, 0.0 }
 0x319   : > { %v3112_v61 = vadd.f32 %v3111_v16, %v3110_v4 }
 0x31a   : > { %v10504_v11 = vpop.f32.mrb[18].mxu0 }
 0x31b   : > { %v10506_v10 = vpop.f32.mrb[19].mxu0  ;;  %v3114_v17 = vadd.f32 %v3113_v30, %v3112_v61  ;;  %v3117_v62 = vsel %vm204_vm1, %v10504_v11, 0.0 }
 0x31c   : > { %v3115_v28 = vsel %vm204_vm1, %v10506_v10, 0.0 }
 0x31d   : > { %v3116_v54 = vadd.f32 %v3115_v28, %v3114_v17 }
 0x31e   : > { %v10512_v3 = vpop.f32.mrb[20].mxu0 }
 0x31f   : > { %v10514_v20 = vpop.f32.mrb[21].mxu0  ;;  %v3118_v31 = vadd.f32 %v3117_v62, %v3116_v54  ;;  %v3121_v18 = vsel %vm204_vm1, %v10512_v3, 0.0  ;;  %v6922_v54 = vld [vmem:[%s12409_s2 + $0x4] sm:$0xf] }
 0x320   : > { %v3119_v50 = vsel %vm204_vm1, %v10514_v20, 0.0  ;;  %8275 = vmatprep.subr.msk.mxu1 %vm530_vm0, %v6922_v54 }
 0x321   : > { %v3120_v5 = vadd.f32 %v3119_v50, %v3118_v31  ;;  %8276 = vmatpush3.msk.msra.mxu1 %vm530_vm0, %v6922_v54 }
 0x322   : > { %v10520_v58 = vpop.f32.mrb[22].mxu0 }
 0x323   : > { %v10522_v27 = vpop.f32.mrb[23].mxu0  ;;  %v3122_v32 = vadd.f32 %v3121_v18, %v3120_v5  ;;  %v3125_v49 = vsel %vm204_vm1, %v10520_v58, 0.0 }
 0x324   : > { %v3123_v42 = vsel %vm204_vm1, %v10522_v27, 0.0 }
 0x325   : > { %v3124_v40 = vadd.f32 %v3123_v42, %v3122_v32  ;;  %v10556_v42 = vld [vmem:[%s12409_s2] sm:$0xf] }
 0x326   : > { %v8265_v44 = vpop.f32.mrb[24].mxu0  ;;  %8325 = vmatprep.subr.msk.mxu1 %vm530_vm0, %v10556_v42 }
 0x327   : > { %v3009_v59 = vpop.f32.mrb[25].mxu0  ;;  %v3126_v43 = vadd.f32 %v3125_v49, %v3124_v40  ;;  %v3129_v45 = vsel %vm204_vm1, %v8265_v44, 0.0 }
 0x328   : > { %v3127_v14 = vsel %vm204_vm1, %v3009_v59, 0.0 }
 0x329   : > { %v3128_v26 = vadd.f32 %v3127_v14, %v3126_v43 }
 0x32a   : > { %v8268_v34 = vpop.f32.mrb[26].mxu0 }
 0x32b   : > { %v3019_v38 = vpop.f32.mrb[27].mxu0  ;;  %v3130_v55 = vadd.f32 %v3129_v45, %v3128_v26  ;;  %v3133_v57 = vsel %vm204_vm1, %v8268_v34, 0.0 }
 0x32c   : > { %v3131_v56 = vsel %vm204_vm1, %v3019_v38, 0.0 }
 0x32d   : > { %v3132_v51 = vadd.f32 %v3131_v56, %v3130_v55 }
 0x32e   : > { %v8271_v6 = vpop.f32.mrb[28].mxu0 }
 0x32f   : > { %v3029_v12 = vpop.f32.mrb[29].mxu0  ;;  %v3134_v13 = vadd.f32 %v3133_v57, %v3132_v51  ;;  %v3137_v36 = vsel %vm204_vm1, %v8271_v6, 0.0 }
 0x330   : > { %v3135_v21 = vsel %vm204_vm1, %v3029_v12, 0.0 }
 0x331   : > { %v3136_v35 = vadd.f32 %v3135_v21, %v3134_v13 }
 0x332   : > { %v8274_v41 = vpop.f32.mrb[30].mxu0 }
 0x333   : > { %v3039_v52 = vpop.f32.mrb[31].mxu0  ;;  %v3138_v8 = vadd.f32 %v3137_v36, %v3136_v35  ;;  %v3141_v24 = vsel %vm204_vm1, %v8274_v41, 0.0 }
 0x334   : > { %v3139_v9 = vsel %vm204_vm1, %v3039_v52, 0.0 }
 0x335   : > { %v3140_v19 = vadd.f32 %v3139_v9, %v3138_v8 }
 0x337   : > { %v3142_v4 = vadd.f32 %v3141_v24, %v3140_v19 }
 0x339   : > { %v3143_v16 = vrot.slane %v3142_v4, 4 }
 0x33b   : > { %v3144_v61 = vadd.f32 %v3143_v16, %v3142_v4 }
 0x33d   : > { %v3145_v30 = vrot.slane %v3144_v61, 2 }
 0x33f   : > { %v3146_v17 = vadd.f32 %v3145_v30, %v3144_v61 }
 0x341   : > { %v3147_v28 = vrot.slane %v3146_v17, 1 }
 0x343   : > { %v3148_v62 = vadd.f32 %v3147_v28, %v3146_v17 }
 0x345   : > { %v3149_v31 = vmul.f32 0.00390625, %v3148_v62 }
 0x347   : > { %v10542_v50 = vsub.f32 %v10436_v15, %v3149_v31  ;;  %v10545_v5 = vsub.f32 %v10432_v60, %v3149_v31  ;;  %v10548_v18 = vsub.f32 %v10442_v25, %v3149_v31  ;;  %v10551_v32 = vsub.f32 %v10440_v33, %v3149_v31 }
 0x348   : > { %v10559_v40 = vsub.f32 %v10450_v1, %v3149_v31  ;;  %v10562_v15 = vsub.f32 %v10448_v48, %v3149_v31  ;;  %v10565_v60 = vsub.f32 %v10458_v39, %v3149_v31  ;;  %v10568_v25 = vsub.f32 %v10456_v37, %v3149_v31 }
 0x349   : > { %v10573_v33 = vsub.f32 %v10466_v47, %v3149_v31  ;;  %v10576_v49 = vsub.f32 %v10464_v46, %v3149_v31  ;;  %v10579_v1 = vsub.f32 %v10474_v0, %v3149_v31  ;;  %v10582_v48 = vsub.f32 %v10472_v63, %v3149_v31 }
 0x34a   : > { %v10585_v39 = vsub.f32 %v10482_v23, %v3149_v31  ;;  %v10588_v37 = vsub.f32 %v10480_v22, %v3149_v31  ;;  %v10591_v43 = vsub.f32 %v10490_v7, %v3149_v31  ;;  %v10594_v47 = vsub.f32 %v10488_v53, %v3149_v31 }
 0x34b   : > { %v10597_v46 = vsub.f32 %v10498_v2, %v3149_v31  ;;  %v10600_v0 = vsub.f32 %v10496_v29, %v3149_v31  ;;  %v10603_v63 = vsub.f32 %v10506_v10, %v3149_v31  ;;  %v10606_v23 = vsub.f32 %v10504_v11, %v3149_v31 }
 0x34c   : > { %v10609_v22 = vsub.f32 %v10514_v20, %v3149_v31  ;;  %v10612_v7 = vsub.f32 %v10512_v3, %v3149_v31  ;;  %v10615_v53 = vsub.f32 %v10522_v27, %v3149_v31  ;;  %v10618_v2 = vsub.f32 %v10520_v58, %v3149_v31 }
 0x34d   : > { %v10620_v29 = vsub.f32 %v3009_v59, %v3149_v31  ;;  %v10622_v14 = vsub.f32 %v8265_v44, %v3149_v31  ;;  %v10624_v10 = vsub.f32 %v3019_v38, %v3149_v31  ;;  %v10626_v11 = vsub.f32 %v8268_v34, %v3149_v31 }
 0x34e   : > { %v10628_v26 = vsub.f32 %v3029_v12, %v3149_v31  ;;  %v10630_v20 = vsub.f32 %v8271_v6, %v3149_v31  ;;  %v10632_v3 = vsub.f32 %v3039_v52, %v3149_v31  ;;  %v10634_v45 = vsub.f32 %v8274_v41, %v3149_v31 }
 0x34f   : > { %v3182_v58 = vmul.f32 %v10542_v50, %v10542_v50  ;;  %v3183_v27 = vmul.f32 %v10545_v5, %v10545_v5  ;;  %v3184_v44 = vmul.f32 %v10548_v18, %v10548_v18  ;;  %v3185_v59 = vmul.f32 %v10551_v32, %v10551_v32 }
 0x350   : > { %v3186_v56 = vmul.f32 %v10559_v40, %v10559_v40  ;;  %v3187_v6 = vmul.f32 %v10562_v15, %v10562_v15  ;;  %v3188_v21 = vmul.f32 %v10565_v60, %v10565_v60  ;;  %v3189_v41 = vmul.f32 %v10568_v25, %v10568_v25 }
 0x351   : > { %v3214_v34 = vsel %vm204_vm1, %v3182_v58, 0.0  ;;  %v3215_v38 = vsel %vm204_vm1, %v3183_v27, 0.0  ;;  %v3217_v51 = vsel %vm204_vm1, %v3184_v44, 0.0  ;;  %v3219_v12 = vsel %vm204_vm1, %v3185_v59, 0.0 }
 0x352   : > { %v3216_v55 = vadd.f32 %v3215_v38, %v3214_v34  ;;  %v3221_v35 = vsel %vm204_vm1, %v3186_v56, 0.0  ;;  %v3223_v52 = vsel %vm204_vm1, %v3187_v6, 0.0  ;;  %v3190_v9 = vmul.f32 %v10573_v33, %v10573_v33 }
 0x353   : > { %v3225_v19 = vsel %vm204_vm1, %v3188_v21, 0.0  ;;  %v3191_v4 = vmul.f32 %v10576_v49, %v10576_v49  ;;  %v3227_v16 = vsel %vm204_vm1, %v3189_v41, 0.0  ;;  %v3192_v30 = vmul.f32 %v10579_v1, %v10579_v1 }
 0x354   : > { %v3218_v57 = vadd.f32 %v3217_v51, %v3216_v55  ;;  %v3229_v17 = vsel %vm204_vm1, %v3190_v9, 0.0  ;;  %v3193_v54 = vmul.f32 %v10582_v48, %v10582_v48  ;;  %v3194_v58 = vmul.f32 %v10585_v39, %v10585_v39 }
 0x355   : > { %v3231_v62 = vsel %vm204_vm1, %v3191_v4, 0.0  ;;  %v3233_v27 = vsel %vm204_vm1, %v3192_v30, 0.0  ;;  %v3195_v59 = vmul.f32 %v10588_v37, %v10588_v37  ;;  %v3196_v55 = vmul.f32 %v10591_v43, %v10591_v43 }
 0x356   : > { %v3220_v13 = vadd.f32 %v3219_v12, %v3218_v57  ;;  %v3235_v34 = vsel %vm204_vm1, %v3193_v54, 0.0  ;;  %v3237_v56 = vsel %vm204_vm1, %v3194_v58, 0.0  ;;  %v3197_v57 = vmul.f32 %v10594_v47, %v10594_v47 }
 0x357   : > { %v3239_v6 = vsel %vm204_vm1, %v3195_v59, 0.0  ;;  %v3241_v21 = vsel %vm204_vm1, %v3196_v55, 0.0 }
 0x358   : > { %v3222_v36 = vadd.f32 %v3221_v35, %v3220_v13  ;;  %v3198_v13 = vmul.f32 %v10597_v46, %v10597_v46  ;;  %v3243_v41 = vsel %vm204_vm1, %v3197_v57, 0.0 }
 0x35a   : > { %v3224_v8 = vadd.f32 %v3223_v52, %v3222_v36  ;;  %v3199_v36 = vmul.f32 %v10600_v0, %v10600_v0  ;;  %v3245_v9 = vsel %vm204_vm1, %v3198_v13, 0.0 }
 0x35c   : > { %v3226_v24 = vadd.f32 %v3225_v19, %v3224_v8  ;;  %v3200_v8 = vmul.f32 %v10603_v63, %v10603_v63  ;;  %v3247_v4 = vsel %vm204_vm1, %v3199_v36, 0.0 }
 0x35e   : > { %v3228_v61 = vadd.f32 %v3227_v16, %v3226_v24  ;;  %v3201_v24 = vmul.f32 %v10606_v23, %v10606_v23  ;;  %v3249_v30 = vsel %vm204_vm1, %v3200_v8, 0.0 }
 0x360   : > { %v3230_v28 = vadd.f32 %v3229_v17, %v3228_v61  ;;  %v3202_v61 = vmul.f32 %v10609_v22, %v10609_v22  ;;  %v3251_v54 = vsel %vm204_vm1, %v3201_v24, 0.0 }
 0x362   : > { %v3232_v31 = vadd.f32 %v3231_v62, %v3230_v28  ;;  %v3203_v28 = vmul.f32 %v10612_v7, %v10612_v7  ;;  %v3253_v58 = vsel %vm204_vm1, %v3202_v61, 0.0 }
 0x364   : > { %v3234_v44 = vadd.f32 %v3233_v27, %v3232_v31  ;;  %v3204_v31 = vmul.f32 %v10615_v53, %v10615_v53  ;;  %v3255_v59 = vsel %vm204_vm1, %v3203_v28, 0.0 }
 0x366   : > { %v3236_v38 = vadd.f32 %v3235_v34, %v3234_v44  ;;  %v3205_v44 = vmul.f32 %v10618_v2, %v10618_v2  ;;  %v3257_v55 = vsel %vm204_vm1, %v3204_v31, 0.0 }
 0x368   : > { %v3238_v51 = vadd.f32 %v3237_v56, %v3236_v38  ;;  %v3206_v38 = vmul.f32 %v10620_v29, %v10620_v29  ;;  %v3259_v57 = vsel %vm204_vm1, %v3205_v44, 0.0 }
 0x36a   : > { %v3240_v12 = vadd.f32 %v3239_v6, %v3238_v51  ;;  %v3207_v51 = vmul.f32 %v10622_v14, %v10622_v14  ;;  %v3261_v13 = vsel %vm204_vm1, %v3206_v38, 0.0 }
 0x36c   : > { %v3242_v35 = vadd.f32 %v3241_v21, %v3240_v12  ;;  %v3208_v12 = vmul.f32 %v10624_v10, %v10624_v10  ;;  %v3263_v36 = vsel %vm204_vm1, %v3207_v51, 0.0 }
 0x36e   : > { %v3244_v52 = vadd.f32 %v3243_v41, %v3242_v35  ;;  %v3209_v35 = vmul.f32 %v10626_v11, %v10626_v11  ;;  %v3265_v8 = vsel %vm204_vm1, %v3208_v12, 0.0 }
 0x370   : > { %v3246_v19 = vadd.f32 %v3245_v9, %v3244_v52  ;;  %v3210_v52 = vmul.f32 %v10628_v26, %v10628_v26  ;;  %v3267_v24 = vsel %vm204_vm1, %v3209_v35, 0.0 }
 0x372   : > { %v3248_v16 = vadd.f32 %v3247_v4, %v3246_v19  ;;  %v3211_v19 = vmul.f32 %v10630_v20, %v10630_v20  ;;  %v3269_v61 = vsel %vm204_vm1, %v3210_v52, 0.0 }
 0x374   : > { %v3250_v17 = vadd.f32 %v3249_v30, %v3248_v16  ;;  %v3212_v16 = vmul.f32 %v10632_v3, %v10632_v3  ;;  %v3271_v28 = vsel %vm204_vm1, %v3211_v19, 0.0 }
 0x376   : > { %v3252_v62 = vadd.f32 %v3251_v54, %v3250_v17  ;;  %v3213_v17 = vmul.f32 %v10634_v45, %v10634_v45 }
 0x378   : > { %v3254_v27 = vadd.f32 %v3253_v58, %v3252_v62  ;;  %v3273_v62 = vsel %vm204_vm1, %v3212_v16, 0.0  ;;  %v3275_v58 = vsel %vm204_vm1, %v3213_v17, 0.0 }
 0x37a   : > { %v3256_v34 = vadd.f32 %v3255_v59, %v3254_v27 }
 0x37c   : > { %v3258_v56 = vadd.f32 %v3257_v55, %v3256_v34 }
 0x37e   : > { %v3260_v6 = vadd.f32 %v3259_v57, %v3258_v56 }
 0x380   : > { %v3262_v21 = vadd.f32 %v3261_v13, %v3260_v6 }
 0x382   : > { %v3264_v41 = vadd.f32 %v3263_v36, %v3262_v21 }
 0x384   : > { %v3266_v9 = vadd.f32 %v3265_v8, %v3264_v41 }
 0x386   : > { %v3268_v4 = vadd.f32 %v3267_v24, %v3266_v9 }
 0x388   : > { %v3270_v30 = vadd.f32 %v3269_v61, %v3268_v4 }
 0x38a   : > { %v3272_v54 = vadd.f32 %v3271_v28, %v3270_v30 }
 0x38c   : > { %v3274_v31 = vadd.f32 %v3273_v62, %v3272_v54 }
 0x38e   : > { %v3276_v27 = vadd.f32 %v3275_v58, %v3274_v31 }
 0x390   : > { %v3277_v44 = vrot.slane %v3276_v27, 4 }
 0x392   : > { %v3278_v59 = vadd.f32 %v3277_v44, %v3276_v27 }
 0x394   : > { %v3279_v34 = vrot.slane %v3278_v59, 2 }
 0x396   : > { %v3280_v38 = vadd.f32 %v3279_v34, %v3278_v59 }
 0x398   : > { %v3281_v55 = vrot.slane %v3280_v38, 1 }
 0x39a   : > { %v3282_v56 = vadd.f32 %v3281_v55, %v3280_v38 }
 0x39c   : > { %v3283_v51 = vmul.f32 0.00390625, %v3282_v56 }
 0x39e   : > { %v3284_v57 = vadd.f32 1e-05, %v3283_v51 }
 0x3a0   : > { %9245 = vrsqrt.f32 %v3284_v57 }
 0x3aa   : > { %v9246_v6 = vpop.eup %9245 }
 0x3ab   : > { %v3316_v12 = vmul.f32 %v9246_v6, %v10632_v3  ;;  %v3286_v13 = vmul.f32 %v9246_v6, %v10542_v50  ;;  %v3287_v21 = vmul.f32 %v9246_v6, %v10545_v5  ;;  %v3288_v35 = vmul.f32 %v9246_v6, %v10548_v18 }
 0x3ac   : > { %v3289_v36 = vmul.f32 %v9246_v6, %v10551_v32  ;;  %v3290_v41 = vmul.f32 %v9246_v6, %v10559_v40  ;;  %v3291_v52 = vmul.f32 %v9246_v6, %v10562_v15  ;;  %v3292_v8 = vmul.f32 %v9246_v6, %v10565_v60 }
 0x3ad   : > { %v3348_v9 = vmax.f32 %v3316_v12, 0.0  ;;  %v10741_v19 = vmul.f32 %v9246_v6, %v10568_v25  ;;  %v10744_v3 = vmul.f32 %v9246_v6, %v10573_v33  ;;  %v10747_v50 = vmul.f32 %v9246_v6, %v10576_v49 }
 0x3ae   : > { %v10750_v5 = vmul.f32 %v9246_v6, %v10579_v1  ;;  %v10753_v18 = vmul.f32 %v9246_v6, %v10582_v48  ;;  %v10756_v32 = vmul.f32 %v9246_v6, %v10585_v39  ;;  %v10759_v40 = vmul.f32 %v9246_v6, %v10588_v37 }
 0x3af   : > { %3380 = vst.msk [vmem:[#allocation2 + $0x181] sm:$0xff] %vm204_vm1, %v3348_v9  ;;  %v10764_v15 = vmul.f32 %v9246_v6, %v10591_v43  ;;  %v10767_v60 = vmul.f32 %v9246_v6, %v10594_v47  ;;  %v10770_v25 = vmul.f32 %v9246_v6, %v10597_v46  ;;  %v10773_v33 = vmul.f32 %v9246_v6, %v10600_v0 }
 0x3b0   : > { %3401 = vst.msk [vmem:[#allocation2 + $0x17f] sm:$0x2] %vm242_vm2, %v3348_v9  ;;  %v10776_v49 = vmul.f32 %v9246_v6, %v10603_v63  ;;  %v10779_v1 = vmul.f32 %v9246_v6, %v10606_v23  ;;  %v10782_v48 = vmul.f32 %v9246_v6, %v10609_v22  ;;  %v10785_v39 = vmul.f32 %v9246_v6, %v10612_v7 }
 0x3b1   : > { %v10788_v37 = vmul.f32 %v9246_v6, %v10615_v53  ;;  %v10791_v43 = vmul.f32 %v9246_v6, %v10618_v2  ;;  %v10794_v47 = vmul.f32 %v9246_v6, %v10620_v29  ;;  %v10797_v46 = vmul.f32 %v9246_v6, %v10622_v14 }
 0x3b2   : > { %v10800_v0 = vmul.f32 %v9246_v6, %v10624_v10  ;;  %v10803_v63 = vmul.f32 %v9246_v6, %v10626_v11  ;;  %v10806_v23 = vmul.f32 %v9246_v6, %v10628_v26  ;;  %v10809_v22 = vmul.f32 %v9246_v6, %v10630_v20 }
 0x3b3   : > { %v10812_v7 = vmul.f32 %v9246_v6, %v10634_v45  ;;  %v3318_v53 = vmax.f32 %v3286_v13, 0.0  ;;  %v3319_v2 = vmax.f32 %v3287_v21, 0.0  ;;  %v3320_v29 = vmax.f32 %v3288_v35, 0.0 }
 0x3b4   : > { %v3321_v14 = vmax.f32 %v3289_v36, 0.0  ;;  %v3322_v24 = vmax.f32 %v3290_v41, 0.0  ;;  %v3323_v4 = vmax.f32 %v3291_v52, 0.0  ;;  %v3324_v10 = vmax.f32 %v3292_v8, 0.0 }
 0x3b5   : > { %v3325_v16 = vmax.f32 %v10741_v19, 0.0  ;;  %v3326_v11 = vmax.f32 %v10744_v3, 0.0  ;;  %v3327_v26 = vmax.f32 %v10747_v50, 0.0  ;;  %v3328_v61 = vmax.f32 %v10750_v5, 0.0  ;;  %3350 = vst.msk [vmem:[#allocation2 + $0x19] sm:$0xff] %vm204_vm1, %v3318_v53  ;;  %3351 = vst.msk [vmem:[#allocation2 + $0x21] sm:$0xff] %vm204_vm1, %v3319_v2 }
 0x3b6   : > { %3352 = vst.msk [vmem:[#allocation2 + $0x31] sm:$0xff] %vm204_vm1, %v3320_v29  ;;  %3382 = vst.msk [vmem:[#allocation2 + $0x1] sm:$0xff] %vm204_vm1, %v3320_v29  ;;  %v3329_v20 = vmax.f32 %v10753_v18, 0.0  ;;  %v3330_v45 = vmax.f32 %v10756_v32, 0.0  ;;  %v3331_v30 = vmax.f32 %v10759_v40, 0.0  ;;  %v3332_v17 = vmax.f32 %v10764_v15, 0.0 }
 0x3b7   : > { %3386 = vst.msk [vmem:[#allocation2 + $0x17] sm:$0x2] %vm242_vm2, %v3318_v53  ;;  %3387 = vst.msk [vmem:[#allocation2 + $0x2f] sm:$0x2] %vm242_vm2, %v3320_v29  ;;  %v3333_v28 = vmax.f32 %v10767_v60, 0.0  ;;  %v3334_v54 = vmax.f32 %v10770_v25, 0.0 }
 0x3b8   : > { %3402 = vst.msk [vmem:[#allocation2 + $0x23] sm:$0x40] %vm259_vm3, %v3319_v2  ;;  %3403 = vst.msk [vmem:[#allocation2 + $0x3b] sm:$0x40] %vm259_vm3, %v3321_v14  ;;  %v3335_v62 = vmax.f32 %v10773_v33, 0.0  ;;  %v3336_v31 = vmax.f32 %v10776_v49, 0.0 }
 0x3b9   : > { %3418 = vst.msk [vmem:[#allocation2 - $0x1] sm:$0x2] %vm242_vm2, %v3320_v29  ;;  %3388 = vst.msk [vmem:[#allocation2 + $0x47] sm:$0x2] %vm242_vm2, %v3322_v24  ;;  %v3337_v58 = vmax.f32 %v10779_v1, 0.0  ;;  %v3338_v27 = vmax.f32 %v10782_v48, 0.0 }
 0x3ba   : > { %3353 = vst.msk [vmem:[#allocation2 + $0x39] sm:$0xff] %vm204_vm1, %v3321_v14  ;;  %3354 = vst.msk [vmem:[#allocation2 + $0x49] sm:$0xff] %vm204_vm1, %v3322_v24  ;;  %v3339_v44 = vmax.f32 %v10785_v39, 0.0  ;;  %v3340_v59 = vmax.f32 %v10788_v37, 0.0  ;;  %v3341_v34 = vmax.f32 %v10791_v43, 0.0  ;;  %v3342_v38 = vmax.f32 %v10794_v47, 0.0 }
 0x3bb   : > { %3355 = vst.msk [vmem:[#allocation2 + $0x51] sm:$0xff] %vm204_vm1, %v3323_v4  ;;  %3356 = vst.msk [vmem:[#allocation2 + $0x61] sm:$0xff] %vm204_vm1, %v3324_v10  ;;  %v3343_v55 = vmax.f32 %v10797_v46, 0.0  ;;  %v3344_v56 = vmax.f32 %v10800_v0, 0.0  ;;  %v3345_v51 = vmax.f32 %v10803_v63, 0.0  ;;  %v3346_v57 = vmax.f32 %v10806_v23, 0.0 }
 0x3bc   : > { %3383 = vst.msk [vmem:[#allocation2 + $0x9] sm:$0xff] %vm204_vm1, %v3321_v14  ;;  %3357 = vst.msk [vmem:[#allocation2 + $0x69] sm:$0xff] %vm204_vm1, %v3325_v16  ;;  %v3347_v6 = vmax.f32 %v10809_v22, 0.0  ;;  %v3349_v12 = vmax.f32 %v10812_v7, 0.0  ;;  %v10912_v35 = vld [vmem:[#allocation2 + $0x20] sm:$0xff] }
 0x3bd   : > { %3389 = vst.msk [vmem:[#allocation2 + $0x5f] sm:$0x2] %vm242_vm2, %v3324_v10  ;;  %3390 = vst.msk [vmem:[#allocation2 + $0x77] sm:$0x2] %vm242_vm2, %v3326_v11  ;;  %v3531_v3 = vrot.slane %v10912_v35, 1 }
 0x3be   : > { %3404 = vst.msk [vmem:[#allocation2 + $0x53] sm:$0x40] %vm259_vm3, %v3323_v4  ;;  %3419 = vst.msk [vmem:[#allocation2 + $0xb] sm:$0x40] %vm259_vm3, %v3321_v14  ;;  %v10910_v21 = vld [vmem:[#allocation2 + $0x18] sm:$0xff]  ;;  %v10925_v5 = vld [vmem:[#allocation2 + $0x30] sm:$0xff] }
 0x3bf   : > { %3358 = vst.msk [vmem:[#allocation2 + $0x79] sm:$0xff] %vm204_vm1, %v3326_v11  ;;  %3359 = vst.msk [vmem:[#allocation2 + $0x81] sm:$0xff] %vm204_vm1, %v3327_v26  ;;  %v3530_v19 = vrot.slane %v10910_v21, 1  ;;  %v10923_v50 = vld [vmem:[#allocation2 + $0x28] sm:$0x3]  ;;  %v3535_v33 = vrot.slane %v10925_v5, 1 }
 0x3c0   : > { %3360 = vst.msk [vmem:[#allocation2 + $0x91] sm:$0xff] %vm204_vm1, %v3328_v61  ;;  %3361 = vst.msk [vmem:[#allocation2 + $0x99] sm:$0xff] %vm204_vm1, %v3329_v20  ;;  %v10908_v13 = vld [vmem:[#allocation2] sm:$0xff]  ;;  %v3533_v15 = vrot.slane %v10923_v50, 1  ;;  %v10936_v60 = vld [vmem:[%s12409_s2 + $0x8] sm:$0xf] }
 0x3c1   : > { %3391 = vst.msk [vmem:[#allocation2 + $0x8f] sm:$0x2] %vm242_vm2, %v3328_v61  ;;  %3392 = vst.msk [vmem:[#allocation2 + $0xa7] sm:$0x2] %vm242_vm2, %v3330_v45  ;;  %v3525_v41 = vrot.slane %v10908_v13, 1  ;;  %v10927_v18 = vld [vmem:[#allocation2 + $0x38] sm:$0xff]  ;;  %v10940_v25 = vsel %vm383_vm4, %v3530_v19, %v3531_v3 }
 0x3c2   : > { %3405 = vst.msk [vmem:[#allocation2 + $0x6b] sm:$0x40] %vm259_vm3, %v3325_v16  ;;  %3406 = vst.msk [vmem:[#allocation2 + $0x83] sm:$0x40] %vm259_vm3, %v3327_v26  ;;  %v3536_v49 = vrot.slane %v10927_v18, 1  ;;  %v10950_v48 = vld [vmem:[#allocation2 + $0x48] sm:$0xff]  ;;  %v10957_v37 = vsel %vm383_vm4, %v3531_v3, %v3533_v15 }
 0x3c3   : > { %3362 = vst.msk [vmem:[#allocation2 + $0xa9] sm:$0xff] %vm204_vm1, %v3330_v45  ;;  %3363 = vst.msk [vmem:[#allocation2 + $0xb1] sm:$0xff] %vm204_vm1, %v3331_v30  ;;  %v10914_v36 = vld [vmem:[#allocation2 + $0x8] sm:$0xff]  ;;  %v10944_v1 = vld [vmem:[#allocation2 + $0x40] sm:$0x3]  ;;  %v3540_v47 = vrot.slane %v10950_v48, 1 }
 0x3c4   : > { %3364 = vst.msk [vmem:[#allocation2 + $0xc1] sm:$0xff] %vm204_vm1, %v3332_v17  ;;  %3365 = vst.msk [vmem:[#allocation2 + $0xc9] sm:$0xff] %vm204_vm1, %v3333_v28  ;;  %v3526_v8 = vrot.slane %v10914_v36, 1  ;;  %v10952_v39 = vld [vmem:[#allocation2 + $0x50] sm:$0xff]  ;;  %v3538_v43 = vrot.slane %v10944_v1, 1  ;;  %v10971_v63 = vld [vmem:[#allocation2 + $0x60] sm:$0xff] }
 0x3c5   : > { %3393 = vst.msk [vmem:[#allocation2 + $0xbf] sm:$0x2] %vm242_vm2, %v3332_v17  ;;  %3394 = vst.msk [vmem:[#allocation2 + $0xd7] sm:$0x2] %vm242_vm2, %v3334_v54  ;;  %v10917_v52 = vld [vmem:[#allocation2 + $0x10] sm:$0x3] }
 0x3c6   : > { %3407 = vst.msk [vmem:[#allocation2 + $0x9b] sm:$0x40] %vm259_vm3, %v3329_v20  ;;  %3408 = vst.msk [vmem:[#allocation2 + $0xb3] sm:$0x40] %vm259_vm3, %v3331_v30  ;;  %v3528_v9 = vrot.slane %v10917_v52, 1  ;;  %v3527_v32 = vsel %vm383_vm4, %v3525_v41, %v3526_v8  ;;  %v3541_v46 = vrot.slane %v10952_v39, 1  ;;  %v10976_v22 = vsel %vm383_vm4, %v3536_v49, %v3538_v43 }
 0x3c7   : > { %3366 = vst.msk [vmem:[#allocation2 + $0xd9] sm:$0xff] %vm204_vm1, %v3334_v54  ;;  %3367 = vst.msk [vmem:[#allocation2 + $0xe1] sm:$0xff] %vm204_vm1, %v3335_v62  ;;  %8277 = vmatprep.mubr.msk.f32.mxu1 %vm204_vm1, %v3527_v32  ;;  %v10967_v0 = vld [vmem:[#allocation2 + $0x58] sm:$0x3]  ;;  %v10973_v23 = vld [vmem:[#allocation2 + $0x68] sm:$0xff]  ;;  %v3545_v2 = vrot.slane %v10971_v63, 1 }
 0x3c8   : > { %3368 = vst.msk [vmem:[#allocation2 + $0xf1] sm:$0xff] %vm204_vm1, %v3336_v31  ;;  %3369 = vst.msk [vmem:[#allocation2 + $0xf9] sm:$0xff] %vm204_vm1, %v3337_v58  ;;  %v3529_v40 = vsel %vm383_vm4, %v3526_v8, %v3528_v9  ;;  %v3543_v7 = vrot.slane %v10967_v0, 1  ;;  %v10982_v53 = vsel %vm383_vm4, %v3540_v47, %v3541_v46  ;;  %v3546_v29 = vrot.slane %v10973_v23, 1  ;;  %v10990_v24 = vld [vmem:[#allocation2 + $0x78] sm:$0xff]  ;;  %v10992_v4 = vld [vmem:[#allocation2 + $0x80] sm:$0xff] }
 0x3c9   : > { %3395 = vst.msk [vmem:[#allocation2 + $0xef] sm:$0x2] %vm242_vm2, %v3336_v31  ;;  %3396 = vst.msk [vmem:[#allocation2 + $0x107] sm:$0x2] %vm242_vm2, %v3338_v27  ;;  %8278 = vmatmul.mubr.msk.f32.vlgmr.msra.gmra.mrb[0].mxu1 %vm204_vm1, %v3529_v40  ;;  %v10986_v14 = vld [vmem:[#allocation2 + $0x70] sm:$0x3] }
 0x3ca   : > { %3409 = vst.msk [vmem:[#allocation2 + $0xcb] sm:$0x40] %vm259_vm3, %v3333_v28  ;;  %3410 = vst.msk [vmem:[#allocation2 + $0xe3] sm:$0x40] %vm259_vm3, %v3335_v62  ;;  %8326 = vmatpush3.msk.msra.mxu1 %vm530_vm0, %v10556_v42  ;;  %8280 = vmatprep.mubr.msk.f32.mxu1 %vm204_vm1, %v10940_v25  ;;  %v10963_v42 = vsel %vm383_vm4, %v3535_v33, %v3536_v49  ;;  %v10995_v10 = vsel %vm383_vm4, %v3541_v46, %v3543_v7  ;;  %v3548_v16 = vrot.slane %v10986_v14, 1  ;;  %v11009_v45 = vld [vmem:[#allocation2 + $0x90] sm:$0xff] }
 0x3cb   : > { %3370 = vst.msk [vmem:[#allocation2 + $0x109] sm:$0xff] %vm204_vm1, %v3338_v27  ;;  %3371 = vst.msk [vmem:[#allocation2 + $0x111] sm:$0xff] %vm204_vm1, %v3339_v44  ;;  %8375 = vmatprep.subr.msk.mxu1 %vm530_vm0, %v10936_v60  ;;  %v11001_v11 = vsel %vm383_vm4, %v3545_v2, %v3546_v29  ;;  %v3550_v26 = vrot.slane %v10990_v24, 1  ;;  %v3551_v61 = vrot.slane %v10992_v4, 1  ;;  %v11005_v20 = vld [vmem:[#allocation2 + $0x88] sm:$0x3] }
 0x3cc   : > { %3372 = vst.msk [vmem:[#allocation2 + $0x121] sm:$0xff] %vm204_vm1, %v3340_v59  ;;  %3373 = vst.msk [vmem:[#allocation2 + $0x129] sm:$0xff] %vm204_vm1, %v3341_v34  ;;  %v11011_v30 = vld [vmem:[#allocation2 + $0x98] sm:$0xff]  ;;  %v11014_v17 = vsel %vm383_vm4, %v3546_v29, %v3548_v16  ;;  %v3553_v28 = vrot.slane %v11005_v20, 1  ;;  %v3555_v62 = vrot.slane %v11009_v45, 1  ;;  %v11028_v27 = vld [vmem:[#allocation2 + $0xa8] sm:$0xff] }
 0x3cd   : > { %3397 = vst.msk [vmem:[#allocation2 + $0x11f] sm:$0x2] %vm242_vm2, %v3340_v59  ;;  %3398 = vst.msk [vmem:[#allocation2 + $0x137] sm:$0x2] %vm242_vm2, %v3342_v38  ;;  %8281 = vmatmul.mubr.msk.f32.gmra.mrb[2].mxu1 %vm204_vm1, %v10957_v37  ;;  %v11020_v54 = vsel %vm383_vm4, %v3550_v26, %v3551_v61  ;;  %v3556_v31 = vrot.slane %v11011_v30, 1 }
 0x3ce   : > { %3411 = vst.msk [vmem:[#allocation2 + $0xfb] sm:$0x40] %vm259_vm3, %v3337_v58  ;;  %3412 = vst.msk [vmem:[#allocation2 + $0x113] sm:$0x40] %vm259_vm3, %v3339_v44  ;;  %8283 = vmatprep.mubr.msk.f32.mxu1 %vm204_vm1, %v10963_v42  ;;  %v11024_v58 = vld [vmem:[#allocation2 + $0xa0] sm:$0x3]  ;;  %v11033_v59 = vsel %vm383_vm4, %v3551_v61, %v3553_v28 }
 0x3cf   : > { %3374 = vst.msk [vmem:[#allocation2 + $0x139] sm:$0xff] %vm204_vm1, %v3342_v38  ;;  %3375 = vst.msk [vmem:[#allocation2 + $0x141] sm:$0xff] %vm204_vm1, %v3343_v55  ;;  %v11030_v44 = vld [vmem:[#allocation2 + $0xb0] sm:$0xff]  ;;  %v11039_v38 = vsel %vm383_vm4, %v3555_v62, %v3556_v31  ;;  %v11066_v32 = vld [vmem:[#allocation2 + $0xd8] sm:$0xff] }
 0x3d0   : > { %3376 = vst.msk [vmem:[#allocation2 + $0x151] sm:$0xff] %vm204_vm1, %v3344_v56  ;;  %3377 = vst.msk [vmem:[#allocation2 + $0x159] sm:$0xff] %vm204_vm1, %v3345_v51  ;;  %v11068_v40 = vld [vmem:[#allocation2 + $0xe0] sm:$0xff]  ;;  %v3570_v43 = vrot.slane %v11066_v32, 1  ;;  %v11085_v7 = vld [vmem:[#allocation2 + $0xf0] sm:$0xff] }
 0x3d1   : > { %3399 = vst.msk [vmem:[#allocation2 + $0x14f] sm:$0x2] %vm242_vm2, %v3344_v56  ;;  %3400 = vst.msk [vmem:[#allocation2 + $0x167] sm:$0x2] %vm242_vm2, %v3346_v57  ;;  %8284 = vmatmul.mubr.msk.f32.gmra.mrb[4].mxu1 %vm204_vm1, %v10976_v22  ;;  %v3561_v56 = vrot.slane %v11030_v44, 1  ;;  %v3571_v47 = vrot.slane %v11068_v40, 1 }
 0x3d2   : > { %3413 = vst.msk [vmem:[#allocation2 + $0x12b] sm:$0x40] %vm259_vm3, %v3341_v34  ;;  %3414 = vst.msk [vmem:[#allocation2 + $0x143] sm:$0x40] %vm259_vm3, %v3343_v55  ;;  %8286 = vmatprep.mubr.msk.f32.mxu1 %vm204_vm1, %v10982_v53  ;;  %v3558_v34 = vrot.slane %v11024_v58, 1  ;;  %v3560_v55 = vrot.slane %v11028_v27, 1 }
 0x3d3   : > { %3378 = vst.msk [vmem:[#allocation2 + $0x169] sm:$0xff] %vm204_vm1, %v3346_v57  ;;  %3379 = vst.msk [vmem:[#allocation2 + $0x171] sm:$0xff] %vm204_vm1, %v3347_v6  ;;  %v11062_v3 = vld [vmem:[#allocation2 + $0xd0] sm:$0x3]  ;;  %v11081_v46 = vld [vmem:[#allocation2 + $0xe8] sm:$0x3]  ;;  %v11096_v26 = vsel %vm383_vm4, %v3570_v43, %v3571_v47 }
 0x3d4   : > { %3381 = vst.msk [vmem:[#allocation2 + $0x189] sm:$0xff] %vm204_vm1, %v3349_v12  ;;  %3384 = vst.msk [vmem:[#allocation2 + $0x199] sm:$0xff] %vm204_vm1, %v3346_v57  ;;  %v11058_v8 = vsel %vm383_vm4, %v3560_v55, %v3561_v56  ;;  %v3568_v33 = vrot.slane %v11062_v3, 1  ;;  %v11087_v2 = vld [vmem:[#allocation2 + $0xf8] sm:$0xff]  ;;  %v3573_v16 = vrot.slane %v11081_v46, 1  ;;  %v3575_v61 = vrot.slane %v11085_v7, 1 }
 0x3d5   : > { %3385 = vst.msk [vmem:[#allocation2 + $0x1a1] sm:$0xff] %vm204_vm1, %v3347_v6  ;;  %8287 = vmatmul.mubr.msk.f32.gmra.mrb[6].mxu1 %vm204_vm1, %v10995_v10  ;;  %12660 = vst [vmem:[#allocation3_spill] sm:$0xff] %v11001_v11  ;;  %v3576_v28 = vrot.slane %v11087_v2, 1  ;;  %v11100_v62 = vld [vmem:[#allocation2 + $0x100] sm:$0x3] }
 0x3d6   : > { %3415 = vst.msk [vmem:[#allocation2 + $0x15b] sm:$0x40] %vm259_vm3, %v3345_v51  ;;  %3416 = vst.msk [vmem:[#allocation2 + $0x173] sm:$0x40] %vm259_vm3, %v3347_v6  ;;  %8289 = vmatprep.mubr.msk.f32.mxu1 %vm204_vm1, %v11001_v11  ;;  %v11043_v51 = vld [vmem:[#allocation2 + $0xb8] sm:$0x3]  ;;  %v11109_v55 = vsel %vm383_vm4, %v3571_v47, %v3573_v16 }
 0x3d7   : > { %3417 = vst.msk [vmem:[#allocation2 + $0x18b] sm:$0x40] %vm259_vm3, %v3349_v12  ;;  %3421 = vst.msk [vmem:[#allocation2 + $0x1a3] sm:$0x40] %vm259_vm3, %v3347_v6  ;;  %v11049_v6 = vld [vmem:[#allocation2 + $0xc8] sm:$0xff]  ;;  %v11052_v12 = vsel %vm383_vm4, %v3556_v31, %v3558_v34  ;;  %v3563_v41 = vrot.slane %v11043_v51, 1 }
 0x3d8   : > { %3420 = vst.msk [vmem:[#allocation2 + $0x197] sm:$0x2] %vm242_vm2, %v3346_v57  ;;  %12661 = vst [vmem:[#allocation14_spill] sm:$0xff] %v11014_v17  ;;  %v11047_v57 = vld [vmem:[#allocation2 + $0xc0] sm:$0xff]  ;;  %v3566_v19 = vrot.slane %v11049_v6, 1  ;;  %v11104_v31 = vld [vmem:[#allocation2 + $0x108] sm:$0xff] }
 0x3d9   : > { %8290 = vmatmul.mubr.msk.f32.gmra.mrb[8].mxu1 %vm204_vm1, %v11014_v17  ;;  %12662 = vst [vmem:[#allocation25_spill] sm:$0xff] %v11020_v54  ;;  %12663 = vst [vmem:[#allocation26_spill] sm:$0xff] %v11033_v59  ;;  %v3565_v9 = vrot.slane %v11047_v57, 1  ;;  %v11071_v15 = vsel %vm383_vm4, %v3561_v56, %v3563_v41  ;;  %v11106_v34 = vld [vmem:[#allocation2 + $0x110] sm:$0xff]  ;;  %v3578_v56 = vrot.slane %v11100_v62, 1  ;;  %v11115_v41 = vsel %vm383_vm4, %v3575_v61, %v3576_v28  ;;  %v11123_v43 = vld [vmem:[#allocation2 + $0x120] sm:$0xff] }
 0x3da   : > { %8292 = vmatprep.mubr.msk.f32.mxu1 %vm204_vm1, %v11020_v54  ;;  %12664 = vst [vmem:[#allocation27_spill] sm:$0xff] %v11039_v38  ;;  %12665 = vst [vmem:[#allocation28_spill] sm:$0xff] %v11052_v12  ;;  %v11090_v29 = vsel %vm383_vm4, %v3566_v19, %v3568_v33  ;;  %v11119_v33 = vld [vmem:[#allocation2 + $0x118] sm:$0x3]  ;;  %v11125_v47 = vld [vmem:[#allocation2 + $0x128] sm:$0xff] }
 0x3db   : > { %12666 = vst [vmem:[#allocation35_spill] sm:$0xff] %v11058_v8  ;;  %12667 = vst [vmem:[#allocation40_spill] sm:$0xff] %v11071_v15  ;;  %v11077_v49 = vsel %vm383_vm4, %v3565_v9, %v3566_v19  ;;  %v3580_v9 = vrot.slane %v11104_v31, 1  ;;  %v3581_v19 = vrot.slane %v11106_v34, 1  ;;  %v11128_v16 = vsel %vm383_vm4, %v3576_v28, %v3578_v56  ;;  %v11144_v28 = vld [vmem:[#allocation2 + $0x140] sm:$0xff]  ;;  %v11180_v54 = vld [vmem:[#allocation2 + $0x168] sm:$0xff] }
 0x3dc   : > { %12668 = vst [vmem:[#allocation4_spill] sm:$0xff] %v11077_v49  ;;  %12669 = vst [vmem:[#allocation5_spill] sm:$0xff] %v11090_v29  ;;  %v3600_v17 = vrot.slane %v11180_v54, 1 }
 0x3dd   : > { %8293 = vmatmul.mubr.msk.f32.gmra.mrb[10].mxu1 %vm204_vm1, %v11033_v59  ;;  %12670 = vst [vmem:[#allocation6_spill] sm:$0xff] %v11096_v26  ;;  %12671 = vst [vmem:[#allocation7_spill] sm:$0xff] %v11109_v55  ;;  %v11134_v61 = vsel %vm383_vm4, %v3580_v9, %v3581_v19 }
 0x3de   : > { %8295 = vmatprep.mubr.msk.f32.mxu1 %vm204_vm1, %v11039_v38  ;;  %12672 = vst [vmem:[#allocation8_spill] sm:$0xff] %v11115_v41  ;;  %12673 = vst [vmem:[#allocation9_spill] sm:$0xff] %v11128_v16 }
 0x3df   : > { %12674 = vst [vmem:[#allocation10_spill] sm:$0xff] %v11134_v61 }
 0x3e1   : > { %8296 = vmatmul.mubr.msk.f32.gmra.mrb[12].mxu1 %vm204_vm1, %v11052_v12  ;;  %v11161_v12 = vld [vmem:[#allocation2 + $0x150] sm:$0xff] }
 0x3e2   : > { %8298 = vmatprep.mubr.msk.f32.mxu1 %vm204_vm1, %v11058_v8  ;;  %v3591_v8 = vrot.slane %v11144_v28, 1  ;;  %v3595_v38 = vrot.slane %v11161_v12, 1 }
 0x3e5   : > { %8299 = vmatmul.mubr.msk.f32.gmra.mrb[14].mxu1 %vm204_vm1, %v11071_v15 }
 0x3e6   : > { %8301 = vmatprep.mubr.msk.f32.mxu1 %vm204_vm1, %v11077_v49  ;;  %v11142_v49 = vld [vmem:[#allocation2 + $0x138] sm:$0xff] }
 0x3e7   : > { %v3590_v15 = vrot.slane %v11142_v49, 1 }
 0x3e9   : > { %8302 = vmatmul.mubr.msk.f32.gmra.mrb[16].mxu1 %vm204_vm1, %v11090_v29  ;;  %v3586_v29 = vrot.slane %v11125_v47, 1 }
 0x3ea   : > { %8304 = vmatprep.mubr.msk.f32.mxu1 %vm204_vm1, %v11096_v26  ;;  %v3585_v26 = vrot.slane %v11123_v43, 1 }
 0x3ec   : > { %v11153_v9 = vsel %vm383_vm4, %v3585_v26, %v3586_v29  ;;  %v11172_v26 = vsel %vm383_vm4, %v3590_v15, %v3591_v8 }
 0x3ed   : > { %8305 = vmatmul.mubr.msk.f32.gmra.mrb[18].mxu1 %vm204_vm1, %v11109_v55  ;;  %v3583_v55 = vrot.slane %v11119_v33, 1  ;;  %12676 = vst [vmem:[#allocation12_spill] sm:$0xff] %v11153_v9  ;;  %12678 = vst [vmem:[#allocation15_spill] sm:$0xff] %v11172_v26 }
 0x3ee   : > { %8307 = vmatprep.mubr.msk.f32.mxu1 %vm204_vm1, %v11115_v41  ;;  %v11138_v41 = vld [vmem:[#allocation2 + $0x130] sm:$0x3] }
 0x3ef   : > { %v11147_v56 = vsel %vm383_vm4, %v3581_v19, %v3583_v55  ;;  %v11163_v55 = vld [vmem:[#allocation2 + $0x158] sm:$0xff] }
 0x3f0   : > { %12675 = vst [vmem:[#allocation11_spill] sm:$0xff] %v11147_v56  ;;  %v3596_v59 = vrot.slane %v11163_v55, 1 }
 0x3f1   : > { %8308 = vmatmul.mubr.msk.f32.gmra.mrb[20].mxu1 %vm204_vm1, %v11128_v16  ;;  %v3588_v16 = vrot.slane %v11138_v41, 1 }
 0x3f2   : > { %8310 = vmatprep.mubr.msk.f32.mxu1 %vm204_vm1, %v11134_v61  ;;  %v11157_v61 = vld [vmem:[#allocation2 + $0x148] sm:$0x3]  ;;  %v11191_v15 = vsel %vm383_vm4, %v3595_v38, %v3596_v59 }
 0x3f3   : > { %v11166_v19 = vsel %vm383_vm4, %v3586_v29, %v3588_v16  ;;  %v11182_v29 = vld [vmem:[#allocation2 + $0x170] sm:$0xff]  ;;  %12680 = vst [vmem:[#allocation17_spill] sm:$0xff] %v11191_v15 }
 0x3f4   : > { %12677 = vst [vmem:[#allocation13_spill] sm:$0xff] %v11166_v19  ;;  %v3601_v11 = vrot.slane %v11182_v29, 1 }
 0x3f5   : > { %8311 = vmatmul.mubr.msk.f32.gmra.mrb[22].mxu1 %vm204_vm1, %v11147_v56  ;;  %v3593_v56 = vrot.slane %v11157_v61, 1 }
 0x3f6   : > { %8313 = vmatprep.mubr.msk.f32.mxu1 %vm204_vm1, %v11153_v9  ;;  %v11176_v9 = vld [vmem:[#allocation2 + $0x160] sm:$0x3]  ;;  %v11206_v38 = vsel %vm383_vm4, %v3600_v17, %v3601_v11  ;;  %v4194_v17 = vrot.slane %v10917_v52, 2 }
 0x3f7   : > { %v11185_v16 = vsel %vm383_vm4, %v3591_v8, %v3593_v56  ;;  %12682 = vst [vmem:[#allocation19_spill] sm:$0xff] %v11206_v38 }
 0x3f8   : > { %12679 = vst [vmem:[#allocation16_spill] sm:$0xff] %v11185_v16 }
 0x3f9   : > { %8314 = vmatmul.mubr.msk.f32.gmra.mrb[24].mxu1 %vm204_vm1, %v11166_v19  ;;  %v3598_v19 = vrot.slane %v11176_v9, 1 }
 0x3fa   : > { %8316 = vmatprep.mubr.msk.f32.mxu1 %vm204_vm1, %v11172_v26  ;;  %v11195_v26 = vld [vmem:[#allocation2 + $0x178] sm:$0x3] }
 0x3fb   : > { %v11200_v8 = vsel %vm383_vm4, %v3596_v59, %v3598_v19  ;;  %v3603_v56 = vrot.slane %v11195_v26, 1  ;;  %v7023_v59 = vld [vmem:[%s12409_s2 + $0xc] sm:$0xf] }
 0x3fc   : > { %12681 = vst [vmem:[#allocation18_spill] sm:$0xff] %v11200_v8 }
 0x3fd   : > { %8317 = vmatmul.mubr.msk.f32.gmra.mrb[26].mxu1 %vm204_vm1, %v11185_v16  ;;  %v11211_v16 = vsel %vm383_vm4, %v3601_v11, %v3603_v56  ;;  %v4192_v11 = vrot.slane %v10914_v36, 2  ;;  %v4196_v56 = vrot.slane %v10910_v21, 2 }
 0x3fe   : > { %8319 = vmatprep.mubr.msk.f32.mxu1 %vm204_vm1, %v11191_v15  ;;  %12683 = vst [vmem:[#allocation20_spill] sm:$0xff] %v11211_v16 }
 0x401   : > { %8320 = vmatmul.mubr.msk.f32.gmra.mrb[28].mxu1 %vm204_vm1, %v11200_v8  ;;  %v4202_v8 = vrot.slane %v10927_v18, 2 }
 0x402   : > { %8322 = vmatprep.mubr.msk.f32.mxu1 %vm204_vm1, %v11206_v38  ;;  %v11297_v38 = vld [vmem:[%s12409_s2 + $0x10] sm:$0xf] }
 0x405   : > { %8323 = vmatmul.mubr.msk.f32.gmra.mrb[30].mxu1 %vm204_vm1, %v11211_v16  ;;  %v4197_v16 = vrot.slane %v10912_v35, 2 }
 0x406   : > { %8327 = vmatprep.mubr.msk.f32.mxu1 %vm204_vm1, %v10908_v13 }
 0x407   : > { %v11301_v52 = vsel %vm1051_vm5, %v4196_v56, %v4197_v16 }
 0x409   : > { %8328 = vmatmul.mubr.msk.f32.vlgmr.msra.gmra.mrb[0].mxu1 %vm204_vm1, %v10914_v36  ;;  %v4199_v36 = vrot.slane %v10923_v50, 2 }
 0x40a   : > { %8376 = vmatpush3.msk.msra.mxu1 %vm530_vm0, %v10936_v60  ;;  %8330 = vmatprep.mubr.msk.f32.mxu1 %vm204_vm1, %v10910_v21  ;;  %v4191_v60 = vrot.slane %v10908_v13, 2  ;;  %v4195_v13 = vsel %vm1051_vm5, %v4192_v11, %v4194_v17 }
 0x40b   : > { %8425 = vmatprep.subr.msk.mxu1 %vm530_vm0, %v7023_v59  ;;  %v11311_v50 = vsel %vm1051_vm5, %v4197_v16, %v4199_v36  ;;  %v4209_v16 = vrot.slane %v10967_v0, 2  ;;  %v4212_v36 = vrot.slane %v10973_v23, 2 }
 0x40c   : > { %v4193_v19 = vsel %vm1051_vm5, %v4191_v60, %v4192_v11  ;;  %v4201_v60 = vrot.slane %v10925_v5, 2  ;;  %v4204_v11 = vrot.slane %v10944_v1, 2 }
 0x40d   : > { %8331 = vmatmul.mubr.msk.f32.gmra.mrb[2].mxu1 %vm204_vm1, %v10912_v35 }
 0x40e   : > { %8333 = vmatprep.mubr.msk.f32.mxu1 %vm204_vm1, %v10925_v5  ;;  %v11317_v17 = vsel %vm1051_vm5, %v4201_v60, %v4202_v8  ;;  %v11324_v56 = vsel %vm1051_vm5, %v4202_v8, %v4204_v11  ;;  %v4214_v8 = vrot.slane %v10986_v14, 2  ;;  %v4216_v11 = vrot.slane %v10990_v24, 2 }
 0x411   : > { %8334 = vmatmul.mubr.msk.f32.gmra.mrb[4].mxu1 %vm204_vm1, %v10927_v18 }
 0x412   : > { %8336 = vmatprep.mubr.msk.f32.mxu1 %vm204_vm1, %v10950_v48 }
 0x415   : > { %8337 = vmatmul.mubr.msk.f32.gmra.mrb[6].mxu1 %vm204_vm1, %v10952_v39 }
 0x416   : > { %8339 = vmatprep.mubr.msk.f32.mxu1 %vm204_vm1, %v10971_v63 }
 0x419   : > { %8340 = vmatmul.mubr.msk.f32.gmra.mrb[8].mxu1 %vm204_vm1, %v10973_v23 }
 0x41a   : > { %8342 = vmatprep.mubr.msk.f32.mxu1 %vm204_vm1, %v10990_v24 }
 0x41d   : > { %8343 = vmatmul.mubr.msk.f32.gmra.mrb[10].mxu1 %vm204_vm1, %v10992_v4 }
 0x41e   : > { %8345 = vmatprep.mubr.msk.f32.mxu1 %vm204_vm1, %v11009_v45 }
 0x421   : > { %8346 = vmatmul.mubr.msk.f32.gmra.mrb[12].mxu1 %vm204_vm1, %v11011_v30 }
 0x422   : > { %8348 = vmatprep.mubr.msk.f32.mxu1 %vm204_vm1, %v11028_v27 }
 0x425   : > { %8349 = vmatmul.mubr.msk.f32.gmra.mrb[14].mxu1 %vm204_vm1, %v11030_v44 }
 0x426   : > { %8351 = vmatprep.mubr.msk.f32.mxu1 %vm204_vm1, %v11047_v57 }
 0x429   : > { %8352 = vmatmul.mubr.msk.f32.gmra.mrb[16].mxu1 %vm204_vm1, %v11049_v6 }
 0x42a   : > { %8354 = vmatprep.mubr.msk.f32.mxu1 %vm204_vm1, %v11066_v32 }
 0x42d   : > { %8355 = vmatmul.mubr.msk.f32.gmra.mrb[18].mxu1 %vm204_vm1, %v11068_v40 }
 0x42e   : > { %8357 = vmatprep.mubr.msk.f32.mxu1 %vm204_vm1, %v11085_v7 }
 0x431   : > { %8358 = vmatmul.mubr.msk.f32.gmra.mrb[20].mxu1 %vm204_vm1, %v11087_v2 }
 0x432   : > { %8360 = vmatprep.mubr.msk.f32.mxu1 %vm204_vm1, %v11104_v31 }
 0x435   : > { %8361 = vmatmul.mubr.msk.f32.gmra.mrb[22].mxu1 %vm204_vm1, %v11106_v34 }
 0x436   : > { %8363 = vmatprep.mubr.msk.f32.mxu1 %vm204_vm1, %v11123_v43 }
 0x439   : > { %8364 = vmatmul.mubr.msk.f32.gmra.mrb[24].mxu1 %vm204_vm1, %v11125_v47 }
 0x43a   : > { %8366 = vmatprep.mubr.msk.f32.mxu1 %vm204_vm1, %v11142_v49 }
 0x43d   : > { %8367 = vmatmul.mubr.msk.f32.gmra.mrb[26].mxu1 %vm204_vm1, %v11144_v28 }
 0x43e   : > { %8369 = vmatprep.mubr.msk.f32.mxu1 %vm204_vm1, %v11161_v12 }
 0x441   : > { %8370 = vmatmul.mubr.msk.f32.gmra.mrb[28].mxu1 %vm204_vm1, %v11163_v55 }
 0x442   : > { %8372 = vmatprep.mubr.msk.f32.mxu1 %vm204_vm1, %v11180_v54 }
 0x445   : > { %8373 = vmatmul.mubr.msk.f32.gmra.mrb[30].mxu1 %vm204_vm1, %v11182_v29 }
 0x446   : > { %8377 = vmatprep.mubr.msk.f32.mxu1 %vm204_vm1, %v4193_v19  ;;  %v4206_v19 = vrot.slane %v10950_v48, 2 }
 0x449   : > { %8378 = vmatmul.mubr.msk.f32.vlgmr.msra.gmra.mrb[0].mxu1 %vm204_vm1, %v4195_v13  ;;  %v4211_v13 = vrot.slane %v10971_v63, 2 }
 0x44a   : > { %8426 = vmatpush3.msk.msra.mxu1 %vm530_vm0, %v7023_v59  ;;  %8380 = vmatprep.mubr.msk.f32.mxu1 %vm204_vm1, %v11301_v52  ;;  %v4207_v59 = vrot.slane %v10952_v39, 2 }
 0x44b   : > { %8475 = vmatprep.subr.msk.mxu1 %vm530_vm0, %v11297_v38  ;;  %v11343_v0 = vsel %vm1051_vm5, %v4211_v13, %v4212_v36  ;;  %v4222_v13 = vrot.slane %v11011_v30, 2 }
 0x44c   : > { %v11330_v1 = vsel %vm1051_vm5, %v4206_v19, %v4207_v59  ;;  %v11337_v60 = vsel %vm1051_vm5, %v4207_v59, %v4209_v16  ;;  %12685 = vst [vmem:[#allocation22_spill] sm:$0xff] %v11343_v0  ;;  %v4217_v19 = vrot.slane %v10992_v4, 2  ;;  %v4219_v59 = vrot.slane %v11005_v20, 2 }
 0x44d   : > { %8381 = vmatmul.mubr.msk.f32.gmra.mrb[2].mxu1 %vm204_vm1, %v11311_v50  ;;  %12684 = vst [vmem:[#allocation21_spill] sm:$0xff] %v11330_v1  ;;  %v4221_v16 = vrot.slane %v11009_v45, 2 }
 0x44e   : > { %8383 = vmatprep.mubr.msk.f32.mxu1 %vm204_vm1, %v11317_v17  ;;  %v11356_v14 = vsel %vm1051_vm5, %v4216_v11, %v4217_v19  ;;  %v4227_v11 = vrot.slane %v11030_v44, 2 }
 0x44f   : > { %12686 = vst [vmem:[#allocation23_spill] sm:$0xff] %v11356_v14  ;;  %v11369_v20 = vsel %vm1051_vm5, %v4221_v16, %v4222_v13  ;;  %v4232_v16 = vrot.slane %v11049_v6, 2 }
 0x450   : > { %12687 = vst [vmem:[#allocation24_spill] sm:$0xff] %v11369_v20 }
 0x451   : > { %8384 = vmatmul.mubr.msk.f32.gmra.mrb[4].mxu1 %vm204_vm1, %v11324_v56 }
 0x452   : > { %8386 = vmatprep.mubr.msk.f32.mxu1 %vm204_vm1, %v11330_v1  ;;  %v11350_v1 = vsel %vm1051_vm5, %v4212_v36, %v4214_v8  ;;  %v4224_v36 = vrot.slane %v11024_v58, 2  ;;  %v4226_v8 = vrot.slane %v11028_v27, 2 }
 0x454   : > { %v11382_v58 = vsel %vm1051_vm5, %v4226_v8, %v4227_v11  ;;  %v4237_v8 = vrot.slane %v11068_v40, 2 }
 0x455   : > { %8387 = vmatmul.mubr.msk.f32.gmra.mrb[6].mxu1 %vm204_vm1, %v11337_v60  ;;  %12688 = vst [vmem:[#allocation29_spill] sm:$0xff] %v11382_v58 }
 0x456   : > { %8389 = vmatprep.mubr.msk.f32.mxu1 %vm204_vm1, %v11343_v0  ;;  %v11363_v0 = vsel %vm1051_vm5, %v4217_v19, %v4219_v59  ;;  %v4229_v19 = vrot.slane %v11043_v51, 2  ;;  %v4231_v59 = vrot.slane %v11047_v57, 2 }
 0x458   : > { %v11395_v51 = vsel %vm1051_vm5, %v4231_v59, %v4232_v16  ;;  %v4242_v59 = vrot.slane %v11087_v2, 2 }
 0x459   : > { %8390 = vmatmul.mubr.msk.f32.gmra.mrb[8].mxu1 %vm204_vm1, %v11350_v1  ;;  %12689 = vst [vmem:[#allocation30_spill] sm:$0xff] %v11395_v51 }
 0x45a   : > { %8392 = vmatprep.mubr.msk.f32.mxu1 %vm204_vm1, %v11356_v14  ;;  %v11376_v14 = vsel %vm1051_vm5, %v4222_v13, %v4224_v36  ;;  %v4234_v13 = vrot.slane %v11062_v3, 2  ;;  %v4236_v36 = vrot.slane %v11066_v32, 2 }
 0x45c   : > { %v11408_v3 = vsel %vm1051_vm5, %v4236_v36, %v4237_v8  ;;  %v4247_v36 = vrot.slane %v11106_v34, 2 }
 0x45d   : > { %8393 = vmatmul.mubr.msk.f32.gmra.mrb[10].mxu1 %vm204_vm1, %v11363_v0  ;;  %12690 = vst [vmem:[#allocation31_spill] sm:$0xff] %v11408_v3 }
 0x45e   : > { %8395 = vmatprep.mubr.msk.f32.mxu1 %vm204_vm1, %v11369_v20  ;;  %v11389_v20 = vsel %vm1051_vm5, %v4227_v11, %v4229_v19  ;;  %v4239_v11 = vrot.slane %v11081_v46, 2  ;;  %v4241_v19 = vrot.slane %v11085_v7, 2 }
 0x460   : > { %v11421_v46 = vsel %vm1051_vm5, %v4241_v19, %v4242_v59  ;;  %v4252_v19 = vrot.slane %v11125_v47, 2 }
 0x461   : > { %8396 = vmatmul.mubr.msk.f32.gmra.mrb[12].mxu1 %vm204_vm1, %v11376_v14  ;;  %12691 = vst [vmem:[#allocation32_spill] sm:$0xff] %v11421_v46 }
 0x462   : > { %8398 = vmatprep.mubr.msk.f32.mxu1 %vm204_vm1, %v11382_v58  ;;  %v11402_v58 = vsel %vm1051_vm5, %v4232_v16, %v4234_v13  ;;  %v4244_v16 = vrot.slane %v11100_v62, 2  ;;  %v4246_v13 = vrot.slane %v11104_v31, 2 }
 0x464   : > { %v11434_v62 = vsel %vm1051_vm5, %v4246_v13, %v4247_v36  ;;  %v4257_v13 = vrot.slane %v11144_v28, 2 }
 0x465   : > { %8399 = vmatmul.mubr.msk.f32.gmra.mrb[14].mxu1 %vm204_vm1, %v11389_v20  ;;  %12693 = vst [vmem:[#allocation34_spill] sm:$0xff] %v11434_v62 }
 0x466   : > { %8401 = vmatprep.mubr.msk.f32.mxu1 %vm204_vm1, %v11395_v51  ;;  %v11415_v51 = vsel %vm1051_vm5, %v4237_v8, %v4239_v11  ;;  %v4249_v8 = vrot.slane %v11119_v33, 2  ;;  %v4251_v11 = vrot.slane %v11123_v43, 2 }
 0x468   : > { %v11447_v33 = vsel %vm1051_vm5, %v4251_v11, %v4252_v19  ;;  %v4262_v11 = vrot.slane %v11163_v55, 2 }
 0x469   : > { %8402 = vmatmul.mubr.msk.f32.gmra.mrb[16].mxu1 %vm204_vm1, %v11402_v58  ;;  %12694 = vst [vmem:[#allocation36_spill] sm:$0xff] %v11447_v33 }
 0x46a   : > { %8404 = vmatprep.mubr.msk.f32.mxu1 %vm204_vm1, %v11408_v3  ;;  %v11428_v3 = vsel %vm1051_vm5, %v4242_v59, %v4244_v16  ;;  %v4254_v59 = vrot.slane %v11138_v41, 2  ;;  %v4256_v16 = vrot.slane %v11142_v49, 2 }
 0x46b   : > { %12692 = vst [vmem:[#allocation33_spill] sm:$0xff] %v11428_v3 }
 0x46c   : > { %v11460_v41 = vsel %vm1051_vm5, %v4256_v16, %v4257_v13  ;;  %v4267_v16 = vrot.slane %v11182_v29, 2 }
 0x46d   : > { %8405 = vmatmul.mubr.msk.f32.gmra.mrb[18].mxu1 %vm204_vm1, %v11415_v51  ;;  %12696 = vst [vmem:[#allocation38_spill] sm:$0xff] %v11460_v41 }
 0x46e   : > { %8407 = vmatprep.mubr.msk.f32.mxu1 %vm204_vm1, %v11421_v46  ;;  %v11441_v46 = vsel %vm1051_vm5, %v4247_v36, %v4249_v8  ;;  %v4259_v36 = vrot.slane %v11157_v61, 2  ;;  %v4261_v8 = vrot.slane %v11161_v12, 2 }
 0x470   : > { %v11473_v61 = vsel %vm1051_vm5, %v4261_v8, %v4262_v11  ;;  %v12700_v8 = vld [vmem:[#allocation25_spill] sm:$0xff] }
 0x471   : > { %8408 = vmatmul.mubr.msk.f32.gmra.mrb[20].mxu1 %vm204_vm1, %v11428_v3  ;;  %12697 = vst [vmem:[#allocation39_spill] sm:$0xff] %v11473_v61 }
 0x472   : > { %8410 = vmatprep.mubr.msk.f32.mxu1 %vm204_vm1, %v11434_v62  ;;  %v11454_v62 = vsel %vm1051_vm5, %v4252_v19, %v4254_v59  ;;  %v4264_v19 = vrot.slane %v11176_v9, 2  ;;  %v4266_v59 = vrot.slane %v11180_v54, 2 }
 0x473   : > { %12695 = vst [vmem:[#allocation37_spill] sm:$0xff] %v11454_v62 }
 0x474   : > { %v11486_v9 = vsel %vm1051_vm5, %v4266_v59, %v4267_v16  ;;  %v12703_v59 = vld [vmem:[#allocation28_spill] sm:$0xff] }
 0x475   : > { %8411 = vmatmul.mubr.msk.f32.gmra.mrb[22].mxu1 %vm204_vm1, %v11441_v46 }
 0x476   : > { %8413 = vmatprep.mubr.msk.f32.mxu1 %vm204_vm1, %v11447_v33  ;;  %v11467_v33 = vsel %vm1051_vm5, %v4257_v13, %v4259_v36  ;;  %v4269_v13 = vrot.slane %v11195_v26, 2  ;;  %v7091_v26 = vld [vmem:[%s12409_s2 + $0x14] sm:$0xf] }
 0x478   : > { %v11491_v36 = vsel %vm1051_vm5, %v4267_v16, %v4269_v13  ;;  %v12704_v16 = vld [vmem:[#allocation35_spill] sm:$0xff]  ;;  %v12705_v13 = vld [vmem:[#allocation40_spill] sm:$0xff] }
 0x479   : > { %8414 = vmatmul.mubr.msk.f32.gmra.mrb[24].mxu1 %vm204_vm1, %v11454_v62 }
 0x47a   : > { %8416 = vmatprep.mubr.msk.f32.mxu1 %vm204_vm1, %v11460_v41  ;;  %v11480_v41 = vsel %vm1051_vm5, %v4262_v11, %v4264_v19  ;;  %v12701_v11 = vld [vmem:[#allocation26_spill] sm:$0xff]  ;;  %v12702_v19 = vld [vmem:[#allocation27_spill] sm:$0xff] }
 0x47d   : > { %8417 = vmatmul.mubr.msk.f32.gmra.mrb[26].mxu1 %vm204_vm1, %v11467_v33 }
 0x47e   : > { %8419 = vmatprep.mubr.msk.f32.mxu1 %vm204_vm1, %v11473_v61 }
 0x481   : > { %8420 = vmatmul.mubr.msk.f32.gmra.mrb[28].mxu1 %vm204_vm1, %v11480_v41 }
 0x482   : > { %8422 = vmatprep.mubr.msk.f32.mxu1 %vm204_vm1, %v11486_v9 }
 0x485   : > { %8423 = vmatmul.mubr.msk.f32.gmra.mrb[30].mxu1 %vm204_vm1, %v11491_v36 }
 0x486   : > { %8427 = vmatprep.mubr.msk.f32.mxu1 %vm204_vm1, %v10910_v21  ;;  %v11561_v21 = vld [vmem:[#allocation2 + $0x180] sm:$0xff] }
 0x489   : > { %8428 = vmatmul.mubr.msk.f32.vlgmr.msra.gmra.mrb[0].mxu1 %vm204_vm1, %v10912_v35  ;;  %v11565_v35 = vld [vmem:[#allocation2 + $0x188] sm:$0xff] }
 0x48a   : > { %8476 = vmatpush3.msk.msra.mxu1 %vm530_vm0, %v11297_v38  ;;  %8430 = vmatprep.mubr.msk.f32.mxu1 %vm204_vm1, %v10925_v5  ;;  %v7125_v38 = vld [vmem:[%s12409_s2 + $0x18] sm:$0xf] }
 0x48b   : > { %8525 = vmatprep.subr.msk.mxu1 %vm530_vm0, %v7091_v26 }
 0x48d   : > { %8431 = vmatmul.mubr.msk.f32.gmra.mrb[2].mxu1 %vm204_vm1, %v10927_v18 }
 0x48e   : > { %8433 = vmatprep.mubr.msk.f32.mxu1 %vm204_vm1, %v10950_v48 }
 0x491   : > { %8434 = vmatmul.mubr.msk.f32.gmra.mrb[4].mxu1 %vm204_vm1, %v10952_v39 }
 0x492   : > { %8436 = vmatprep.mubr.msk.f32.mxu1 %vm204_vm1, %v10971_v63 }
 0x495   : > { %8437 = vmatmul.mubr.msk.f32.gmra.mrb[6].mxu1 %vm204_vm1, %v10973_v23 }
 0x496   : > { %8439 = vmatprep.mubr.msk.f32.mxu1 %vm204_vm1, %v10990_v24 }
 0x499   : > { %8440 = vmatmul.mubr.msk.f32.gmra.mrb[8].mxu1 %vm204_vm1, %v10992_v4 }
 0x49a   : > { %8442 = vmatprep.mubr.msk.f32.mxu1 %vm204_vm1, %v11009_v45 }
 0x49d   : > { %8443 = vmatmul.mubr.msk.f32.gmra.mrb[10].mxu1 %vm204_vm1, %v11011_v30 }
 0x49e   : > { %8445 = vmatprep.mubr.msk.f32.mxu1 %vm204_vm1, %v11028_v27 }
 0x4a1   : > { %8446 = vmatmul.mubr.msk.f32.gmra.mrb[12].mxu1 %vm204_vm1, %v11030_v44 }
 0x4a2   : > { %8448 = vmatprep.mubr.msk.f32.mxu1 %vm204_vm1, %v11047_v57 }
 0x4a5   : > { %8449 = vmatmul.mubr.msk.f32.gmra.mrb[14].mxu1 %vm204_vm1, %v11049_v6 }
 0x4a6   : > { %8451 = vmatprep.mubr.msk.f32.mxu1 %vm204_vm1, %v11066_v32 }
 0x4a9   : > { %8452 = vmatmul.mubr.msk.f32.gmra.mrb[16].mxu1 %vm204_vm1, %v11068_v40 }
 0x4aa   : > { %8454 = vmatprep.mubr.msk.f32.mxu1 %vm204_vm1, %v11085_v7 }
 0x4ad   : > { %8455 = vmatmul.mubr.msk.f32.gmra.mrb[18].mxu1 %vm204_vm1, %v11087_v2 }
 0x4ae   : > { %8457 = vmatprep.mubr.msk.f32.mxu1 %vm204_vm1, %v11104_v31 }
 0x4b1   : > { %8458 = vmatmul.mubr.msk.f32.gmra.mrb[20].mxu1 %vm204_vm1, %v11106_v34 }
 0x4b2   : > { %8460 = vmatprep.mubr.msk.f32.mxu1 %vm204_vm1, %v11123_v43 }
 0x4b5   : > { %8461 = vmatmul.mubr.msk.f32.gmra.mrb[22].mxu1 %vm204_vm1, %v11125_v47 }
 0x4b6   : > { %8463 = vmatprep.mubr.msk.f32.mxu1 %vm204_vm1, %v11142_v49 }
 0x4b9   : > { %8464 = vmatmul.mubr.msk.f32.gmra.mrb[24].mxu1 %vm204_vm1, %v11144_v28 }
 0x4ba   : > { %8466 = vmatprep.mubr.msk.f32.mxu1 %vm204_vm1, %v11161_v12 }
 0x4bd   : > { %8467 = vmatmul.mubr.msk.f32.gmra.mrb[26].mxu1 %vm204_vm1, %v11163_v55 }
 0x4be   : > { %8469 = vmatprep.mubr.msk.f32.mxu1 %vm204_vm1, %v11180_v54 }
 0x4c1   : > { %8470 = vmatmul.mubr.msk.f32.gmra.mrb[28].mxu1 %vm204_vm1, %v11182_v29 }
 0x4c2   : > { %8472 = vmatprep.mubr.msk.f32.mxu1 %vm204_vm1, %v11561_v21 }
 0x4c5   : > { %8473 = vmatmul.mubr.msk.f32.gmra.mrb[30].mxu1 %vm204_vm1, %v11565_v35 }
 0x4c6   : > { %8477 = vmatprep.mubr.msk.f32.mxu1 %vm204_vm1, %v10940_v25  ;;  %v12698_v25 = vld [vmem:[#allocation3_spill] sm:$0xff] }
 0x4c9   : > { %8478 = vmatmul.mubr.msk.f32.vlgmr.msra.gmra.mrb[0].mxu1 %vm204_vm1, %v10957_v37  ;;  %v12699_v37 = vld [vmem:[#allocation14_spill] sm:$0xff] }
 0x4ca   : > { %8526 = vmatpush3.msk.msra.mxu1 %vm530_vm0, %v7091_v26  ;;  %8480 = vmatprep.mubr.msk.f32.mxu1 %vm204_vm1, %v10963_v42  ;;  %v12706_v26 = vld [vmem:[#allocation4_spill] sm:$0xff] }
 0x4cb   : > { %8575 = vmatprep.subr.msk.mxu1 %vm530_vm0, %v7125_v38 }
 0x4cd   : > { %8481 = vmatmul.mubr.msk.f32.gmra.mrb[2].mxu1 %vm204_vm1, %v10976_v22 }
 0x4ce   : > { %8483 = vmatprep.mubr.msk.f32.mxu1 %vm204_vm1, %v10982_v53 }
 0x4d1   : > { %8484 = vmatmul.mubr.msk.f32.gmra.mrb[4].mxu1 %vm204_vm1, %v10995_v10 }
 0x4d2   : > { %8486 = vmatprep.mubr.msk.f32.mxu1 %vm204_vm1, %v12698_v25  ;;  %v12720_v25 = vld [vmem:[#allocation20_spill] sm:$0xff] }
 0x4d5   : > { %8487 = vmatmul.mubr.msk.f32.gmra.mrb[6].mxu1 %vm204_vm1, %v12699_v37  ;;  %v12707_v37 = vld [vmem:[#allocation5_spill] sm:$0xff] }
 0x4d6   : > { %8489 = vmatprep.mubr.msk.f32.mxu1 %vm204_vm1, %v12700_v8  ;;  %v12708_v8 = vld [vmem:[#allocation6_spill] sm:$0xff] }
 0x4d9   : > { %8490 = vmatmul.mubr.msk.f32.gmra.mrb[8].mxu1 %vm204_vm1, %v12701_v11  ;;  %v12709_v11 = vld [vmem:[#allocation7_spill] sm:$0xff] }
 0x4da   : > { %8492 = vmatprep.mubr.msk.f32.mxu1 %vm204_vm1, %v12702_v19  ;;  %v12710_v19 = vld [vmem:[#allocation8_spill] sm:$0xff] }
 0x4dd   : > { %8493 = vmatmul.mubr.msk.f32.gmra.mrb[10].mxu1 %vm204_vm1, %v12703_v59  ;;  %v12711_v59 = vld [vmem:[#allocation9_spill] sm:$0xff] }
 0x4de   : > { %8495 = vmatprep.mubr.msk.f32.mxu1 %vm204_vm1, %v12704_v16  ;;  %v12712_v16 = vld [vmem:[#allocation10_spill] sm:$0xff] }
 0x4e1   : > { %8496 = vmatmul.mubr.msk.f32.gmra.mrb[12].mxu1 %vm204_vm1, %v12705_v13  ;;  %v12713_v13 = vld [vmem:[#allocation11_spill] sm:$0xff] }
 0x4e2   : > { %8498 = vmatprep.mubr.msk.f32.mxu1 %vm204_vm1, %v12706_v26  ;;  %v12714_v26 = vld [vmem:[#allocation12_spill] sm:$0xff] }
 0x4e5   : > { %8499 = vmatmul.mubr.msk.f32.gmra.mrb[14].mxu1 %vm204_vm1, %v12707_v37  ;;  %v12715_v37 = vld [vmem:[#allocation13_spill] sm:$0xff] }
 0x4e6   : > { %8501 = vmatprep.mubr.msk.f32.mxu1 %vm204_vm1, %v12708_v8  ;;  %v12716_v8 = vld [vmem:[#allocation15_spill] sm:$0xff] }
 0x4e9   : > { %8502 = vmatmul.mubr.msk.f32.gmra.mrb[16].mxu1 %vm204_vm1, %v12709_v11  ;;  %v12717_v11 = vld [vmem:[#allocation16_spill] sm:$0xff] }
 0x4ea   : > { %8504 = vmatprep.mubr.msk.f32.mxu1 %vm204_vm1, %v12710_v19  ;;  %v12719_v19 = vld [vmem:[#allocation19_spill] sm:$0xff] }
 0x4ed   : > { %8505 = vmatmul.mubr.msk.f32.gmra.mrb[18].mxu1 %vm204_vm1, %v12711_v59  ;;  %v4867_v59 = vrot.slane %v11565_v35, 1 }
 0x4ee   : > { %8507 = vmatprep.mubr.msk.f32.mxu1 %vm204_vm1, %v12712_v16  ;;  %v4866_v16 = vrot.slane %v11561_v21, 1 }
 0x4f1   : > { %8508 = vmatmul.mubr.msk.f32.gmra.mrb[20].mxu1 %vm204_vm1, %v12713_v13  ;;  %v12718_v13 = vld [vmem:[#allocation18_spill] sm:$0xff] }
 0x4f2   : > { %8510 = vmatprep.mubr.msk.f32.mxu1 %vm204_vm1, %v12714_v26  ;;  %v3472_v26 = vld [vmem:[#allocation2 + $0x190] sm:$0x3] }
 0x4f5   : > { %8511 = vmatmul.mubr.msk.f32.gmra.mrb[22].mxu1 %vm204_vm1, %v12715_v37  ;;  %v4869_v37 = vrot.slane %v3472_v26, 1 }
 0x4f6   : > { %8513 = vmatprep.mubr.msk.f32.mxu1 %vm204_vm1, %v12716_v8 }
 0x4f9   : > { %8514 = vmatmul.mubr.msk.f32.gmra.mrb[24].mxu1 %vm204_vm1, %v12717_v11  ;;  %v11637_v11 = vsel %vm383_vm4, %v4866_v16, %v4867_v59  ;;  %v12726_v16 = vld [vmem:[#allocation30_spill] sm:$0xff] }
 0x4fa   : > { %8516 = vmatprep.mubr.msk.f32.mxu1 %vm204_vm1, %v11191_v15  ;;  %v11642_v15 = vsel %vm383_vm4, %v4867_v59, %v4869_v37  ;;  %v12721_v37 = vld [vmem:[#allocation21_spill] sm:$0xff] }
 0x4fb   : > { %v12725_v59 = vld [vmem:[#allocation29_spill] sm:$0xff] }
 0x4fd   : > { %8517 = vmatmul.mubr.msk.f32.gmra.mrb[26].mxu1 %vm204_vm1, %v12718_v13 }
 0x4fe   : > { %8519 = vmatprep.mubr.msk.f32.mxu1 %vm204_vm1, %v12719_v19  ;;  %v7159_v19 = vld [vmem:[%s12409_s2 + $0x1c] sm:$0xf] }
 0x501   : > { %8520 = vmatmul.mubr.msk.f32.gmra.mrb[28].mxu1 %vm204_vm1, %v12720_v25 }
 0x502   : > { %8522 = vmatprep.mubr.msk.f32.mxu1 %vm204_vm1, %v11637_v11 }
 0x505   : > { %8523 = vmatmul.mubr.msk.f32.gmra.mrb[30].mxu1 %vm204_vm1, %v11642_v15 }
 0x506   : > { %8527 = vmatprep.mubr.msk.f32.mxu1 %vm204_vm1, %v11301_v52  ;;  %v12722_v52 = vld [vmem:[#allocation22_spill] sm:$0xff] }
 0x509   : > { %8528 = vmatmul.mubr.msk.f32.vlgmr.msra.gmra.mrb[0].mxu1 %vm204_vm1, %v11311_v50  ;;  %v12723_v50 = vld [vmem:[#allocation23_spill] sm:$0xff] }
 0x50a   : > { %8576 = vmatpush3.msk.msra.mxu1 %vm530_vm0, %v7125_v38  ;;  %8530 = vmatprep.mubr.msk.f32.mxu1 %vm204_vm1, %v11317_v17  ;;  %v12724_v38 = vld [vmem:[#allocation24_spill] sm:$0xff] }
 0x50b   : > { %8625 = vmatprep.subr.msk.mxu1 %vm530_vm0, %v7159_v19 }
 0x50d   : > { %8531 = vmatmul.mubr.msk.f32.gmra.mrb[2].mxu1 %vm204_vm1, %v11324_v56 }
 0x50e   : > { %8533 = vmatprep.mubr.msk.f32.mxu1 %vm204_vm1, %v12721_v37 }
 0x511   : > { %8534 = vmatmul.mubr.msk.f32.gmra.mrb[4].mxu1 %vm204_vm1, %v11337_v60 }
 0x512   : > { %8536 = vmatprep.mubr.msk.f32.mxu1 %vm204_vm1, %v12722_v52 }
 0x515   : > { %8537 = vmatmul.mubr.msk.f32.gmra.mrb[6].mxu1 %vm204_vm1, %v11350_v1 }
 0x516   : > { %8539 = vmatprep.mubr.msk.f32.mxu1 %vm204_vm1, %v12723_v50  ;;  %v12727_v50 = vld [vmem:[#allocation31_spill] sm:$0xff] }
 0x519   : > { %8540 = vmatmul.mubr.msk.f32.gmra.mrb[8].mxu1 %vm204_vm1, %v11363_v0 }
 0x51a   : > { %8542 = vmatprep.mubr.msk.f32.mxu1 %vm204_vm1, %v12724_v38  ;;  %v12728_v38 = vld [vmem:[#allocation32_spill] sm:$0xff] }
 0x51d   : > { %8543 = vmatmul.mubr.msk.f32.gmra.mrb[10].mxu1 %vm204_vm1, %v11376_v14 }
 0x51e   : > { %8545 = vmatprep.mubr.msk.f32.mxu1 %vm204_vm1, %v12725_v59  ;;  %v12729_v59 = vld [vmem:[#allocation34_spill] sm:$0xff] }
 0x521   : > { %8546 = vmatmul.mubr.msk.f32.gmra.mrb[12].mxu1 %vm204_vm1, %v11389_v20 }
 0x522   : > { %8548 = vmatprep.mubr.msk.f32.mxu1 %vm204_vm1, %v12726_v16  ;;  %v12730_v16 = vld [vmem:[#allocation36_spill] sm:$0xff] }
 0x525   : > { %8549 = vmatmul.mubr.msk.f32.gmra.mrb[14].mxu1 %vm204_vm1, %v11402_v58 }
 0x526   : > { %8551 = vmatprep.mubr.msk.f32.mxu1 %vm204_vm1, %v12727_v50  ;;  %v12731_v50 = vld [vmem:[#allocation38_spill] sm:$0xff] }
 0x529   : > { %8552 = vmatmul.mubr.msk.f32.gmra.mrb[16].mxu1 %vm204_vm1, %v11415_v51 }
 0x52a   : > { %8554 = vmatprep.mubr.msk.f32.mxu1 %vm204_vm1, %v12728_v38 }
 0x52d   : > { %8555 = vmatmul.mubr.msk.f32.gmra.mrb[18].mxu1 %vm204_vm1, %v11428_v3  ;;  %v5138_v3 = vrot.slane %v11565_v35, 2 }
 0x52e   : > { %8557 = vmatprep.mubr.msk.f32.mxu1 %vm204_vm1, %v12729_v59  ;;  %v5137_v59 = vrot.slane %v11561_v21, 2 }
 0x531   : > { %8558 = vmatmul.mubr.msk.f32.gmra.mrb[20].mxu1 %vm204_vm1, %v11441_v46 }
 0x532   : > { %8560 = vmatprep.mubr.msk.f32.mxu1 %vm204_vm1, %v12730_v16 }
 0x535   : > { %8561 = vmatmul.mubr.msk.f32.gmra.mrb[22].mxu1 %vm204_vm1, %v11454_v62  ;;  %v5140_v62 = vrot.slane %v3472_v26, 2  ;;  %v7193_v26 = vld [vmem:[%s12409_s2 + $0x20] sm:$0xf] }
 0x536   : > { %8563 = vmatprep.mubr.msk.f32.mxu1 %vm204_vm1, %v12731_v50  ;;  %v11714_v50 = vsel %vm1051_vm5, %v5137_v59, %v5138_v3 }
 0x539   : > { %8564 = vmatmul.mubr.msk.f32.gmra.mrb[24].mxu1 %vm204_vm1, %v11467_v33 }
 0x53a   : > { %8566 = vmatprep.mubr.msk.f32.mxu1 %vm204_vm1, %v11473_v61  ;;  %v11719_v61 = vsel %vm1051_vm5, %v5138_v3, %v5140_v62 }
 0x53d   : > { %8567 = vmatmul.mubr.msk.f32.gmra.mrb[26].mxu1 %vm204_vm1, %v11480_v41 }
 0x53e   : > { %8569 = vmatprep.mubr.msk.f32.mxu1 %vm204_vm1, %v11486_v9 }
 0x541   : > { %8570 = vmatmul.mubr.msk.f32.gmra.mrb[28].mxu1 %vm204_vm1, %v11491_v36 }
 0x542   : > { %8572 = vmatprep.mubr.msk.f32.mxu1 %vm204_vm1, %v11714_v50 }
 0x545   : > { %8573 = vmatmul.mubr.msk.f32.gmra.mrb[30].mxu1 %vm204_vm1, %v11719_v61 }
 0x546   : > { %8577 = vmatprep.mubr.msk.f32.mxu1 %vm204_vm1, %v10925_v5  ;;  %v11788_v5 = vld [vmem:[#allocation2 + $0x198] sm:$0xff] }
 0x549   : > { %8578 = vmatmul.mubr.msk.f32.vlgmr.msra.gmra.mrb[0].mxu1 %vm204_vm1, %v10927_v18  ;;  %v11792_v18 = vld [vmem:[#allocation2 + $0x1a0] sm:$0xff] }
 0x54a   : > { %8626 = vmatpush3.msk.msra.mxu1 %vm530_vm0, %v7159_v19  ;;  %8580 = vmatprep.mubr.msk.f32.mxu1 %vm204_vm1, %v10950_v48  ;;  %v12732_v48 = vld [vmem:[#allocation3_spill] sm:$0xff] }
 0x54b   : > { %8675 = vmatprep.subr.msk.mxu1 %vm530_vm0, %v7193_v26 }
 0x54d   : > { %8581 = vmatmul.mubr.msk.f32.gmra.mrb[2].mxu1 %vm204_vm1, %v10952_v39  ;;  %v12733_v39 = vld [vmem:[#allocation14_spill] sm:$0xff] }
 0x54e   : > { %8583 = vmatprep.mubr.msk.f32.mxu1 %vm204_vm1, %v10971_v63  ;;  %v12734_v63 = vld [vmem:[#allocation25_spill] sm:$0xff] }
 0x551   : > { %8584 = vmatmul.mubr.msk.f32.gmra.mrb[4].mxu1 %vm204_vm1, %v10973_v23  ;;  %v12736_v23 = vld [vmem:[#allocation27_spill] sm:$0xff] }
 0x552   : > { %8586 = vmatprep.mubr.msk.f32.mxu1 %vm204_vm1, %v10990_v24  ;;  %v12739_v24 = vld [vmem:[#allocation40_spill] sm:$0xff] }
 0x555   : > { %8587 = vmatmul.mubr.msk.f32.gmra.mrb[6].mxu1 %vm204_vm1, %v10992_v4  ;;  %v12740_v4 = vld [vmem:[#allocation4_spill] sm:$0xff] }
 0x556   : > { %8589 = vmatprep.mubr.msk.f32.mxu1 %vm204_vm1, %v11009_v45  ;;  %v12742_v45 = vld [vmem:[#allocation6_spill] sm:$0xff] }
 0x559   : > { %8590 = vmatmul.mubr.msk.f32.gmra.mrb[8].mxu1 %vm204_vm1, %v11011_v30  ;;  %v12743_v30 = vld [vmem:[#allocation7_spill] sm:$0xff] }
 0x55a   : > { %8592 = vmatprep.mubr.msk.f32.mxu1 %vm204_vm1, %v11028_v27  ;;  %v12745_v27 = vld [vmem:[#allocation9_spill] sm:$0xff] }
 0x55d   : > { %8593 = vmatmul.mubr.msk.f32.gmra.mrb[10].mxu1 %vm204_vm1, %v11030_v44  ;;  %v12746_v44 = vld [vmem:[#allocation10_spill] sm:$0xff] }
 0x55e   : > { %8595 = vmatprep.mubr.msk.f32.mxu1 %vm204_vm1, %v11047_v57  ;;  %v12747_v57 = vld [vmem:[#allocation11_spill] sm:$0xff] }
 0x561   : > { %8596 = vmatmul.mubr.msk.f32.gmra.mrb[12].mxu1 %vm204_vm1, %v11049_v6  ;;  %v12748_v6 = vld [vmem:[#allocation12_spill] sm:$0xff] }
 0x562   : > { %8598 = vmatprep.mubr.msk.f32.mxu1 %vm204_vm1, %v11066_v32  ;;  %v12750_v32 = vld [vmem:[#allocation16_spill] sm:$0xff] }
 0x565   : > { %8599 = vmatmul.mubr.msk.f32.gmra.mrb[14].mxu1 %vm204_vm1, %v11068_v40  ;;  %v12751_v40 = vld [vmem:[#allocation17_spill] sm:$0xff] }
 0x566   : > { %8601 = vmatprep.mubr.msk.f32.mxu1 %vm204_vm1, %v11085_v7  ;;  %v5677_v7 = vrot.slane %v11788_v5, 1 }
 0x569   : > { %8602 = vmatmul.mubr.msk.f32.gmra.mrb[16].mxu1 %vm204_vm1, %v11087_v2  ;;  %v5678_v2 = vrot.slane %v11792_v18, 1 }
 0x56a   : > { %8604 = vmatprep.mubr.msk.f32.mxu1 %vm204_vm1, %v11104_v31  ;;  %v3475_v31 = vld [vmem:[#allocation2 + $0x1a8] sm:$0x3] }
 0x56d   : > { %8605 = vmatmul.mubr.msk.f32.gmra.mrb[18].mxu1 %vm204_vm1, %v11106_v34  ;;  %v5680_v34 = vrot.slane %v3475_v31, 1 }
 0x56e   : > { %8607 = vmatprep.mubr.msk.f32.mxu1 %vm204_vm1, %v11123_v43  ;;  %v5679_v43 = vsel %vm383_vm4, %v5677_v7, %v5678_v2 }
 0x571   : > { %8608 = vmatmul.mubr.msk.f32.gmra.mrb[20].mxu1 %vm204_vm1, %v11125_v47  ;;  %v5681_v47 = vsel %vm383_vm4, %v5678_v2, %v5680_v34 }
 0x572   : > { %8610 = vmatprep.mubr.msk.f32.mxu1 %vm204_vm1, %v11142_v49  ;;  %v12752_v49 = vld [vmem:[#allocation19_spill] sm:$0xff] }
 0x575   : > { %8611 = vmatmul.mubr.msk.f32.gmra.mrb[22].mxu1 %vm204_vm1, %v11144_v28  ;;  %v12753_v28 = vld [vmem:[#allocation23_spill] sm:$0xff] }
 0x576   : > { %8613 = vmatprep.mubr.msk.f32.mxu1 %vm204_vm1, %v11161_v12  ;;  %v12749_v12 = vld [vmem:[#allocation13_spill] sm:$0xff] }
 0x579   : > { %8614 = vmatmul.mubr.msk.f32.gmra.mrb[24].mxu1 %vm204_vm1, %v11163_v55  ;;  %v12754_v55 = vld [vmem:[#allocation24_spill] sm:$0xff] }
 0x57a   : > { %8616 = vmatprep.mubr.msk.f32.mxu1 %vm204_vm1, %v11180_v54  ;;  %v12744_v54 = vld [vmem:[#allocation8_spill] sm:$0xff] }
 0x57d   : > { %8617 = vmatmul.mubr.msk.f32.gmra.mrb[26].mxu1 %vm204_vm1, %v11182_v29  ;;  %v12755_v29 = vld [vmem:[#allocation29_spill] sm:$0xff] }
 0x57e   : > { %8619 = vmatprep.mubr.msk.f32.mxu1 %vm204_vm1, %v11561_v21 }
 0x581   : > { %8620 = vmatmul.mubr.msk.f32.gmra.mrb[28].mxu1 %vm204_vm1, %v11565_v35 }
 0x582   : > { %8622 = vmatprep.mubr.msk.f32.mxu1 %vm204_vm1, %v11788_v5 }
 0x585   : > { %8623 = vmatmul.mubr.msk.f32.gmra.mrb[30].mxu1 %vm204_vm1, %v11792_v18 }
 0x586   : > { %8627 = vmatprep.mubr.msk.f32.mxu1 %vm204_vm1, %v10963_v42  ;;  %v12735_v42 = vld [vmem:[#allocation26_spill] sm:$0xff] }
 0x589   : > { %8628 = vmatmul.mubr.msk.f32.vlgmr.msra.gmra.mrb[0].mxu1 %vm204_vm1, %v10976_v22  ;;  %v12737_v22 = vld [vmem:[#allocation28_spill] sm:$0xff] }
 0x58a   : > { %8676 = vmatpush3.msk.msra.mxu1 %vm530_vm0, %v7193_v26  ;;  %8630 = vmatprep.mubr.msk.f32.mxu1 %vm204_vm1, %v10982_v53  ;;  %v12738_v53 = vld [vmem:[#allocation35_spill] sm:$0xff] }
 0x58d   : > { %8631 = vmatmul.mubr.msk.f32.gmra.mrb[2].mxu1 %vm204_vm1, %v10995_v10  ;;  %v12741_v10 = vld [vmem:[#allocation5_spill] sm:$0xff] }
 0x58e   : > { %8633 = vmatprep.mubr.msk.f32.mxu1 %vm204_vm1, %v12732_v48 }
 0x591   : > { %8634 = vmatmul.mubr.msk.f32.gmra.mrb[4].mxu1 %vm204_vm1, %v12733_v39 }
 0x592   : > { %8636 = vmatprep.mubr.msk.f32.mxu1 %vm204_vm1, %v12734_v63 }
 0x595   : > { %8637 = vmatmul.mubr.msk.f32.gmra.mrb[6].mxu1 %vm204_vm1, %v12735_v42 }
 0x596   : > { %8639 = vmatprep.mubr.msk.f32.mxu1 %vm204_vm1, %v12736_v23 }
 0x599   : > { %8640 = vmatmul.mubr.msk.f32.gmra.mrb[8].mxu1 %vm204_vm1, %v12737_v22 }
 0x59a   : > { %8642 = vmatprep.mubr.msk.f32.mxu1 %vm204_vm1, %v12738_v53 }
 0x59d   : > { %8643 = vmatmul.mubr.msk.f32.gmra.mrb[10].mxu1 %vm204_vm1, %v12739_v24 }
 0x59e   : > { %8645 = vmatprep.mubr.msk.f32.mxu1 %vm204_vm1, %v12740_v4 }
 0x5a1   : > { %8646 = vmatmul.mubr.msk.f32.gmra.mrb[12].mxu1 %vm204_vm1, %v12741_v10 }
 0x5a2   : > { %8648 = vmatprep.mubr.msk.f32.mxu1 %vm204_vm1, %v12742_v45 }
 0x5a5   : > { %8649 = vmatmul.mubr.msk.f32.gmra.mrb[14].mxu1 %vm204_vm1, %v12743_v30 }
 0x5a6   : > { %8651 = vmatprep.mubr.msk.f32.mxu1 %vm204_vm1, %v12744_v54 }
 0x5a9   : > { %8652 = vmatmul.mubr.msk.f32.gmra.mrb[16].mxu1 %vm204_vm1, %v12745_v27 }
 0x5aa   : > { %8654 = vmatprep.mubr.msk.f32.mxu1 %vm204_vm1, %v12746_v44 }
 0x5ad   : > { %8655 = vmatmul.mubr.msk.f32.gmra.mrb[18].mxu1 %vm204_vm1, %v12747_v57 }
 0x5ae   : > { %8657 = vmatprep.mubr.msk.f32.mxu1 %vm204_vm1, %v12748_v6 }
 0x5b1   : > { %8658 = vmatmul.mubr.msk.f32.gmra.mrb[20].mxu1 %vm204_vm1, %v12749_v12 }
 0x5b2   : > { %8660 = vmatprep.mubr.msk.f32.mxu1 %vm204_vm1, %v12716_v8 }
 0x5b5   : > { %8661 = vmatmul.mubr.msk.f32.gmra.mrb[22].mxu1 %vm204_vm1, %v12750_v32 }
 0x5b6   : > { %8663 = vmatprep.mubr.msk.f32.mxu1 %vm204_vm1, %v12751_v40 }
 0x5b9   : > { %8664 = vmatmul.mubr.msk.f32.gmra.mrb[24].mxu1 %vm204_vm1, %v12718_v13 }
 0x5ba   : > { %8666 = vmatprep.mubr.msk.f32.mxu1 %vm204_vm1, %v12752_v49 }
 0x5bd   : > { %8667 = vmatmul.mubr.msk.f32.gmra.mrb[26].mxu1 %vm204_vm1, %v12720_v25 }
 0x5be   : > { %8669 = vmatprep.mubr.msk.f32.mxu1 %vm204_vm1, %v11637_v11 }
 0x5c1   : > { %8670 = vmatmul.mubr.msk.f32.gmra.mrb[28].mxu1 %vm204_vm1, %v11642_v15  ;;  %v12756_v15 = vld [vmem:[#allocation30_spill] sm:$0xff] }
 0x5c2   : > { %8672 = vmatprep.mubr.msk.f32.mxu1 %vm204_vm1, %v5679_v43 }
 0x5c5   : > { %8673 = vmatmul.mubr.msk.f32.gmra.mrb[30].mxu1 %vm204_vm1, %v5681_v47 }
 0x5c6   : > { %8677 = vmatprep.mubr.msk.f32.mxu1 %vm204_vm1, %v11317_v17  ;;  %v12757_v17 = vld [vmem:[#allocation31_spill] sm:$0xff] }
 0x5c9   : > { %8678 = vmatmul.mubr.msk.f32.vlgmr.msra.gmra.mrb[0].mxu1 %vm204_vm1, %v11324_v56  ;;  %v12758_v56 = vld [vmem:[#allocation33_spill] sm:$0xff] }
 0x5ca   : > { %8680 = vmatprep.mubr.msk.f32.mxu1 %vm204_vm1, %v12721_v37 }
 0x5cd   : > { %8681 = vmatmul.mubr.msk.f32.gmra.mrb[2].mxu1 %vm204_vm1, %v11337_v60  ;;  %v12760_v60 = vld [vmem:[#allocation37_spill] sm:$0xff] }
 0x5ce   : > { %8683 = vmatprep.mubr.msk.f32.mxu1 %vm204_vm1, %v12722_v52 }
 0x5d1   : > { %8684 = vmatmul.mubr.msk.f32.gmra.mrb[4].mxu1 %vm204_vm1, %v11350_v1  ;;  %v12759_v1 = vld [vmem:[#allocation34_spill] sm:$0xff] }
 0x5d2   : > { %8686 = vmatprep.mubr.msk.f32.mxu1 %vm204_vm1, %v12753_v28 }
 0x5d5   : > { %8687 = vmatmul.mubr.msk.f32.gmra.mrb[6].mxu1 %vm204_vm1, %v11363_v0  ;;  %v12761_v0 = vld [vmem:[#allocation38_spill] sm:$0xff] }
 0x5d6   : > { %8689 = vmatprep.mubr.msk.f32.mxu1 %vm204_vm1, %v12754_v55 }
 0x5d9   : > { %8690 = vmatmul.mubr.msk.f32.gmra.mrb[8].mxu1 %vm204_vm1, %v11376_v14  ;;  %v12762_v14 = vld [vmem:[#allocation39_spill] sm:$0xff] }
 0x5da   : > { %8692 = vmatprep.mubr.msk.f32.mxu1 %vm204_vm1, %v12755_v29 }
 0x5dd   : > { %8693 = vmatmul.mubr.msk.f32.gmra.mrb[10].mxu1 %vm204_vm1, %v11389_v20  ;;  %v5948_v20 = vrot.slane %v11788_v5, 2 }
 0x5de   : > { %8695 = vmatprep.mubr.msk.f32.mxu1 %vm204_vm1, %v12756_v15 }
 0x5e1   : > { %8696 = vmatmul.mubr.msk.f32.gmra.mrb[12].mxu1 %vm204_vm1, %v11402_v58  ;;  %v5949_v58 = vrot.slane %v11792_v18, 2 }
 0x5e2   : > { %8698 = vmatprep.mubr.msk.f32.mxu1 %vm204_vm1, %v12757_v17 }
 0x5e3   : > { %v5950_v3 = vsel %vm1051_vm5, %v5948_v20, %v5949_v58 }
 0x5e5   : > { %8699 = vmatmul.mubr.msk.f32.gmra.mrb[14].mxu1 %vm204_vm1, %v11415_v51  ;;  %v5951_v51 = vrot.slane %v3475_v31, 2 }
 0x5e6   : > { %8701 = vmatprep.mubr.msk.f32.mxu1 %vm204_vm1, %v12728_v38 }
 0x5e9   : > { %8702 = vmatmul.mubr.msk.f32.gmra.mrb[16].mxu1 %vm204_vm1, %v12758_v56 }
 0x5ea   : > { %8704 = vmatprep.mubr.msk.f32.mxu1 %vm204_vm1, %v12759_v1 }
 0x5ed   : > { %8705 = vmatmul.mubr.msk.f32.gmra.mrb[18].mxu1 %vm204_vm1, %v11441_v46  ;;  %v5952_v46 = vsel %vm1051_vm5, %v5949_v58, %v5951_v51 }
 0x5ee   : > { %8707 = vmatprep.mubr.msk.f32.mxu1 %vm204_vm1, %v12730_v16 }
 0x5f1   : > { %8708 = vmatmul.mubr.msk.f32.gmra.mrb[20].mxu1 %vm204_vm1, %v12760_v60 }
 0x5f2   : > { %8710 = vmatprep.mubr.msk.f32.mxu1 %vm204_vm1, %v12761_v0 }
 0x5f5   : > { %8711 = vmatmul.mubr.msk.f32.gmra.mrb[22].mxu1 %vm204_vm1, %v11467_v33 }
 0x5f6   : > { %8713 = vmatprep.mubr.msk.f32.mxu1 %vm204_vm1, %v12762_v14 }
 0x5f9   : > { %8714 = vmatmul.mubr.msk.f32.gmra.mrb[24].mxu1 %vm204_vm1, %v11480_v41 }
 0x5fa   : > { %8716 = vmatprep.mubr.msk.f32.mxu1 %vm204_vm1, %v11486_v9 }
 0x5fd   : > { %8717 = vmatmul.mubr.msk.f32.gmra.mrb[26].mxu1 %vm204_vm1, %v11491_v36 }
 0x5fe   : > { %8719 = vmatprep.mubr.msk.f32.mxu1 %vm204_vm1, %v11714_v50 }
 0x601   : > { %8720 = vmatmul.mubr.msk.f32.gmra.mrb[28].mxu1 %vm204_vm1, %v11719_v61 }
 0x602   : > { %8722 = vmatprep.mubr.msk.f32.mxu1 %vm204_vm1, %v5950_v3 }
 0x605   : > { %8723 = vmatmul.mubr.msk.f32.gmra.mrb[30].mxu1 %vm204_vm1, %v5952_v46 }
 0x69c   : > { %v11929_v62 = vpop.f32.mrb[0].mxu1 }
 0x69d   : > { %v6220_v33 = vsel %vm204_vm1, %v11929_v62, 0.0  ;;  %v11933_v41 = vpop.f32.mrb[1].mxu1 }
 0x69e   : > { %v6219_v9 = vsel %vm204_vm1, %v11933_v41, 0.0 }
 0x69f   : > { %v6221_v36 = vadd.f32 %v6220_v33, %v6219_v9 }
 0x6a0   : > { %v11937_v61 = vpop.f32.mrb[2].mxu1 }
 0x6a1   : > { %v11939_v21 = vpop.f32.mrb[3].mxu1  ;;  %v6224_v8 = vsel %vm204_vm1, %v11937_v61, 0.0 }
 0x6a2   : > { %v6222_v35 = vsel %vm204_vm1, %v11939_v21, 0.0 }
 0x6a3   : > { %v6223_v25 = vadd.f32 %v6222_v35, %v6221_v36 }
 0x6a4   : > { %v11945_v11 = vpop.f32.mrb[4].mxu1 }
 0x6a5   : > { %v11947_v19 = vpop.f32.mrb[5].mxu1  ;;  %v6225_v13 = vadd.f32 %v6224_v8, %v6223_v25  ;;  %v6228_v50 = vsel %vm204_vm1, %v11945_v11, 0.0 }
 0x6a6   : > { %v6226_v37 = vsel %vm204_vm1, %v11947_v19, 0.0 }
 0x6a7   : > { %v6227_v52 = vadd.f32 %v6226_v37, %v6225_v13 }
 0x6a8   : > { %v11953_v38 = vpop.f32.mrb[6].mxu1 }
 0x6a9   : > { %v11955_v59 = vpop.f32.mrb[7].mxu1  ;;  %v6229_v16 = vadd.f32 %v6228_v50, %v6227_v52  ;;  %v6232_v18 = vsel %vm204_vm1, %v11953_v38, 0.0 }
 0x6aa   : > { %v6230_v26 = vsel %vm204_vm1, %v11955_v59, 0.0 }
 0x6ab   : > { %v6231_v5 = vadd.f32 %v6230_v26, %v6229_v16 }
 0x6ac   : > { %v11961_v48 = vpop.f32.mrb[8].mxu1 }
 0x6ad   : > { %v11963_v39 = vpop.f32.mrb[9].mxu1  ;;  %v6233_v63 = vadd.f32 %v6232_v18, %v6231_v5  ;;  %v6236_v22 = vsel %vm204_vm1, %v11961_v48, 0.0 }
 0x6ae   : > { %v6234_v42 = vsel %vm204_vm1, %v11963_v39, 0.0 }
 0x6af   : > { %v6235_v23 = vadd.f32 %v6234_v42, %v6233_v63 }
 0x6b0   : > { %v11969_v53 = vpop.f32.mrb[10].mxu1 }
 0x6b1   : > { %v11971_v24 = vpop.f32.mrb[11].mxu1  ;;  %v6237_v4 = vadd.f32 %v6236_v22, %v6235_v23  ;;  %v6240_v30 = vsel %vm204_vm1, %v11969_v53, 0.0 }
 0x6b2   : > { %v6238_v10 = vsel %vm204_vm1, %v11971_v24, 0.0 }
 0x6b3   : > { %v6239_v45 = vadd.f32 %v6238_v10, %v6237_v4 }
 0x6b4   : > { %v11977_v54 = vpop.f32.mrb[12].mxu1 }
 0x6b5   : > { %v11979_v27 = vpop.f32.mrb[13].mxu1  ;;  %v6241_v44 = vadd.f32 %v6240_v30, %v6239_v45  ;;  %v6244_v12 = vsel %vm204_vm1, %v11977_v54, 0.0 }
 0x6b6   : > { %v6242_v57 = vsel %vm204_vm1, %v11979_v27, 0.0 }
 0x6b7   : > { %v6243_v6 = vadd.f32 %v6242_v57, %v6241_v44 }
 0x6b8   : > { %v11985_v32 = vpop.f32.mrb[14].mxu1 }
 0x6b9   : > { %v11987_v40 = vpop.f32.mrb[15].mxu1  ;;  %v6245_v49 = vadd.f32 %v6244_v12, %v6243_v6  ;;  %v6248_v31 = vsel %vm204_vm1, %v11985_v32, 0.0 }
 0x6ba   : > { %v6246_v7 = vsel %vm204_vm1, %v11987_v40, 0.0 }
 0x6bb   : > { %v6247_v2 = vadd.f32 %v6246_v7, %v6245_v49 }
 0x6bc   : > { %v11993_v34 = vpop.f32.mrb[16].mxu1 }
 0x6bd   : > { %v11995_v43 = vpop.f32.mrb[17].mxu1  ;;  %v6249_v47 = vadd.f32 %v6248_v31, %v6247_v2  ;;  %v6252_v29 = vsel %vm204_vm1, %v11993_v34, 0.0 }
 0x6be   : > { %v6250_v28 = vsel %vm204_vm1, %v11995_v43, 0.0 }
 0x6bf   : > { %v6251_v55 = vadd.f32 %v6250_v28, %v6249_v47 }
 0x6c0   : > { %v12001_v15 = vpop.f32.mrb[18].mxu1 }
 0x6c1   : > { %v12003_v17 = vpop.f32.mrb[19].mxu1  ;;  %v6253_v56 = vadd.f32 %v6252_v29, %v6251_v55  ;;  %v6256_v0 = vsel %vm204_vm1, %v12001_v15, 0.0 }
 0x6c2   : > { %v6254_v1 = vsel %vm204_vm1, %v12003_v17, 0.0 }
 0x6c3   : > { %v6255_v60 = vadd.f32 %v6254_v1, %v6253_v56 }
 0x6c4   : > { %v12009_v14 = vpop.f32.mrb[20].mxu1 }
 0x6c5   : > { %v12011_v20 = vpop.f32.mrb[21].mxu1  ;;  %v6257_v58 = vadd.f32 %v6256_v0, %v6255_v60  ;;  %v6260_v46 = vsel %vm204_vm1, %v12009_v14, 0.0 }
 0x6c6   : > { %v6258_v51 = vsel %vm204_vm1, %v12011_v20, 0.0 }
 0x6c7   : > { %v6259_v3 = vadd.f32 %v6258_v51, %v6257_v58 }
 0x6c8   : > { %v8712_v33 = vpop.f32.mrb[22].mxu1 }
 0x6c9   : > { %v6138_v9 = vpop.f32.mrb[23].mxu1  ;;  %v6261_v36 = vadd.f32 %v6260_v46, %v6259_v3  ;;  %v6264_v8 = vsel %vm204_vm1, %v8712_v33, 0.0 }
 0x6ca   : > { %v6262_v35 = vsel %vm204_vm1, %v6138_v9, 0.0 }
 0x6cb   : > { %v6263_v25 = vadd.f32 %v6262_v35, %v6261_v36 }
 0x6cc   : > { %v8715_v13 = vpop.f32.mrb[24].mxu1 }
 0x6cd   : > { %v6148_v37 = vpop.f32.mrb[25].mxu1  ;;  %v6265_v52 = vadd.f32 %v6264_v8, %v6263_v25  ;;  %v6268_v26 = vsel %vm204_vm1, %v8715_v13, 0.0 }
 0x6ce   : > { %v6266_v50 = vsel %vm204_vm1, %v6148_v37, 0.0 }
 0x6cf   : > { %v6267_v16 = vadd.f32 %v6266_v50, %v6265_v52 }
 0x6d0   : > { %v8718_v5 = vpop.f32.mrb[26].mxu1 }
 0x6d1   : > { %v6158_v18 = vpop.f32.mrb[27].mxu1  ;;  %v6269_v63 = vadd.f32 %v6268_v26, %v6267_v16  ;;  %v6272_v22 = vsel %vm204_vm1, %v8718_v5, 0.0 }
 0x6d2   : > { %v6270_v42 = vsel %vm204_vm1, %v6158_v18, 0.0 }
 0x6d3   : > { %v6271_v23 = vadd.f32 %v6270_v42, %v6269_v63 }
 0x6d4   : > { %v8721_v4 = vpop.f32.mrb[28].mxu1 }
 0x6d5   : > { %v6168_v10 = vpop.f32.mrb[29].mxu1  ;;  %v6273_v45 = vadd.f32 %v6272_v22, %v6271_v23  ;;  %v6276_v57 = vsel %vm204_vm1, %v8721_v4, 0.0 }
 0x6d6   : > { %v6274_v30 = vsel %vm204_vm1, %v6168_v10, 0.0 }
 0x6d7   : > { %v6275_v44 = vadd.f32 %v6274_v30, %v6273_v45 }
 0x6d8   : > { %v8724_v6 = vpop.f32.mrb[30].mxu1 }
 0x6d9   : > { %v6178_v12 = vpop.f32.mrb[31].mxu1  ;;  %v6277_v49 = vadd.f32 %v6276_v57, %v6275_v44  ;;  %v6280_v31 = vsel %vm204_vm1, %v8724_v6, 0.0 }
 0x6da   : > { %v6278_v7 = vsel %vm204_vm1, %v6178_v12, 0.0 }
 0x6db   : > { %v6279_v2 = vadd.f32 %v6278_v7, %v6277_v49 }
 0x6dd   : > { %v6281_v47 = vadd.f32 %v6280_v31, %v6279_v2 }
 0x6df   : > { %v6282_v28 = vrot.slane %v6281_v47, 4 }
 0x6e1   : > { %v6283_v55 = vadd.f32 %v6282_v28, %v6281_v47 }
 0x6e3   : > { %v6284_v29 = vrot.slane %v6283_v55, 2 }
 0x6e5   : > { %v6285_v56 = vadd.f32 %v6284_v29, %v6283_v55 }
 0x6e7   : > { %v6286_v1 = vrot.slane %v6285_v56, 1 }
 0x6e9   : > { %v6287_v60 = vadd.f32 %v6286_v1, %v6285_v56 }
 0x6eb   : > { %v6288_v0 = vmul.f32 0.00390625, %v6287_v60 }
 0x6ed   : > { %v12028_v58 = vsub.f32 %v11933_v41, %v6288_v0  ;;  %v12031_v51 = vsub.f32 %v11929_v62, %v6288_v0  ;;  %v12034_v3 = vsub.f32 %v11939_v21, %v6288_v0  ;;  %v12037_v46 = vsub.f32 %v11937_v61, %v6288_v0 }
 0x6ee   : > { %v12040_v36 = vsub.f32 %v11947_v19, %v6288_v0  ;;  %v12043_v35 = vsub.f32 %v11945_v11, %v6288_v0  ;;  %v12046_v25 = vsub.f32 %v11955_v59, %v6288_v0  ;;  %v12049_v41 = vsub.f32 %v11953_v38, %v6288_v0 }
 0x6ef   : > { %v12052_v62 = vsub.f32 %v11963_v39, %v6288_v0  ;;  %v12055_v21 = vsub.f32 %v11961_v48, %v6288_v0  ;;  %v12058_v61 = vsub.f32 %v11971_v24, %v6288_v0  ;;  %v12061_v19 = vsub.f32 %v11969_v53, %v6288_v0 }
 0x6f0   : > { %v12064_v11 = vsub.f32 %v11979_v27, %v6288_v0  ;;  %v12067_v59 = vsub.f32 %v11977_v54, %v6288_v0  ;;  %v12070_v38 = vsub.f32 %v11987_v40, %v6288_v0  ;;  %v12073_v39 = vsub.f32 %v11985_v32, %v6288_v0 }
 0x6f1   : > { %v12076_v48 = vsub.f32 %v11995_v43, %v6288_v0  ;;  %v12079_v24 = vsub.f32 %v11993_v34, %v6288_v0  ;;  %v12082_v53 = vsub.f32 %v12003_v17, %v6288_v0  ;;  %v12085_v27 = vsub.f32 %v12001_v15, %v6288_v0 }
 0x6f2   : > { %v12088_v54 = vsub.f32 %v12011_v20, %v6288_v0  ;;  %v12091_v40 = vsub.f32 %v12009_v14, %v6288_v0  ;;  %v12093_v32 = vsub.f32 %v6138_v9, %v6288_v0  ;;  %v12095_v8 = vsub.f32 %v8712_v33, %v6288_v0 }
 0x6f3   : > { %v12097_v43 = vsub.f32 %v6148_v37, %v6288_v0  ;;  %v12099_v34 = vsub.f32 %v8715_v13, %v6288_v0  ;;  %v12101_v52 = vsub.f32 %v6158_v18, %v6288_v0  ;;  %v12103_v17 = vsub.f32 %v8718_v5, %v6288_v0 }
 0x6f4   : > { %v12105_v15 = vsub.f32 %v6168_v10, %v6288_v0  ;;  %v12107_v50 = vsub.f32 %v8721_v4, %v6288_v0  ;;  %v12109_v20 = vsub.f32 %v6178_v12, %v6288_v0  ;;  %v12111_v14 = vsub.f32 %v8724_v6, %v6288_v0 }
 0x6f5   : > { %v6321_v33 = vmul.f32 %v12028_v58, %v12028_v58  ;;  %v6322_v9 = vmul.f32 %v12031_v51, %v12031_v51  ;;  %v6323_v13 = vmul.f32 %v12034_v3, %v12034_v3  ;;  %v6324_v37 = vmul.f32 %v12037_v46, %v12037_v46 }
 0x6f6   : > { %v6325_v18 = vmul.f32 %v12040_v36, %v12040_v36  ;;  %v6326_v23 = vmul.f32 %v12043_v35, %v12043_v35  ;;  %v6327_v10 = vmul.f32 %v12046_v25, %v12046_v25  ;;  %v6328_v44 = vmul.f32 %v12049_v41, %v12049_v41 }
 0x6f7   : > { %v6353_v16 = vsel %vm204_vm1, %v6321_v33, 0.0  ;;  %v6354_v26 = vsel %vm204_vm1, %v6322_v9, 0.0  ;;  %v6356_v63 = vsel %vm204_vm1, %v6323_v13, 0.0  ;;  %v6358_v22 = vsel %vm204_vm1, %v6324_v37, 0.0 }
 0x6f8   : > { %v6355_v5 = vadd.f32 %v6354_v26, %v6353_v16  ;;  %v6360_v45 = vsel %vm204_vm1, %v6325_v18, 0.0  ;;  %v6362_v57 = vsel %vm204_vm1, %v6326_v23, 0.0  ;;  %v6329_v12 = vmul.f32 %v12052_v62, %v12052_v62 }
 0x6f9   : > { %v6364_v49 = vsel %vm204_vm1, %v6327_v10, 0.0  ;;  %v6330_v2 = vmul.f32 %v12055_v21, %v12055_v21  ;;  %v6366_v31 = vsel %vm204_vm1, %v6328_v44, 0.0  ;;  %v6331_v28 = vmul.f32 %v12058_v61, %v12058_v61 }
 0x6fa   : > { %v6357_v42 = vadd.f32 %v6356_v63, %v6355_v5  ;;  %v6368_v55 = vsel %vm204_vm1, %v6329_v12, 0.0  ;;  %v6332_v56 = vmul.f32 %v12061_v19, %v12061_v19  ;;  %v6333_v0 = vmul.f32 %v12064_v11, %v12064_v11 }
 0x6fb   : > { %v6370_v1 = vsel %vm204_vm1, %v6330_v2, 0.0  ;;  %v6372_v33 = vsel %vm204_vm1, %v6331_v28, 0.0  ;;  %v6334_v13 = vmul.f32 %v12067_v59, %v12067_v59  ;;  %v6335_v26 = vmul.f32 %v12070_v38, %v12070_v38 }
 0x6fc   : > { %v6359_v4 = vadd.f32 %v6358_v22, %v6357_v42  ;;  %v6374_v37 = vsel %vm204_vm1, %v6332_v56, 0.0  ;;  %v6376_v5 = vsel %vm204_vm1, %v6333_v0, 0.0  ;;  %v6336_v63 = vmul.f32 %v12073_v39, %v12073_v39 }
 0x6fd   : > { %v6378_v42 = vsel %vm204_vm1, %v6334_v13, 0.0  ;;  %v6337_v22 = vmul.f32 %v12076_v48, %v12076_v48 }
 0x6fe   : > { %v6361_v30 = vadd.f32 %v6360_v45, %v6359_v4  ;;  %v6380_v4 = vsel %vm204_vm1, %v6335_v26, 0.0  ;;  %v6338_v45 = vmul.f32 %v12079_v24, %v12079_v24 }
 0x700   : > { %v6363_v6 = vadd.f32 %v6362_v57, %v6361_v30  ;;  %v6382_v30 = vsel %vm204_vm1, %v6336_v63, 0.0  ;;  %v6339_v57 = vmul.f32 %v12082_v53, %v12082_v53 }
 0x702   : > { %v6365_v7 = vadd.f32 %v6364_v49, %v6363_v6  ;;  %v6384_v6 = vsel %vm204_vm1, %v6337_v22, 0.0  ;;  %v6340_v49 = vmul.f32 %v12085_v27, %v12085_v27 }
 0x704   : > { %v6367_v47 = vadd.f32 %v6366_v31, %v6365_v7  ;;  %v6386_v7 = vsel %vm204_vm1, %v6338_v45, 0.0  ;;  %v6341_v31 = vmul.f32 %v12088_v54, %v12088_v54 }
 0x706   : > { %v6369_v29 = vadd.f32 %v6368_v55, %v6367_v47  ;;  %v6388_v47 = vsel %vm204_vm1, %v6339_v57, 0.0  ;;  %v6342_v55 = vmul.f32 %v12091_v40, %v12091_v40 }
 0x708   : > { %v6371_v60 = vadd.f32 %v6370_v1, %v6369_v29  ;;  %v6390_v29 = vsel %vm204_vm1, %v6340_v49, 0.0  ;;  %v6343_v1 = vmul.f32 %v12093_v32, %v12093_v32 }
 0x70a   : > { %v6373_v9 = vadd.f32 %v6372_v33, %v6371_v60  ;;  %v6392_v60 = vsel %vm204_vm1, %v6341_v31, 0.0  ;;  %v6344_v33 = vmul.f32 %v12095_v8, %v12095_v8 }
 0x70c   : > { %v6375_v16 = vadd.f32 %v6374_v37, %v6373_v9  ;;  %v6394_v9 = vsel %vm204_vm1, %v6342_v55, 0.0  ;;  %v6345_v37 = vmul.f32 %v12097_v43, %v12097_v43 }
 0x70e   : > { %v6377_v18 = vadd.f32 %v6376_v5, %v6375_v16  ;;  %v6396_v16 = vsel %vm204_vm1, %v6343_v1, 0.0  ;;  %v6346_v5 = vmul.f32 %v12099_v34, %v12099_v34 }
 0x710   : > { %v6379_v23 = vadd.f32 %v6378_v42, %v6377_v18  ;;  %v6398_v18 = vsel %vm204_vm1, %v6344_v33, 0.0  ;;  %v6347_v42 = vmul.f32 %v12101_v52, %v12101_v52 }
 0x712   : > { %v6381_v10 = vadd.f32 %v6380_v4, %v6379_v23  ;;  %v6400_v23 = vsel %vm204_vm1, %v6345_v37, 0.0  ;;  %v6348_v4 = vmul.f32 %v12103_v17, %v12103_v17 }
 0x714   : > { %v6383_v44 = vadd.f32 %v6382_v30, %v6381_v10  ;;  %v6402_v10 = vsel %vm204_vm1, %v6346_v5, 0.0  ;;  %v6349_v30 = vmul.f32 %v12105_v15, %v12105_v15 }
 0x716   : > { %v6385_v12 = vadd.f32 %v6384_v6, %v6383_v44  ;;  %v6404_v44 = vsel %vm204_vm1, %v6347_v42, 0.0  ;;  %v6350_v6 = vmul.f32 %v12107_v50, %v12107_v50 }
 0x718   : > { %v6387_v2 = vadd.f32 %v6386_v7, %v6385_v12  ;;  %v6406_v12 = vsel %vm204_vm1, %v6348_v4, 0.0  ;;  %v6351_v7 = vmul.f32 %v12109_v20, %v12109_v20 }
 0x71a   : > { %v6389_v28 = vadd.f32 %v6388_v47, %v6387_v2  ;;  %v6408_v2 = vsel %vm204_vm1, %v6349_v30, 0.0  ;;  %v6352_v47 = vmul.f32 %v12111_v14, %v12111_v14 }
 0x71c   : > { %v6391_v56 = vadd.f32 %v6390_v29, %v6389_v28  ;;  %v6410_v28 = vsel %vm204_vm1, %v6350_v6, 0.0  ;;  %v6412_v29 = vsel %vm204_vm1, %v6351_v7, 0.0  ;;  %v6414_v1 = vsel %vm204_vm1, %v6352_v47, 0.0  ;;  %v6463_v6 = vld [vmem:[%s9305_s21 + $0x30] sm:$0xff]  ;;  %v6466_v7 = vld [vmem:[%s9305_s21 + $0x48] sm:$0xff]  ;;  %v6469_v47 = vld [vmem:[%s9305_s21 + $0x60] sm:$0xff] }
 0x71e   : > { %v6393_v0 = vadd.f32 %v6392_v60, %v6391_v56 }
 0x720   : > { %v6395_v13 = vadd.f32 %v6394_v9, %v6393_v0 }
 0x722   : > { %v6397_v26 = vadd.f32 %v6396_v16, %v6395_v13 }
 0x724   : > { %v6399_v63 = vadd.f32 %v6398_v18, %v6397_v26 }
 0x726   : > { %v6401_v22 = vadd.f32 %v6400_v23, %v6399_v63 }
 0x728   : > { %v6403_v45 = vadd.f32 %v6402_v10, %v6401_v22 }
 0x72a   : > { %v6405_v57 = vadd.f32 %v6404_v44, %v6403_v45 }
 0x72c   : > { %v6407_v49 = vadd.f32 %v6406_v12, %v6405_v57  ;;  %v6462_v57 = vld [vmem:[%s9305_s21 + $0x28] sm:$0xff]  ;;  %v6464_v12 = vld [vmem:[%s9305_s21 + $0x38] sm:$0xff] }
 0x72e   : > { %v6409_v31 = vadd.f32 %v6408_v2, %v6407_v49  ;;  %v6465_v49 = vld [vmem:[%s9305_s21 + $0x40] sm:$0xff]  ;;  %v6467_v2 = vld [vmem:[%s9305_s21 + $0x50] sm:$0xff] }
 0x730   : > { %v6411_v55 = vadd.f32 %v6410_v28, %v6409_v31  ;;  %v6470_v28 = vld [vmem:[%s9305_s21 + $0x68] sm:$0xff] }
 0x732   : > { %v6413_v56 = vadd.f32 %v6412_v29, %v6411_v55  ;;  %v6471_v55 = vld [vmem:[%s9305_s21 + $0x70] sm:$0xff]  ;;  %v6472_v29 = vld [vmem:[%s9305_s21 + $0x78] sm:$0xff] }
 0x734   : > { %v6415_v60 = vadd.f32 %v6414_v1, %v6413_v56  ;;  %v6473_v56 = vld [vmem:[%s9305_s21 + $0x80] sm:$0xff]  ;;  %v6474_v1 = vld [vmem:[%s9305_s21 + $0x88] sm:$0xff] }
 0x736   : > { %v6416_v0 = vrot.slane %v6415_v60, 4 }
 0x738   : > { %v6417_v33 = vadd.f32 %v6416_v0, %v6415_v60  ;;  %v6475_v60 = vld [vmem:[%s9305_s21 + $0x90] sm:$0xff] }
 0x73a   : > { %v6418_v9 = vrot.slane %v6417_v33, 2 }
 0x73c   : > { %v6419_v13 = vadd.f32 %v6418_v9, %v6417_v33 }
 0x73e   : > { %v6420_v37 = vrot.slane %v6419_v13, 1 }
 0x740   : > { %v6421_v16 = vadd.f32 %v6420_v37, %v6419_v13  ;;  %v6478_v13 = vld [vmem:[%s9305_s21 + $0xa8] sm:$0xff] }
 0x742   : > { %v6422_v26 = vmul.f32 0.00390625, %v6421_v16 }
 0x744   : > { %v6423_v5 = vadd.f32 1e-05, %v6422_v26 }
 0x746   : > { %9247 = vrsqrt.f32 %v6423_v5 }
 0x750   : > { %v9248_v18 = vpop.eup %9247 }
 0x751   : > { %v6425_v63 = vmul.f32 %v9248_v18, %v12028_v58  ;;  %v6426_v42 = vmul.f32 %v9248_v18, %v12031_v51  ;;  %v6427_v23 = vmul.f32 %v9248_v18, %v12034_v3  ;;  %v6428_v22 = vmul.f32 %v9248_v18, %v12037_v46 }
 0x752   : > { %v6429_v4 = vmul.f32 %v9248_v18, %v12040_v36  ;;  %v6430_v10 = vmul.f32 %v9248_v18, %v12043_v35  ;;  %v6431_v45 = vmul.f32 %v9248_v18, %v12046_v25  ;;  %v6432_v30 = vmul.f32 %v9248_v18, %v12049_v41 }
 0x753   : > { %v6433_v58 = vmul.f32 %v9248_v18, %v12052_v62  ;;  %v6434_v51 = vmul.f32 %v9248_v18, %v12055_v21  ;;  %v6435_v3 = vmul.f32 %v9248_v18, %v12058_v61  ;;  %v6436_v46 = vmul.f32 %v9248_v18, %v12061_v19  ;;  %v6457_v62 = vld [vmem:[%s9305_s21] sm:$0xff]  ;;  %v6458_v21 = vld [vmem:[%s9305_s21 + $0x8] sm:$0xff]  ;;  %v6459_v61 = vld [vmem:[%s9305_s21 + $0x10] sm:$0xff] }
 0x754   : > { %v12222_v36 = vmul.f32 %v9248_v18, %v12064_v11  ;;  %v12225_v35 = vmul.f32 %v9248_v18, %v12067_v59  ;;  %v12228_v25 = vmul.f32 %v9248_v18, %v12070_v38  ;;  %v12231_v41 = vmul.f32 %v9248_v18, %v12073_v39  ;;  %v6460_v19 = vld [vmem:[%s9305_s21 + $0x18] sm:$0xff]  ;;  %v6461_v39 = vld [vmem:[%s9305_s21 + $0x20] sm:$0xff] }
 0x755   : > { %v12238_v44 = vmul.f32 %v9248_v18, %v12076_v48  ;;  %v12241_v11 = vmul.f32 %v9248_v18, %v12079_v24  ;;  %v12244_v59 = vmul.f32 %v9248_v18, %v12082_v53  ;;  %v12247_v38 = vmul.f32 %v9248_v18, %v12085_v27 }
 0x756   : > { %v12254_v48 = vmul.f32 %v9248_v18, %v12088_v54  ;;  %v12257_v24 = vmul.f32 %v9248_v18, %v12091_v40  ;;  %v12260_v53 = vmul.f32 %v9248_v18, %v12093_v32  ;;  %v12263_v27 = vmul.f32 %v9248_v18, %v12095_v8  ;;  %v6468_v8 = vld [vmem:[%s9305_s21 + $0x58] sm:$0xff] }
 0x757   : > { %v12269_v31 = vmul.f32 %v9248_v18, %v12097_v43  ;;  %v12272_v54 = vmul.f32 %v9248_v18, %v12099_v34  ;;  %v12275_v40 = vmul.f32 %v9248_v18, %v12101_v52  ;;  %v12278_v32 = vmul.f32 %v9248_v18, %v12103_v17 }
 0x758   : > { %v12291_v43 = vmul.f32 %v9248_v18, %v12105_v15  ;;  %v12294_v34 = vmul.f32 %v9248_v18, %v12107_v50  ;;  %v12297_v52 = vmul.f32 %v9248_v18, %v12109_v20  ;;  %v12300_v17 = vmul.f32 %v9248_v18, %v12111_v14  ;;  %v6476_v15 = vld [vmem:[%s9305_s21 + $0x98] sm:$0xff]  ;;  %v6477_v20 = vld [vmem:[%s9305_s21 + $0xa0] sm:$0xff]  ;;  %v6479_v14 = vld [vmem:[%s9305_s21 + $0xb0] sm:$0xff] }
 0x759   : > { %v6489_v0 = vadd.f32 %v6457_v62, %v6425_v63  ;;  %v6490_v33 = vadd.f32 %v6458_v21, %v6426_v42  ;;  %v6491_v9 = vadd.f32 %v6459_v61, %v6427_v23  ;;  %v6492_v50 = vadd.f32 %v6460_v19, %v6428_v22  ;;  %v6480_v18 = vld [vmem:[%s9305_s21 + $0xb8] sm:$0xff]  ;;  %v6482_v63 = vld [vmem:[%s9305_s21 + $0xc8] sm:$0xff] }
 0x75a   : > { %12763 = vst [vmem:[#allocation41_spill] sm:$0xff] %v12300_v17  ;;  %v6493_v37 = vadd.f32 %v6461_v39, %v6429_v4  ;;  %v6494_v16 = vadd.f32 %v6462_v57, %v6430_v10  ;;  %v6495_v26 = vadd.f32 %v6463_v6, %v6431_v45  ;;  %v6496_v5 = vadd.f32 %v6464_v12, %v6432_v30  ;;  %v6481_v17 = vld [vmem:[%s9305_s21 + $0xc0] sm:$0xff]  ;;  %v6483_v4 = vld [vmem:[%s9305_s21 + $0xd0] sm:$0xff]  ;;  %v6484_v10 = vld [vmem:[%s9305_s21 + $0xd8] sm:$0xff] }
 0x75b   : > { %v6497_v42 = vadd.f32 %v6465_v49, %v6433_v58  ;;  %v6498_v23 = vadd.f32 %v6466_v7, %v6434_v51  ;;  %v6499_v22 = vadd.f32 %v6467_v2, %v6435_v3  ;;  %v6500_v62 = vadd.f32 %v6468_v8, %v6436_v46  ;;  %6521 = vst.msk [vmem:[%s12288_s6] sm:$0xff] %vm204_vm1, %v6489_v0  ;;  %v6485_v45 = vld [vmem:[%s9305_s21 + $0xe0] sm:$0xff]  ;;  %v6486_v46 = vld [vmem:[%s9305_s21 + $0xe8] sm:$0xff] }
 0x75c   : > { %6522 = vst.msk [vmem:[%s12288_s6 + $0x8] sm:$0xff] %vm204_vm1, %v6490_v33  ;;  %6523 = vst.msk [vmem:[%s12288_s6 + $0x10] sm:$0xff] %vm204_vm1, %v6491_v9  ;;  %v6501_v30 = vadd.f32 %v6469_v47, %v12222_v36  ;;  %v6502_v58 = vadd.f32 %v6470_v28, %v12225_v35  ;;  %v6503_v51 = vadd.f32 %v6471_v55, %v12228_v25  ;;  %v6487_v36 = vld [vmem:[%s9305_s21 + $0xf0] sm:$0xff]  ;;  %v6488_v35 = vld [vmem:[%s9305_s21 + $0xf8] sm:$0xff] }
 0x75d   : > { %6524 = vst.msk [vmem:[%s12288_s6 + $0x18] sm:$0xff] %vm204_vm1, %v6492_v50  ;;  %v6504_v3 = vadd.f32 %v6472_v29, %v12231_v41  ;;  %6525 = vst.msk [vmem:[%s12288_s6 + $0x20] sm:$0xff] %vm204_vm1, %v6493_v37  ;;  %v6505_v25 = vadd.f32 %v6473_v56, %v12238_v44  ;;  %v6506_v21 = vadd.f32 %v6474_v1, %v12241_v11 }
 0x75e   : > { %6526 = vst.msk [vmem:[%s12288_s6 + $0x28] sm:$0xff] %vm204_vm1, %v6494_v16  ;;  %6527 = vst.msk [vmem:[%s12288_s6 + $0x30] sm:$0xff] %vm204_vm1, %v6495_v26  ;;  %v6507_v41 = vadd.f32 %v6475_v60, %v12244_v59  ;;  %v6508_v61 = vadd.f32 %v6476_v15, %v12247_v38  ;;  %v6509_v19 = vadd.f32 %v6477_v20, %v12254_v48 }
 0x75f   : > { %6528 = vst.msk [vmem:[%s12288_s6 + $0x38] sm:$0xff] %vm204_vm1, %v6496_v5  ;;  %6529 = vst.msk [vmem:[%s12288_s6 + $0x40] sm:$0xff] %vm204_vm1, %v6497_v42  ;;  %v6510_v44 = vadd.f32 %v6478_v13, %v12257_v24  ;;  %v6511_v11 = vadd.f32 %v6479_v14, %v12260_v53  ;;  %v6512_v59 = vadd.f32 %v6480_v18, %v12263_v27 }
 0x760   : > { %6530 = vst.msk [vmem:[%s12288_s6 + $0x48] sm:$0xff] %vm204_vm1, %v6498_v23  ;;  %6531 = vst.msk [vmem:[%s12288_s6 + $0x50] sm:$0xff] %vm204_vm1, %v6499_v22  ;;  %v6513_v38 = vadd.f32 %v6481_v17, %v12269_v31  ;;  %v6514_v39 = vadd.f32 %v6482_v63, %v12272_v54  ;;  %v6515_v57 = vadd.f32 %v6483_v4, %v12275_v40 }
 0x761   : > { %6532 = vst.msk [vmem:[%s12288_s6 + $0x58] sm:$0xff] %vm204_vm1, %v6500_v62  ;;  %6533 = vst.msk [vmem:[%s12288_s6 + $0x60] sm:$0xff] %vm204_vm1, %v6501_v30  ;;  %v6516_v6 = vadd.f32 %v6484_v10, %v12278_v32  ;;  %v6517_v12 = vadd.f32 %v6485_v45, %v12291_v43  ;;  %v6518_v48 = vadd.f32 %v6486_v46, %v12294_v34  ;;  %v12764_v53 = vld [vmem:[#allocation41_spill] sm:$0xff] }
 0x762   : > { %6534 = vst.msk [vmem:[%s12288_s6 + $0x68] sm:$0xff] %vm204_vm1, %v6502_v58  ;;  %6535 = vst.msk [vmem:[%s12288_s6 + $0x70] sm:$0xff] %vm204_vm1, %v6503_v51  ;;  %v6519_v24 = vadd.f32 %v6487_v36, %v12297_v52  ;;  %v6520_v27 = vadd.f32 %v6488_v35, %v12764_v53 }
 0x763   : > { %6536 = vst.msk [vmem:[%s12288_s6 + $0x78] sm:$0xff] %vm204_vm1, %v6504_v3  ;;  %6537 = vst.msk [vmem:[%s12288_s6 + $0x80] sm:$0xff] %vm204_vm1, %v6505_v25 }
 0x764   : > { %6538 = vst.msk [vmem:[%s12288_s6 + $0x88] sm:$0xff] %vm204_vm1, %v6506_v21  ;;  %6539 = vst.msk [vmem:[%s12288_s6 + $0x90] sm:$0xff] %vm204_vm1, %v6507_v41 }
 0x765   : > { %6540 = vst.msk [vmem:[%s12288_s6 + $0x98] sm:$0xff] %vm204_vm1, %v6508_v61  ;;  %6541 = vst.msk [vmem:[%s12288_s6 + $0xa0] sm:$0xff] %vm204_vm1, %v6509_v19 }
 0x766   : > { %6542 = vst.msk [vmem:[%s12288_s6 + $0xa8] sm:$0xff] %vm204_vm1, %v6510_v44  ;;  %6543 = vst.msk [vmem:[%s12288_s6 + $0xb0] sm:$0xff] %vm204_vm1, %v6511_v11 }
 0x767   : > { %6544 = vst.msk [vmem:[%s12288_s6 + $0xb8] sm:$0xff] %vm204_vm1, %v6512_v59  ;;  %6545 = vst.msk [vmem:[%s12288_s6 + $0xc0] sm:$0xff] %vm204_vm1, %v6513_v38 }
 0x768   : > { %6546 = vst.msk [vmem:[%s12288_s6 + $0xc8] sm:$0xff] %vm204_vm1, %v6514_v39  ;;  %6547 = vst.msk [vmem:[%s12288_s6 + $0xd0] sm:$0xff] %vm204_vm1, %v6515_v57 }
 0x769   : > { %6548 = vst.msk [vmem:[%s12288_s6 + $0xd8] sm:$0xff] %vm204_vm1, %v6516_v6  ;;  %6549 = vst.msk [vmem:[%s12288_s6 + $0xe0] sm:$0xff] %vm204_vm1, %v6517_v12 }
 0x76a   : > { %6550 = vst.msk [vmem:[%s12288_s6 + $0xe8] sm:$0xff] %vm204_vm1, %v6518_v48  ;;  %6551 = vst.msk [vmem:[%s12288_s6 + $0xf0] sm:$0xff] %vm204_vm1, %v6519_v24 }
 0x76b   : > { %6552 = vst.msk [vmem:[%s12288_s6 + $0xf8] sm:$0xff] %vm204_vm1, %v6520_v27 }
 0x76c PF: > { %s13_s12 = sadd.s32 1, %s9255_s12  }
 0x76d   : > { %p10_p4 = scmp.ge.s32.totalorder %s13_s12, 4  }
 0x76f   :  { %12 = sbr.rel (!%p10_p4) target bundleno = 1 (0x1), region = 80 }

</bundles_post_ra>
